<compile_context>
chip_gen: v7x
topology: tpu7x:2x2x1
jax: 0.10.0
libtpu: 0.0.40
codegen_flags: <defaults>
</compile_context>

<pallas_src>
import functools
import math

import jax
import jax.numpy as jnp
import numpy as np
from jax.experimental import pallas as pl
from jax.experimental.pallas import tpu as pltpu

VMEM = pl.BlockSpec(memory_space=pltpu.MemorySpace.VMEM)
LN_EPS = 1e-5


# ------------------------------------------------------------------ in-kernel helpers

def _layer_norm(x, g, b, eps=LN_EPS):
    m = jnp.mean(x, axis=-1, keepdims=True)
    v = jnp.mean((x - m) ** 2, axis=-1, keepdims=True)
    return (x - m) * jax.lax.rsqrt(v + eps) * g + b


def _conv1d_same(x2, w, b, B, S, K):
    """'same' Conv1d along S as K shifted bf16 matmuls accumulated in f32.

    No im2col: avoids the (B, S, K*C) cols buffer and the pad copy; each tap is one
    (B*S, Cin) @ (Cin, Cout) MXU matmul against its weight panel.
    x2: (B*S, Cin) f32, rows ordered (b, s);  w: (K*Cin, Cout) bf16;  b: (1, Cout) f32.
    """
    M, Cin = x2.shape
    Cout = w.shape[-1]
    pad = K // 2
    # s-position of every row (3-D iota merged back to 2-D; avoids integer remainder).
    s_idx = jax.lax.broadcasted_iota(jnp.int32, (B, S, Cin), 1).reshape(M, Cin)
    acc = jnp.zeros((M, Cout), jnp.float32) + b
    for k in range(K):
        d = k - pad                      # output row s reads input row s + d
        if d == 0:
            xs = x2
        elif d > 0:
            # shift rows up by d with zero fill, mask rows whose source crossed a batch edge
            # TODO(synk): pltpu.roll (XLU slot) + mask is the cheaper shift at production sizes.
            xs = jnp.concatenate([x2[d:, :], jnp.zeros((d, Cin), jnp.float32)], axis=0)
            xs = jnp.where(s_idx < S - d, xs, 0.0)
        else:
            xs = jnp.concatenate([jnp.zeros((-d, Cin), jnp.float32), x2[:M + d, :]], axis=0)
            xs = jnp.where(s_idx >= -d, xs, 0.0)
        acc = acc + jnp.dot(xs.astype(jnp.bfloat16), w[k * Cin:(k + 1) * Cin, :],
                            preferred_element_type=jnp.float32)
    return acc


def _attention_into(ctx_ref, qkv, B, S, H, num_heads):
    """nn.MultiheadAttention(batch_first=False) quirk: the (B, S, H) activation is
    interpreted as (L=B, N=S, E=H), so attention mixes over the batch axis (length B),
    batched over (s, head).

    qkv: (B*S, 3H) f32, rows ordered (b, s).  Vectorised over all keys / lanes per
    (query-row, head); each head's context is written straight into its lane slice of
    the ctx scratch (no concatenates).  Softmax kept exact in f32.
    """
    dh = H // num_heads
    scale = 1.0 / math.sqrt(dh)
    for hh in range(num_heads):
        lo = hh * dh
        kh = qkv[:, H + lo:H + lo + dh].reshape(B, S, dh)          # all keys   (B, S, dh)
        vh = qkv[:, 2 * H + lo:2 * H + lo + dh].reshape(B, S, dh)  # all values (B, S, dh)
        for lq in range(B):
            qh = qkv[lq * S:(lq + 1) * S, lo:lo + dh]              # (S, dh)
            s = jnp.sum(qh[None, :, :] * kh, axis=-1, keepdims=True) * scale   # (B, S, 1)
            m = jnp.max(s, axis=0, keepdims=True)
            e = jnp.exp(s - m)
            p = e / jnp.sum(e, axis=0, keepdims=True)
            ctx_ref[lq * S:(lq + 1) * S, lo:lo + dh] = jnp.sum(p * vh, axis=0)
    return ctx_ref[...]


# ------------------------------------------------------------------ fused forward kernel

def _fastspeech_kernel(x_ref,
                       wqkv_ref, bqkv_ref, wo_ref, bo_ref, ln1g_ref, ln1b_ref,
                       w1_ref, b1_ref, w2_ref, b2_ref, ln2g_ref, ln2b_ref,
                       dw1_ref, db1_ref, dln1g_ref, dln1b_ref,
                       dw2_ref, db2_ref, dln2g_ref, dln2b_ref, dlw_ref, dlb_ref,
                       melw_ref, melb_ref,
                       mel_ref, dur_ref,
                       ctx_ref,
                       *, num_blocks, num_heads, conv_k):
    B, S, H = x_ref.shape
    bf16 = jnp.bfloat16
    x2 = x_ref[...].reshape(B * S, H)             # f32 residual stream, VMEM/vreg resident

    def fft_block(x2, blk):
        # fused QKV projection (bf16 MXU operands, f32 accumulation)
        qkv = jnp.dot(x2.astype(bf16), wqkv_ref[blk],
                      preferred_element_type=jnp.float32) + bqkv_ref[blk]
        ctx = _attention_into(ctx_ref, qkv, B, S, H, num_heads)
        attn = jnp.dot(ctx.astype(bf16), wo_ref[blk],
                       preferred_element_type=jnp.float32) + bo_ref[blk]
        y = _layer_norm(x2 + attn, ln1g_ref[blk], ln1b_ref[blk])
        h = jnp.maximum(_conv1d_same(y, w1_ref[blk], b1_ref[blk], B, S, conv_k), 0.0)
        h = _conv1d_same(h, w2_ref[blk], b2_ref[blk], B, S, conv_k)
        return _layer_norm(y + h, ln2g_ref[blk], ln2b_ref[blk])

    # encoder
    for blk in range(num_blocks):
        x2 = fft_block(x2, blk)

    # duration predictor on the encoder output
    h = jnp.maximum(_conv1d_same(x2, dw1_ref[...], db1_ref[...], B, S, conv_k), 0.0)
    h = _layer_norm(h, dln1g_ref[...], dln1b_ref[...])
    h = jnp.maximum(_conv1d_same(h, dw2_ref[...], db2_ref[...], B, S, conv_k), 0.0)
    h = _layer_norm(h, dln2g_ref[...], dln2b_ref[...])
    # (H -> 1) head emitted lane-dense as a (1, B*S) row (unmasked vst, not a 1-lane store)
    dur_ref[...] = (jnp.dot(dlw_ref[...], h.T, preferred_element_type=jnp.float32)
                    + dlb_ref[...])

    # decoder
    for blk in range(num_blocks, 2 * num_blocks):
        x2 = fft_block(x2, blk)

    # mel head: N padded to a full 128-lane slab (sliced back in the wrapper)
    mel_ref[...] = (jnp.dot(x2.astype(bf16), melw_ref[...],
                            preferred_element_type=jnp.float32) + melb_ref[...])


# ------------------------------------------------------------------ wrapper

def fastspeech_forward(packed, phonemes, *, num_blocks, num_heads, conv_k, mel_dim):
    # Embedding lookup (gather) kept in plain JAX glue.
    x = jnp.take(packed['emb'], phonemes, axis=0)                  # (B, S, H)
    B, S, H = x.shape
    MELP = packed['melw'].shape[-1]
    kernel = functools.partial(_fastspeech_kernel, num_blocks=num_blocks,
                               num_heads=num_heads, conv_k=conv_k)
    mel_pad, dur_row = pl.pallas_call(
        kernel,
        out_shape=(jax.ShapeDtypeStruct((B * S, MELP), jnp.float32),
                   jax.ShapeDtypeStruct((1, B * S), jnp.float32)),
        in_specs=[VMEM] * 25,
        out_specs=(VMEM, VMEM),
        scratch_shapes=[pltpu.VMEM((B * S, H), jnp.float32)],
        compiler_params=pltpu.CompilerParams(vmem_limit_bytes=32 * 1024 * 1024),
    )(x,
      packed['wqkv'], packed['bqkv'], packed['wo'], packed['bo'],
      packed['ln1g'], packed['ln1b'],
      packed['w1'], packed['b1'], packed['w2'], packed['b2'],
      packed['ln2g'], packed['ln2b'],
      packed['dw1'], packed['db1'], packed['dln1g'], packed['dln1b'],
      packed['dw2'], packed['db2'], packed['dln2g'], packed['dln2b'],
      packed['dlw'], packed['dlb'],
      packed['melw'], packed['melb'])
    mel = mel_pad[:, :mel_dim].reshape(B, S, mel_dim)
    pred_dur = dur_row.reshape(B, S)
    # TODO(synk): length_regulator (data-dependent repeat_interleave) only runs when
    # durations is provided; the durations=None forward path skips it, as here.
    return mel, pred_dur


# ------------------------------------------------------------------ params (deterministic)

def _uniform(key, shape, bound):
    return jax.random.uniform(key, shape, jnp.float32, -bound, bound)


def init_fft_block(key, H, K, expansion):
    ks = jax.random.split(key, 12)
    bH = 1.0 / math.sqrt(H)
    bcH = 1.0 / math.sqrt(H * K)
    bcE = 1.0 / math.sqrt(expansion * K)
    return {
        'attn': {
            'wq': _uniform(ks[0], (H, H), bH), 'bq': _uniform(ks[1], (H,), bH),
            'wk': _uniform(ks[2], (H, H), bH), 'bk': _uniform(ks[3], (H,), bH),
            'wv': _uniform(ks[4], (H, H), bH), 'bv': _uniform(ks[5], (H,), bH),
            'wo': _uniform(ks[6], (H, H), bH), 'bo': _uniform(ks[7], (H,), bH),
        },
        'ln1_g': jnp.ones((H,), jnp.float32), 'ln1_b': jnp.zeros((H,), jnp.float32),
        'conv1_w': _uniform(ks[8], (K, H, expansion), bcH),
        'conv1_b': _uniform(ks[9], (expansion,), bcH),
        'conv2_w': _uniform(ks[10], (K, expansion, H), bcE),
        'conv2_b': _uniform(ks[11], (H,), bcE),
        'ln2_g': jnp.ones((H,), jnp.float32), 'ln2_b': jnp.zeros((H,), jnp.float32),
    }


def init_duration_predictor(key, H, K):
    ks = jax.random.split(key, 6)
    bcH = 1.0 / math.sqrt(H * K)
    bH = 1.0 / math.sqrt(H)
    return {
        'conv1_w': _uniform(ks[0], (K, H, H), bcH), 'conv1_b': _uniform(ks[1], (H,), bcH),
        'ln1_g': jnp.ones((H,), jnp.float32), 'ln1_b': jnp.zeros((H,), jnp.float32),
        'conv2_w': _uniform(ks[2], (K, H, H), bcH), 'conv2_b': _uniform(ks[3], (H,), bcH),
        'ln2_g': jnp.ones((H,), jnp.float32), 'ln2_b': jnp.zeros((H,), jnp.float32),
        'lin_w': _uniform(ks[4], (H, 1), bH), 'lin_b': _uniform(ks[5], (1,), bH),
    }


def init_params(key, *, vocab, H, blocks, K, expansion, mel):
    k_emb, k_enc, k_dec, k_dur, k_l1, k_l2 = jax.random.split(key, 6)
    bH = 1.0 / math.sqrt(H)
    return {
        'emb': jax.random.normal(k_emb, (vocab, H), jnp.float32),
        'encoder': [init_fft_block(k, H, K, expansion) for k in jax.random.split(k_enc, blocks)],
        'decoder': [init_fft_block(k, H, K, expansion) for k in jax.random.split(k_dec, blocks)],
        'dur': init_duration_predictor(k_dur, H, K),
        'lin_w': _uniform(k_l1, (H, mel), bH),
        'lin_b': _uniform(k_l2, (mel,), bH),
    }


# ------------------------------------------------------------------ param packing (done once)

def pack_params(params):
    bf16 = jnp.bfloat16
    fft = params['encoder'] + params['decoder']          # encoder blocks first, then decoder
    K, H, E = params['encoder'][0]['conv1_w'].shape
    dp = params['dur']
    MEL = params['lin_w'].shape[1]
    MELP = max(128, ((MEL + 127) // 128) * 128)
    melw = jnp.zeros((H, MELP), jnp.float32).at[:, :MEL].set(params['lin_w'])
    melb = jnp.zeros((1, MELP), jnp.float32).at[0, :MEL].set(params['lin_b'])

    def stack(fn, dtype=jnp.float32):
        return jnp.stack([fn(p).astype(dtype) for p in fft], axis=0)

    return {
        'emb': params['emb'],
        'wqkv': stack(lambda p: jnp.concatenate(
            [p['attn']['wq'], p['attn']['wk'], p['attn']['wv']], axis=1), bf16),
        'bqkv': stack(lambda p: jnp.concatenate(
            [p['attn']['bq'], p['attn']['bk'], p['attn']['bv']]).reshape(1, -1)),
        'wo': stack(lambda p: p['attn']['wo'], bf16),
        'bo': stack(lambda p: p['attn']['bo'].reshape(1, -1)),
        'ln1g': stack(lambda p: p['ln1_g'].reshape(1, -1)),
        'ln1b': stack(lambda p: p['ln1_b'].reshape(1, -1)),
        'w1': stack(lambda p: p['conv1_w'].reshape(K * H, E), bf16),
        'b1': stack(lambda p: p['conv1_b'].reshape(1, -1)),
        'w2': stack(lambda p: p['conv2_w'].reshape(K * E, H), bf16),
        'b2': stack(lambda p: p['conv2_b'].reshape(1, -1)),
        'ln2g': stack(lambda p: p['ln2_g'].reshape(1, -1)),
        'ln2b': stack(lambda p: p['ln2_b'].reshape(1, -1)),
        'dw1': dp['conv1_w'].reshape(K * H, H).astype(bf16),
        'db1': dp['conv1_b'].reshape(1, -1),
        'dln1g': dp['ln1_g'].reshape(1, -1), 'dln1b': dp['ln1_b'].reshape(1, -1),
        'dw2': dp['conv2_w'].reshape(K * H, H).astype(bf16),
        'db2': dp['conv2_b'].reshape(1, -1),
        'dln2g': dp['ln2_g'].reshape(1, -1), 'dln2b': dp['ln2_b'].reshape(1, -1),
        'dlw': dp['lin_w'].reshape(1, H),                 # (H,1) -> (1,H) row vector
        'dlb': dp['lin_b'].reshape(1, 1),
        'melw': melw.astype(bf16),
        'melb': melb,
    }


# ------------------------------------------------------------------ pure-JAX reference

def _ref_linear(x, w, b):
    return x @ w + b


def _ref_layer_norm(x, g, b, eps=LN_EPS):
    m = jnp.mean(x, -1, keepdims=True)
    v = jnp.mean((x - m) ** 2, -1, keepdims=True)
    return (x - m) * jax.lax.rsqrt(v + eps) * g + b


def _ref_conv1d(x, w, b, relu):
    K = w.shape[0]
    pad = K // 2
    L = x.shape[1]
    xp = jnp.pad(x, ((0, 0), (pad, pad), (0, 0)))
    out = b
    for k in range(K):
        out = out + jnp.einsum('bli,io->blo', xp[:, k:k + L, :], w[k])
    return jnp.maximum(out, 0.0) if relu else out


def _ref_mha(x, p, num_heads):
    L, N, E = x.shape
    d = E // num_heads
    q = _ref_linear(x, p['wq'], p['bq'])
    k = _ref_linear(x, p['wk'], p['bk'])
    v = _ref_linear(x, p['wv'], p['bv'])
    sp = lambda t: t.reshape(L, N * num_heads, d).transpose(1, 0, 2)
    qh, kh, vh = sp(q), sp(k), sp(v)
    s = jnp.einsum('bqd,bkd->bqk', qh, kh) * (1.0 / math.sqrt(d))
    a = jax.nn.softmax(s, axis=-1)
    ctx = jnp.einsum('bqk,bkd->bqd', a, vh).transpose(1, 0, 2).reshape(L, N, E)
    return _ref_linear(ctx, p['wo'], p['bo'])


def _ref_fft_block(x, p, num_heads):
    x = _ref_layer_norm(x + _ref_mha(x, p['attn'], num_heads), p['ln1_g'], p['ln1_b'])
    h = _ref_conv1d(x, p['conv1_w'], p['conv1_b'], True)
    h = _ref_conv1d(h, p['conv2_w'], p['conv2_b'], False)
    return _ref_layer_norm(x + h, p['ln2_g'], p['ln2_b'])


def ref_forward(params, phonemes, *, num_heads):
    x = jnp.take(params['emb'], phonemes, axis=0)
    for p in params['encoder']:
        x = _ref_fft_block(x, p, num_heads)
    dp = params['dur']
    h = _ref_conv1d(x, dp['conv1_w'], dp['conv1_b'], True)
    h = _ref_layer_norm(h, dp['ln1_g'], dp['ln1_b'])
    h = _ref_conv1d(h, dp['conv2_w'], dp['conv2_b'], True)
    h = _ref_layer_norm(h, dp['ln2_g'], dp['ln2_b'])
    pred_dur = _ref_linear(h, dp['lin_w'], dp['lin_b'])[..., 0]
    for p in params['decoder']:
        x = _ref_fft_block(x, p, num_heads)
    mel = _ref_linear(x, params['lin_w'], params['lin_b'])
    return mel, pred_dur


# ------------------------------------------------------------------ main

if __name__ == "__main__":
    # Small shapes consistent with the module: B=2, S=8 phoneme tokens,
    # hidden=32, heads=2, blocks=2, kernel=3, conv_expansion=64, mel_dim=16.
    B, S = 2, 8
    VOCAB, H, HEADS, BLOCKS, K, EXP, MEL = 51, 32, 2, 2, 3, 64, 16

    root = jax.random.PRNGKey(0)
    k_inp, k_par = jax.random.split(root)
    params = init_params(k_par, vocab=VOCAB, H=H, blocks=BLOCKS, K=K, expansion=EXP, mel=MEL)
    packed = pack_params(params)     # one-time weight packing (QKV concat, bf16 cast, stacking)
    phonemes = jax.random.randint(k_inp, (B, S), 0, VOCAB, dtype=jnp.int32)

    fwd = jax.jit(functools.partial(fastspeech_forward, num_blocks=BLOCKS, num_heads=HEADS,
                                    conv_k=K, mel_dim=MEL))
    mel, pred_dur = fwd(packed, phonemes)
    jax.block_until_ready((mel, pred_dur))

    assert mel.shape == (B, S, MEL)
    assert pred_dur.shape == (B, S)

    mel_ref, dur_ref = ref_forward(params, phonemes, num_heads=HEADS)
    # bf16 MXU operands (f32 accumulation / LN / softmax) => slightly looser tolerance
    # than the pure-f32 version; still tight enough to catch any structural error.
    np.testing.assert_allclose(np.asarray(mel), np.asarray(mel_ref), rtol=5e-2, atol=5e-2)
    np.testing.assert_allclose(np.asarray(pred_dur), np.asarray(dur_ref), rtol=5e-2, atol=5e-2)

    print("KERNEL_OK")
</pallas_src>

<mosaic_0001>
module attributes {stable_mosaic.version = 11 : i64} {
  func.func @_fastspeech_kernel(%arg0: memref<2x8x32xf32, #tpu.memory_space<vmem>>, %arg1: memref<4x32x96xbf16, #tpu.memory_space<vmem>>, %arg2: memref<4x1x96xf32, #tpu.memory_space<vmem>>, %arg3: memref<4x32x32xbf16, #tpu.memory_space<vmem>>, %arg4: memref<4x1x32xf32, #tpu.memory_space<vmem>>, %arg5: memref<4x1x32xf32, #tpu.memory_space<vmem>>, %arg6: memref<4x1x32xf32, #tpu.memory_space<vmem>>, %arg7: memref<4x96x64xbf16, #tpu.memory_space<vmem>>, %arg8: memref<4x1x64xf32, #tpu.memory_space<vmem>>, %arg9: memref<4x192x32xbf16, #tpu.memory_space<vmem>>, %arg10: memref<4x1x32xf32, #tpu.memory_space<vmem>>, %arg11: memref<4x1x32xf32, #tpu.memory_space<vmem>>, %arg12: memref<4x1x32xf32, #tpu.memory_space<vmem>>, %arg13: memref<96x32xbf16, #tpu.memory_space<vmem>>, %arg14: memref<1x32xf32, #tpu.memory_space<vmem>>, %arg15: memref<1x32xf32, #tpu.memory_space<vmem>>, %arg16: memref<1x32xf32, #tpu.memory_space<vmem>>, %arg17: memref<96x32xbf16, #tpu.memory_space<vmem>>, %arg18: memref<1x32xf32, #tpu.memory_space<vmem>>, %arg19: memref<1x32xf32, #tpu.memory_space<vmem>>, %arg20: memref<1x32xf32, #tpu.memory_space<vmem>>, %arg21: memref<1x32xf32, #tpu.memory_space<vmem>>, %arg22: memref<1x1xf32, #tpu.memory_space<vmem>>, %arg23: memref<32x128xbf16, #tpu.memory_space<vmem>>, %arg24: memref<1x128xf32, #tpu.memory_space<vmem>>, %arg25: memref<16x128xf32, #tpu.memory_space<vmem>>, %arg26: memref<1x16xf32, #tpu.memory_space<vmem>>, %arg27: memref<16x32xf32, #tpu.memory_space<vmem>>) attributes {dimension_semantics = [], scalar_prefetch = 0 : i64, scratch_operands = 1 : i64, tpu.core_type = #tpu.core_type<tc>} {
    %c0 = arith.constant 0 : index
    %c0_0 = arith.constant 0 : index
    %c0_1 = arith.constant 0 : index
    %0 = vector.load %arg0[%c0, %c0_0, %c0_1] : memref<2x8x32xf32, #tpu.memory_space<vmem>>, vector<2x8x32xf32>
    %1 = vector.shape_cast %0 : vector<2x8x32xf32> to vector<16x32xf32>
    %2 = arith.truncf %1 : vector<16x32xf32> to vector<16x32xbf16>
    %c0_2 = arith.constant 0 : index
    %c0_3 = arith.constant 0 : index
    %c0_4 = arith.constant 0 : index
    %3 = vector.load %arg1[%c0_2, %c0_3, %c0_4] : memref<4x32x96xbf16, #tpu.memory_space<vmem>>, vector<1x32x96xbf16>
    %4 = vector.shape_cast %3 : vector<1x32x96xbf16> to vector<32x96xbf16>
    %cst = arith.constant dense<0.000000e+00> : vector<16x96xf32>
    %5 = tpu.matmul %2, %4, %cst {dimension_numbers = #tpu.dot_dimension_numbers<[1], [0], [0], [1], [0, 0, 1, 1], [], []>} : vector<16x32xbf16>, vector<32x96xbf16>, vector<16x96xf32> -> vector<16x96xf32>
    %c0_5 = arith.constant 0 : index
    %c0_6 = arith.constant 0 : index
    %c0_7 = arith.constant 0 : index
    %6 = vector.load %arg2[%c0_5, %c0_6, %c0_7] : memref<4x1x96xf32, #tpu.memory_space<vmem>>, vector<1x1x96xf32>
    %7 = vector.shape_cast %6 : vector<1x1x96xf32> to vector<1x96xf32>
    %8 = vector.broadcast %7 : vector<1x96xf32> to vector<16x96xf32>
    %9 = arith.addf %5, %8 : vector<16x96xf32>
    %10 = vector.extract_strided_slice %9 {offsets = [0, 32], sizes = [16, 16], strides = [1, 1]} : vector<16x96xf32> to vector<16x16xf32>
    %11 = vector.shape_cast %10 : vector<16x16xf32> to vector<2x8x16xf32>
    %12 = vector.extract_strided_slice %9 {offsets = [0, 64], sizes = [16, 16], strides = [1, 1]} : vector<16x96xf32> to vector<16x16xf32>
    %13 = vector.shape_cast %12 : vector<16x16xf32> to vector<2x8x16xf32>
    %14 = vector.extract_strided_slice %9 {offsets = [0, 0], sizes = [8, 16], strides = [1, 1]} : vector<16x96xf32> to vector<8x16xf32>
    %15 = vector.shape_cast %14 : vector<8x16xf32> to vector<1x8x16xf32>
    %16 = vector.broadcast %15 : vector<1x8x16xf32> to vector<2x8x16xf32>
    %17 = arith.mulf %16, %11 : vector<2x8x16xf32>
    %cst_8 = arith.constant dense<0.000000e+00> : vector<2x8xf32>
    %18 = vector.multi_reduction <add>, %17, %cst_8 [2] : vector<2x8x16xf32> to vector<2x8xf32>
    %19 = vector.shape_cast %18 : vector<2x8xf32> to vector<2x8x1xf32>
    %cst_9 = arith.constant 2.500000e-01 : f32
    %20 = vector.broadcast %cst_9 : f32 to vector<2x8x1xf32>
    %21 = arith.mulf %19, %20 : vector<2x8x1xf32>
    %cst_10 = arith.constant dense<0xFF800000> : vector<8x1xf32>
    %22 = vector.multi_reduction <maximumf>, %21, %cst_10 [0] : vector<2x8x1xf32> to vector<8x1xf32>
    %23 = vector.shape_cast %22 : vector<8x1xf32> to vector<1x8x1xf32>
    %24 = vector.broadcast %23 : vector<1x8x1xf32> to vector<2x8x1xf32>
    %25 = arith.subf %21, %24 : vector<2x8x1xf32>
    %26 = math.exp %25 : vector<2x8x1xf32>
    %cst_11 = arith.constant dense<0.000000e+00> : vector<8x1xf32>
    %27 = vector.multi_reduction <add>, %26, %cst_11 [0] : vector<2x8x1xf32> to vector<8x1xf32>
    %28 = vector.shape_cast %27 : vector<8x1xf32> to vector<1x8x1xf32>
    %29 = vector.broadcast %28 : vector<1x8x1xf32> to vector<2x8x1xf32>
    %30 = arith.divf %26, %29 : vector<2x8x1xf32>
    %31 = vector.broadcast %30 : vector<2x8x1xf32> to vector<2x8x16xf32>
    %32 = arith.mulf %31, %13 : vector<2x8x16xf32>
    %cst_12 = arith.constant dense<0.000000e+00> : vector<8x16xf32>
    %33 = vector.multi_reduction <add>, %32, %cst_12 [0] : vector<2x8x16xf32> to vector<8x16xf32>
    %c0_13 = arith.constant 0 : index
    %c0_14 = arith.constant 0 : index
    %34 = vector.load %arg27[%c0_13, %c0_14] : memref<16x32xf32, #tpu.memory_space<vmem>>, vector<8x16xf32>
    tpu.vector_store %arg27[%c0_13, %c0_14], %33 {strides = array<i32>} : memref<16x32xf32, #tpu.memory_space<vmem>>, vector<8x16xf32>,
    %35 = vector.extract_strided_slice %9 {offsets = [8, 0], sizes = [8, 16], strides = [1, 1]} : vector<16x96xf32> to vector<8x16xf32>
    %36 = vector.shape_cast %35 : vector<8x16xf32> to vector<1x8x16xf32>
    %37 = vector.broadcast %36 : vector<1x8x16xf32> to vector<2x8x16xf32>
    %38 = arith.mulf %37, %11 : vector<2x8x16xf32>
    %cst_15 = arith.constant dense<0.000000e+00> : vector<2x8xf32>
    %39 = vector.multi_reduction <add>, %38, %cst_15 [2] : vector<2x8x16xf32> to vector<2x8xf32>
    %40 = vector.shape_cast %39 : vector<2x8xf32> to vector<2x8x1xf32>
    %cst_16 = arith.constant 2.500000e-01 : f32
    %41 = vector.broadcast %cst_16 : f32 to vector<2x8x1xf32>
    %42 = arith.mulf %40, %41 : vector<2x8x1xf32>
    %cst_17 = arith.constant dense<0xFF800000> : vector<8x1xf32>
    %43 = vector.multi_reduction <maximumf>, %42, %cst_17 [0] : vector<2x8x1xf32> to vector<8x1xf32>
    %44 = vector.shape_cast %43 : vector<8x1xf32> to vector<1x8x1xf32>
    %45 = vector.broadcast %44 : vector<1x8x1xf32> to vector<2x8x1xf32>
    %46 = arith.subf %42, %45 : vector<2x8x1xf32>
    %47 = math.exp %46 : vector<2x8x1xf32>
    %cst_18 = arith.constant dense<0.000000e+00> : vector<8x1xf32>
    %48 = vector.multi_reduction <add>, %47, %cst_18 [0] : vector<2x8x1xf32> to vector<8x1xf32>
    %49 = vector.shape_cast %48 : vector<8x1xf32> to vector<1x8x1xf32>
    %50 = vector.broadcast %49 : vector<1x8x1xf32> to vector<2x8x1xf32>
    %51 = arith.divf %47, %50 : vector<2x8x1xf32>
    %52 = vector.broadcast %51 : vector<2x8x1xf32> to vector<2x8x16xf32>
    %53 = arith.mulf %52, %13 : vector<2x8x16xf32>
    %cst_19 = arith.constant dense<0.000000e+00> : vector<8x16xf32>
    %54 = vector.multi_reduction <add>, %53, %cst_19 [0] : vector<2x8x16xf32> to vector<8x16xf32>
    %c8 = arith.constant 8 : index
    %c0_20 = arith.constant 0 : index
    %55 = vector.load %arg27[%c8, %c0_20] : memref<16x32xf32, #tpu.memory_space<vmem>>, vector<8x16xf32>
    tpu.vector_store %arg27[%c8, %c0_20], %54 {strides = array<i32>} : memref<16x32xf32, #tpu.memory_space<vmem>>, vector<8x16xf32>,
    %56 = vector.extract_strided_slice %9 {offsets = [0, 48], sizes = [16, 16], strides = [1, 1]} : vector<16x96xf32> to vector<16x16xf32>
    %57 = vector.shape_cast %56 : vector<16x16xf32> to vector<2x8x16xf32>
    %58 = vector.extract_strided_slice %9 {offsets = [0, 80], sizes = [16, 16], strides = [1, 1]} : vector<16x96xf32> to vector<16x16xf32>
    %59 = vector.shape_cast %58 : vector<16x16xf32> to vector<2x8x16xf32>
    %60 = vector.extract_strided_slice %9 {offsets = [0, 16], sizes = [8, 16], strides = [1, 1]} : vector<16x96xf32> to vector<8x16xf32>
    %61 = vector.shape_cast %60 : vector<8x16xf32> to vector<1x8x16xf32>
    %62 = vector.broadcast %61 : vector<1x8x16xf32> to vector<2x8x16xf32>
    %63 = arith.mulf %62, %57 : vector<2x8x16xf32>
    %cst_21 = arith.constant dense<0.000000e+00> : vector<2x8xf32>
    %64 = vector.multi_reduction <add>, %63, %cst_21 [2] : vector<2x8x16xf32> to vector<2x8xf32>
    %65 = vector.shape_cast %64 : vector<2x8xf32> to vector<2x8x1xf32>
    %cst_22 = arith.constant 2.500000e-01 : f32
    %66 = vector.broadcast %cst_22 : f32 to vector<2x8x1xf32>
    %67 = arith.mulf %65, %66 : vector<2x8x1xf32>
    %cst_23 = arith.constant dense<0xFF800000> : vector<8x1xf32>
    %68 = vector.multi_reduction <maximumf>, %67, %cst_23 [0] : vector<2x8x1xf32> to vector<8x1xf32>
    %69 = vector.shape_cast %68 : vector<8x1xf32> to vector<1x8x1xf32>
    %70 = vector.broadcast %69 : vector<1x8x1xf32> to vector<2x8x1xf32>
    %71 = arith.subf %67, %70 : vector<2x8x1xf32>
    %72 = math.exp %71 : vector<2x8x1xf32>
    %cst_24 = arith.constant dense<0.000000e+00> : vector<8x1xf32>
    %73 = vector.multi_reduction <add>, %72, %cst_24 [0] : vector<2x8x1xf32> to vector<8x1xf32>
    %74 = vector.shape_cast %73 : vector<8x1xf32> to vector<1x8x1xf32>
    %75 = vector.broadcast %74 : vector<1x8x1xf32> to vector<2x8x1xf32>
    %76 = arith.divf %72, %75 : vector<2x8x1xf32>
    %77 = vector.broadcast %76 : vector<2x8x1xf32> to vector<2x8x16xf32>
    %78 = arith.mulf %77, %59 : vector<2x8x16xf32>
    %cst_25 = arith.constant dense<0.000000e+00> : vector<8x16xf32>
    %79 = vector.multi_reduction <add>, %78, %cst_25 [0] : vector<2x8x16xf32> to vector<8x16xf32>
    %c0_26 = arith.constant 0 : index
    %c16 = arith.constant 16 : index
    %80 = vector.load %arg27[%c0_26, %c16] : memref<16x32xf32, #tpu.memory_space<vmem>>, vector<8x16xf32>
    tpu.vector_store %arg27[%c0_26, %c16], %79 {strides = array<i32>} : memref<16x32xf32, #tpu.memory_space<vmem>>, vector<8x16xf32>,
    %81 = vector.extract_strided_slice %9 {offsets = [8, 16], sizes = [8, 16], strides = [1, 1]} : vector<16x96xf32> to vector<8x16xf32>
    %82 = vector.shape_cast %81 : vector<8x16xf32> to vector<1x8x16xf32>
    %83 = vector.broadcast %82 : vector<1x8x16xf32> to vector<2x8x16xf32>
    %84 = arith.mulf %83, %57 : vector<2x8x16xf32>
    %cst_27 = arith.constant dense<0.000000e+00> : vector<2x8xf32>
    %85 = vector.multi_reduction <add>, %84, %cst_27 [2] : vector<2x8x16xf32> to vector<2x8xf32>
    %86 = vector.shape_cast %85 : vector<2x8xf32> to vector<2x8x1xf32>
    %cst_28 = arith.constant 2.500000e-01 : f32
    %87 = vector.broadcast %cst_28 : f32 to vector<2x8x1xf32>
    %88 = arith.mulf %86, %87 : vector<2x8x1xf32>
    %cst_29 = arith.constant dense<0xFF800000> : vector<8x1xf32>
    %89 = vector.multi_reduction <maximumf>, %88, %cst_29 [0] : vector<2x8x1xf32> to vector<8x1xf32>
    %90 = vector.shape_cast %89 : vector<8x1xf32> to vector<1x8x1xf32>
    %91 = vector.broadcast %90 : vector<1x8x1xf32> to vector<2x8x1xf32>
    %92 = arith.subf %88, %91 : vector<2x8x1xf32>
    %93 = math.exp %92 : vector<2x8x1xf32>
    %cst_30 = arith.constant dense<0.000000e+00> : vector<8x1xf32>
    %94 = vector.multi_reduction <add>, %93, %cst_30 [0] : vector<2x8x1xf32> to vector<8x1xf32>
    %95 = vector.shape_cast %94 : vector<8x1xf32> to vector<1x8x1xf32>
    %96 = vector.broadcast %95 : vector<1x8x1xf32> to vector<2x8x1xf32>
    %97 = arith.divf %93, %96 : vector<2x8x1xf32>
    %98 = vector.broadcast %97 : vector<2x8x1xf32> to vector<2x8x16xf32>
    %99 = arith.mulf %98, %59 : vector<2x8x16xf32>
    %cst_31 = arith.constant dense<0.000000e+00> : vector<8x16xf32>
    %100 = vector.multi_reduction <add>, %99, %cst_31 [0] : vector<2x8x16xf32> to vector<8x16xf32>
    %c8_32 = arith.constant 8 : index
    %c16_33 = arith.constant 16 : index
    %101 = vector.load %arg27[%c8_32, %c16_33] : memref<16x32xf32, #tpu.memory_space<vmem>>, vector<8x16xf32>
    tpu.vector_store %arg27[%c8_32, %c16_33], %100 {strides = array<i32>} : memref<16x32xf32, #tpu.memory_space<vmem>>, vector<8x16xf32>,
    %c0_34 = arith.constant 0 : index
    %c0_35 = arith.constant 0 : index
    %102 = vector.load %arg27[%c0_34, %c0_35] : memref<16x32xf32, #tpu.memory_space<vmem>>, vector<16x32xf32>
    %103 = arith.truncf %102 : vector<16x32xf32> to vector<16x32xbf16>
    %c0_36 = arith.constant 0 : index
    %c0_37 = arith.constant 0 : index
    %c0_38 = arith.constant 0 : index
    %104 = vector.load %arg3[%c0_36, %c0_37, %c0_38] : memref<4x32x32xbf16, #tpu.memory_space<vmem>>, vector<1x32x32xbf16>
    %105 = vector.shape_cast %104 : vector<1x32x32xbf16> to vector<32x32xbf16>
    %cst_39 = arith.constant dense<0.000000e+00> : vector<16x32xf32>
    %106 = tpu.matmul %103, %105, %cst_39 {dimension_numbers = #tpu.dot_dimension_numbers<[1], [0], [0], [1], [0, 0, 1, 1], [], []>} : vector<16x32xbf16>, vector<32x32xbf16>, vector<16x32xf32> -> vector<16x32xf32>
    %c0_40 = arith.constant 0 : index
    %c0_41 = arith.constant 0 : index
    %c0_42 = arith.constant 0 : index
    %107 = vector.load %arg4[%c0_40, %c0_41, %c0_42] : memref<4x1x32xf32, #tpu.memory_space<vmem>>, vector<1x1x32xf32>
    %108 = vector.shape_cast %107 : vector<1x1x32xf32> to vector<1x32xf32>
    %109 = vector.broadcast %108 : vector<1x32xf32> to vector<16x32xf32>
    %110 = arith.addf %106, %109 : vector<16x32xf32>
    %111 = arith.addf %1, %110 : vector<16x32xf32>
    %c0_43 = arith.constant 0 : index
    %c0_44 = arith.constant 0 : index
    %c0_45 = arith.constant 0 : index
    %112 = vector.load %arg5[%c0_43, %c0_44, %c0_45] : memref<4x1x32xf32, #tpu.memory_space<vmem>>, vector<1x1x32xf32>
    %113 = vector.shape_cast %112 : vector<1x1x32xf32> to vector<1x32xf32>
    %c0_46 = arith.constant 0 : index
    %c0_47 = arith.constant 0 : index
    %c0_48 = arith.constant 0 : index
    %114 = vector.load %arg6[%c0_46, %c0_47, %c0_48] : memref<4x1x32xf32, #tpu.memory_space<vmem>>, vector<1x1x32xf32>
    %115 = vector.shape_cast %114 : vector<1x1x32xf32> to vector<1x32xf32>
    %cst_49 = arith.constant dense<0.000000e+00> : vector<16xf32>
    %116 = vector.multi_reduction <add>, %111, %cst_49 [1] : vector<16x32xf32> to vector<16xf32>
    %117 = vector.shape_cast %116 : vector<16xf32> to vector<16x1xf32>
    %cst_50 = arith.constant 3.200000e+01 : f32
    %118 = vector.broadcast %cst_50 : f32 to vector<16x1xf32>
    %119 = arith.divf %117, %118 : vector<16x1xf32>
    %120 = vector.broadcast %119 : vector<16x1xf32> to vector<16x32xf32>
    %121 = arith.subf %111, %120 : vector<16x32xf32>
    %122 = arith.mulf %121, %121 : vector<16x32xf32>
    %cst_51 = arith.constant dense<0.000000e+00> : vector<16xf32>
    %123 = vector.multi_reduction <add>, %122, %cst_51 [1] : vector<16x32xf32> to vector<16xf32>
    %124 = vector.shape_cast %123 : vector<16xf32> to vector<16x1xf32>
    %cst_52 = arith.constant 3.200000e+01 : f32
    %125 = vector.broadcast %cst_52 : f32 to vector<16x1xf32>
    %126 = arith.divf %124, %125 : vector<16x1xf32>
    %127 = vector.broadcast %119 : vector<16x1xf32> to vector<16x32xf32>
    %128 = arith.subf %111, %127 : vector<16x32xf32>
    %cst_53 = arith.constant 9.99999974E-6 : f32
    %129 = vector.broadcast %cst_53 : f32 to vector<16x1xf32>
    %130 = arith.addf %126, %129 : vector<16x1xf32>
    %131 = math.rsqrt %130 : vector<16x1xf32>
    %132 = vector.broadcast %131 : vector<16x1xf32> to vector<16x32xf32>
    %133 = arith.mulf %128, %132 : vector<16x32xf32>
    %134 = vector.broadcast %113 : vector<1x32xf32> to vector<16x32xf32>
    %135 = arith.mulf %133, %134 : vector<16x32xf32>
    %136 = vector.broadcast %115 : vector<1x32xf32> to vector<16x32xf32>
    %137 = arith.addf %135, %136 : vector<16x32xf32>
    %c0_54 = arith.constant 0 : index
    %c0_55 = arith.constant 0 : index
    %c0_56 = arith.constant 0 : index
    %138 = vector.load %arg7[%c0_54, %c0_55, %c0_56] : memref<4x96x64xbf16, #tpu.memory_space<vmem>>, vector<1x96x64xbf16>
    %139 = vector.shape_cast %138 : vector<1x96x64xbf16> to vector<96x64xbf16>
    %c0_57 = arith.constant 0 : index
    %c0_58 = arith.constant 0 : index
    %c0_59 = arith.constant 0 : index
    %140 = vector.load %arg8[%c0_57, %c0_58, %c0_59] : memref<4x1x64xf32, #tpu.memory_space<vmem>>, vector<1x1x64xf32>
    %141 = vector.shape_cast %140 : vector<1x1x64xf32> to vector<1x64xf32>
    %142 = tpu.iota {dimensions = array<i32: 1>} : vector<2x8x32xi32>
    %143 = vector.shape_cast %142 : vector<2x8x32xi32> to vector<16x32xi32>
    %cst_60 = arith.constant 0.000000e+00 : f32
    %144 = vector.broadcast %cst_60 : f32 to vector<16x64xf32>
    %145 = vector.broadcast %141 : vector<1x64xf32> to vector<16x64xf32>
    %146 = arith.addf %144, %145 : vector<16x64xf32>
    %cst_61 = arith.constant 0.000000e+00 : f32
    %147 = vector.broadcast %cst_61 : f32 to vector<1x32xf32>
    %148 = vector.extract_strided_slice %137 {offsets = [0, 0], sizes = [15, 32], strides = [1, 1]} : vector<16x32xf32> to vector<15x32xf32>
    %149 = tpu.concatenate %147, %148 in 0 : vector<1x32xf32>, vector<15x32xf32> -> vector<16x32xf32>
    %c1_i32 = arith.constant 1 : i32
    %150 = vector.broadcast %c1_i32 : i32 to vector<16x32xi32>
    %151 = arith.cmpi sge, %143, %150 : vector<16x32xi32>
    %cst_62 = arith.constant 0.000000e+00 : f32
    %152 = vector.broadcast %cst_62 : f32 to vector<16x32xf32>
    %153 = arith.select %151, %149, %152 : vector<16x32xi1>, vector<16x32xf32>
    %154 = arith.truncf %153 : vector<16x32xf32> to vector<16x32xbf16>
    %155 = vector.extract_strided_slice %139 {offsets = [0, 0], sizes = [32, 64], strides = [1, 1]} : vector<96x64xbf16> to vector<32x64xbf16>
    %cst_63 = arith.constant dense<0.000000e+00> : vector<16x64xf32>
    %156 = tpu.matmul %154, %155, %cst_63 {dimension_numbers = #tpu.dot_dimension_numbers<[1], [0], [0], [1], [0, 0, 1, 1], [], []>} : vector<16x32xbf16>, vector<32x64xbf16>, vector<16x64xf32> -> vector<16x64xf32>
    %157 = arith.addf %146, %156 : vector<16x64xf32>
    %158 = arith.truncf %137 : vector<16x32xf32> to vector<16x32xbf16>
    %159 = vector.extract_strided_slice %139 {offsets = [32, 0], sizes = [32, 64], strides = [1, 1]} : vector<96x64xbf16> to vector<32x64xbf16>
    %cst_64 = arith.constant dense<0.000000e+00> : vector<16x64xf32>
    %160 = tpu.matmul %158, %159, %cst_64 {dimension_numbers = #tpu.dot_dimension_numbers<[1], [0], [0], [1], [0, 0, 1, 1], [], []>} : vector<16x32xbf16>, vector<32x64xbf16>, vector<16x64xf32> -> vector<16x64xf32>
    %161 = arith.addf %157, %160 : vector<16x64xf32>
    %162 = vector.extract_strided_slice %137 {offsets = [1, 0], sizes = [15, 32], strides = [1, 1]} : vector<16x32xf32> to vector<15x32xf32>
    %cst_65 = arith.constant 0.000000e+00 : f32
    %163 = vector.broadcast %cst_65 : f32 to vector<1x32xf32>
    %164 = tpu.concatenate %162, %163 in 0 : vector<15x32xf32>, vector<1x32xf32> -> vector<16x32xf32>
    %c7_i32 = arith.constant 7 : i32
    %165 = vector.broadcast %c7_i32 : i32 to vector<16x32xi32>
    %166 = arith.cmpi slt, %143, %165 : vector<16x32xi32>
    %cst_66 = arith.constant 0.000000e+00 : f32
    %167 = vector.broadcast %cst_66 : f32 to vector<16x32xf32>
    %168 = arith.select %166, %164, %167 : vector<16x32xi1>, vector<16x32xf32>
    %169 = arith.truncf %168 : vector<16x32xf32> to vector<16x32xbf16>
    %170 = vector.extract_strided_slice %139 {offsets = [64, 0], sizes = [32, 64], strides = [1, 1]} : vector<96x64xbf16> to vector<32x64xbf16>
    %cst_67 = arith.constant dense<0.000000e+00> : vector<16x64xf32>
    %171 = tpu.matmul %169, %170, %cst_67 {dimension_numbers = #tpu.dot_dimension_numbers<[1], [0], [0], [1], [0, 0, 1, 1], [], []>} : vector<16x32xbf16>, vector<32x64xbf16>, vector<16x64xf32> -> vector<16x64xf32>
    %172 = arith.addf %161, %171 : vector<16x64xf32>
    %cst_68 = arith.constant 0.000000e+00 : f32
    %173 = vector.broadcast %cst_68 : f32 to vector<16x64xf32>
    %174 = arith.maximumf %172, %173 : vector<16x64xf32>
    %c0_69 = arith.constant 0 : index
    %c0_70 = arith.constant 0 : index
    %c0_71 = arith.constant 0 : index
    %175 = vector.load %arg9[%c0_69, %c0_70, %c0_71] : memref<4x192x32xbf16, #tpu.memory_space<vmem>>, vector<1x192x32xbf16>
    %176 = vector.shape_cast %175 : vector<1x192x32xbf16> to vector<192x32xbf16>
    %c0_72 = arith.constant 0 : index
    %c0_73 = arith.constant 0 : index
    %c0_74 = arith.constant 0 : index
    %177 = vector.load %arg10[%c0_72, %c0_73, %c0_74] : memref<4x1x32xf32, #tpu.memory_space<vmem>>, vector<1x1x32xf32>
    %178 = vector.shape_cast %177 : vector<1x1x32xf32> to vector<1x32xf32>
    %179 = tpu.iota {dimensions = array<i32: 1>} : vector<2x8x64xi32>
    %180 = vector.shape_cast %179 : vector<2x8x64xi32> to vector<16x64xi32>
    %cst_75 = arith.constant 0.000000e+00 : f32
    %181 = vector.broadcast %cst_75 : f32 to vector<16x32xf32>
    %182 = vector.broadcast %178 : vector<1x32xf32> to vector<16x32xf32>
    %183 = arith.addf %181, %182 : vector<16x32xf32>
    %cst_76 = arith.constant 0.000000e+00 : f32
    %184 = vector.broadcast %cst_76 : f32 to vector<1x64xf32>
    %185 = vector.extract_strided_slice %174 {offsets = [0, 0], sizes = [15, 64], strides = [1, 1]} : vector<16x64xf32> to vector<15x64xf32>
    %186 = tpu.concatenate %184, %185 in 0 : vector<1x64xf32>, vector<15x64xf32> -> vector<16x64xf32>
    %c1_i32_77 = arith.constant 1 : i32
    %187 = vector.broadcast %c1_i32_77 : i32 to vector<16x64xi32>
    %188 = arith.cmpi sge, %180, %187 : vector<16x64xi32>
    %cst_78 = arith.constant 0.000000e+00 : f32
    %189 = vector.broadcast %cst_78 : f32 to vector<16x64xf32>
    %190 = arith.select %188, %186, %189 : vector<16x64xi1>, vector<16x64xf32>
    %191 = arith.truncf %190 : vector<16x64xf32> to vector<16x64xbf16>
    %192 = vector.extract_strided_slice %176 {offsets = [0, 0], sizes = [64, 32], strides = [1, 1]} : vector<192x32xbf16> to vector<64x32xbf16>
    %cst_79 = arith.constant dense<0.000000e+00> : vector<16x32xf32>
    %193 = tpu.matmul %191, %192, %cst_79 {dimension_numbers = #tpu.dot_dimension_numbers<[1], [0], [0], [1], [0, 0, 1, 1], [], []>} : vector<16x64xbf16>, vector<64x32xbf16>, vector<16x32xf32> -> vector<16x32xf32>
    %194 = arith.addf %183, %193 : vector<16x32xf32>
    %195 = arith.truncf %174 : vector<16x64xf32> to vector<16x64xbf16>
    %196 = vector.extract_strided_slice %176 {offsets = [64, 0], sizes = [64, 32], strides = [1, 1]} : vector<192x32xbf16> to vector<64x32xbf16>
    %cst_80 = arith.constant dense<0.000000e+00> : vector<16x32xf32>
    %197 = tpu.matmul %195, %196, %cst_80 {dimension_numbers = #tpu.dot_dimension_numbers<[1], [0], [0], [1], [0, 0, 1, 1], [], []>} : vector<16x64xbf16>, vector<64x32xbf16>, vector<16x32xf32> -> vector<16x32xf32>
    %198 = arith.addf %194, %197 : vector<16x32xf32>
    %199 = vector.extract_strided_slice %174 {offsets = [1, 0], sizes = [15, 64], strides = [1, 1]} : vector<16x64xf32> to vector<15x64xf32>
    %cst_81 = arith.constant 0.000000e+00 : f32
    %200 = vector.broadcast %cst_81 : f32 to vector<1x64xf32>
    %201 = tpu.concatenate %199, %200 in 0 : vector<15x64xf32>, vector<1x64xf32> -> vector<16x64xf32>
    %c7_i32_82 = arith.constant 7 : i32
    %202 = vector.broadcast %c7_i32_82 : i32 to vector<16x64xi32>
    %203 = arith.cmpi slt, %180, %202 : vector<16x64xi32>
    %cst_83 = arith.constant 0.000000e+00 : f32
    %204 = vector.broadcast %cst_83 : f32 to vector<16x64xf32>
    %205 = arith.select %203, %201, %204 : vector<16x64xi1>, vector<16x64xf32>
    %206 = arith.truncf %205 : vector<16x64xf32> to vector<16x64xbf16>
    %207 = vector.extract_strided_slice %176 {offsets = [128, 0], sizes = [64, 32], strides = [1, 1]} : vector<192x32xbf16> to vector<64x32xbf16>
    %cst_84 = arith.constant dense<0.000000e+00> : vector<16x32xf32>
    %208 = tpu.matmul %206, %207, %cst_84 {dimension_numbers = #tpu.dot_dimension_numbers<[1], [0], [0], [1], [0, 0, 1, 1], [], []>} : vector<16x64xbf16>, vector<64x32xbf16>, vector<16x32xf32> -> vector<16x32xf32>
    %209 = arith.addf %198, %208 : vector<16x32xf32>
    %210 = arith.addf %137, %209 : vector<16x32xf32>
    %c0_85 = arith.constant 0 : index
    %c0_86 = arith.constant 0 : index
    %c0_87 = arith.constant 0 : index
    %211 = vector.load %arg11[%c0_85, %c0_86, %c0_87] : memref<4x1x32xf32, #tpu.memory_space<vmem>>, vector<1x1x32xf32>
    %212 = vector.shape_cast %211 : vector<1x1x32xf32> to vector<1x32xf32>
    %c0_88 = arith.constant 0 : index
    %c0_89 = arith.constant 0 : index
    %c0_90 = arith.constant 0 : index
    %213 = vector.load %arg12[%c0_88, %c0_89, %c0_90] : memref<4x1x32xf32, #tpu.memory_space<vmem>>, vector<1x1x32xf32>
    %214 = vector.shape_cast %213 : vector<1x1x32xf32> to vector<1x32xf32>
    %cst_91 = arith.constant dense<0.000000e+00> : vector<16xf32>
    %215 = vector.multi_reduction <add>, %210, %cst_91 [1] : vector<16x32xf32> to vector<16xf32>
    %216 = vector.shape_cast %215 : vector<16xf32> to vector<16x1xf32>
    %cst_92 = arith.constant 3.200000e+01 : f32
    %217 = vector.broadcast %cst_92 : f32 to vector<16x1xf32>
    %218 = arith.divf %216, %217 : vector<16x1xf32>
    %219 = vector.broadcast %218 : vector<16x1xf32> to vector<16x32xf32>
    %220 = arith.subf %210, %219 : vector<16x32xf32>
    %221 = arith.mulf %220, %220 : vector<16x32xf32>
    %cst_93 = arith.constant dense<0.000000e+00> : vector<16xf32>
    %222 = vector.multi_reduction <add>, %221, %cst_93 [1] : vector<16x32xf32> to vector<16xf32>
    %223 = vector.shape_cast %222 : vector<16xf32> to vector<16x1xf32>
    %cst_94 = arith.constant 3.200000e+01 : f32
    %224 = vector.broadcast %cst_94 : f32 to vector<16x1xf32>
    %225 = arith.divf %223, %224 : vector<16x1xf32>
    %226 = vector.broadcast %218 : vector<16x1xf32> to vector<16x32xf32>
    %227 = arith.subf %210, %226 : vector<16x32xf32>
    %cst_95 = arith.constant 9.99999974E-6 : f32
    %228 = vector.broadcast %cst_95 : f32 to vector<16x1xf32>
    %229 = arith.addf %225, %228 : vector<16x1xf32>
    %230 = math.rsqrt %229 : vector<16x1xf32>
    %231 = vector.broadcast %230 : vector<16x1xf32> to vector<16x32xf32>
    %232 = arith.mulf %227, %231 : vector<16x32xf32>
    %233 = vector.broadcast %212 : vector<1x32xf32> to vector<16x32xf32>
    %234 = arith.mulf %232, %233 : vector<16x32xf32>
    %235 = vector.broadcast %214 : vector<1x32xf32> to vector<16x32xf32>
    %236 = arith.addf %234, %235 : vector<16x32xf32>
    %237 = arith.truncf %236 : vector<16x32xf32> to vector<16x32xbf16>
    %c1 = arith.constant 1 : index
    %c0_96 = arith.constant 0 : index
    %c0_97 = arith.constant 0 : index
    %238 = vector.load %arg1[%c1, %c0_96, %c0_97] : memref<4x32x96xbf16, #tpu.memory_space<vmem>>, vector<1x32x96xbf16>
    %239 = vector.shape_cast %238 : vector<1x32x96xbf16> to vector<32x96xbf16>
    %cst_98 = arith.constant dense<0.000000e+00> : vector<16x96xf32>
    %240 = tpu.matmul %237, %239, %cst_98 {dimension_numbers = #tpu.dot_dimension_numbers<[1], [0], [0], [1], [0, 0, 1, 1], [], []>} : vector<16x32xbf16>, vector<32x96xbf16>, vector<16x96xf32> -> vector<16x96xf32>
    %c1_99 = arith.constant 1 : index
    %c0_100 = arith.constant 0 : index
    %c0_101 = arith.constant 0 : index
    %241 = vector.load %arg2[%c1_99, %c0_100, %c0_101] : memref<4x1x96xf32, #tpu.memory_space<vmem>>, vector<1x1x96xf32>
    %242 = vector.shape_cast %241 : vector<1x1x96xf32> to vector<1x96xf32>
    %243 = vector.broadcast %242 : vector<1x96xf32> to vector<16x96xf32>
    %244 = arith.addf %240, %243 : vector<16x96xf32>
    %245 = vector.extract_strided_slice %244 {offsets = [0, 32], sizes = [16, 16], strides = [1, 1]} : vector<16x96xf32> to vector<16x16xf32>
    %246 = vector.shape_cast %245 : vector<16x16xf32> to vector<2x8x16xf32>
    %247 = vector.extract_strided_slice %244 {offsets = [0, 64], sizes = [16, 16], strides = [1, 1]} : vector<16x96xf32> to vector<16x16xf32>
    %248 = vector.shape_cast %247 : vector<16x16xf32> to vector<2x8x16xf32>
    %249 = vector.extract_strided_slice %244 {offsets = [0, 0], sizes = [8, 16], strides = [1, 1]} : vector<16x96xf32> to vector<8x16xf32>
    %250 = vector.shape_cast %249 : vector<8x16xf32> to vector<1x8x16xf32>
    %251 = vector.broadcast %250 : vector<1x8x16xf32> to vector<2x8x16xf32>
    %252 = arith.mulf %251, %246 : vector<2x8x16xf32>
    %cst_102 = arith.constant dense<0.000000e+00> : vector<2x8xf32>
    %253 = vector.multi_reduction <add>, %252, %cst_102 [2] : vector<2x8x16xf32> to vector<2x8xf32>
    %254 = vector.shape_cast %253 : vector<2x8xf32> to vector<2x8x1xf32>
    %cst_103 = arith.constant 2.500000e-01 : f32
    %255 = vector.broadcast %cst_103 : f32 to vector<2x8x1xf32>
    %256 = arith.mulf %254, %255 : vector<2x8x1xf32>
    %cst_104 = arith.constant dense<0xFF800000> : vector<8x1xf32>
    %257 = vector.multi_reduction <maximumf>, %256, %cst_104 [0] : vector<2x8x1xf32> to vector<8x1xf32>
    %258 = vector.shape_cast %257 : vector<8x1xf32> to vector<1x8x1xf32>
    %259 = vector.broadcast %258 : vector<1x8x1xf32> to vector<2x8x1xf32>
    %260 = arith.subf %256, %259 : vector<2x8x1xf32>
    %261 = math.exp %260 : vector<2x8x1xf32>
    %cst_105 = arith.constant dense<0.000000e+00> : vector<8x1xf32>
    %262 = vector.multi_reduction <add>, %261, %cst_105 [0] : vector<2x8x1xf32> to vector<8x1xf32>
    %263 = vector.shape_cast %262 : vector<8x1xf32> to vector<1x8x1xf32>
    %264 = vector.broadcast %263 : vector<1x8x1xf32> to vector<2x8x1xf32>
    %265 = arith.divf %261, %264 : vector<2x8x1xf32>
    %266 = vector.broadcast %265 : vector<2x8x1xf32> to vector<2x8x16xf32>
    %267 = arith.mulf %266, %248 : vector<2x8x16xf32>
    %cst_106 = arith.constant dense<0.000000e+00> : vector<8x16xf32>
    %268 = vector.multi_reduction <add>, %267, %cst_106 [0] : vector<2x8x16xf32> to vector<8x16xf32>
    %c0_107 = arith.constant 0 : index
    %c0_108 = arith.constant 0 : index
    %269 = vector.load %arg27[%c0_107, %c0_108] : memref<16x32xf32, #tpu.memory_space<vmem>>, vector<8x16xf32>
    tpu.vector_store %arg27[%c0_107, %c0_108], %268 {strides = array<i32>} : memref<16x32xf32, #tpu.memory_space<vmem>>, vector<8x16xf32>,
    %270 = vector.extract_strided_slice %244 {offsets = [8, 0], sizes = [8, 16], strides = [1, 1]} : vector<16x96xf32> to vector<8x16xf32>
    %271 = vector.shape_cast %270 : vector<8x16xf32> to vector<1x8x16xf32>
    %272 = vector.broadcast %271 : vector<1x8x16xf32> to vector<2x8x16xf32>
    %273 = arith.mulf %272, %246 : vector<2x8x16xf32>
    %cst_109 = arith.constant dense<0.000000e+00> : vector<2x8xf32>
    %274 = vector.multi_reduction <add>, %273, %cst_109 [2] : vector<2x8x16xf32> to vector<2x8xf32>
    %275 = vector.shape_cast %274 : vector<2x8xf32> to vector<2x8x1xf32>
    %cst_110 = arith.constant 2.500000e-01 : f32
    %276 = vector.broadcast %cst_110 : f32 to vector<2x8x1xf32>
    %277 = arith.mulf %275, %276 : vector<2x8x1xf32>
    %cst_111 = arith.constant dense<0xFF800000> : vector<8x1xf32>
    %278 = vector.multi_reduction <maximumf>, %277, %cst_111 [0] : vector<2x8x1xf32> to vector<8x1xf32>
    %279 = vector.shape_cast %278 : vector<8x1xf32> to vector<1x8x1xf32>
    %280 = vector.broadcast %279 : vector<1x8x1xf32> to vector<2x8x1xf32>
    %281 = arith.subf %277, %280 : vector<2x8x1xf32>
    %282 = math.exp %281 : vector<2x8x1xf32>
    %cst_112 = arith.constant dense<0.000000e+00> : vector<8x1xf32>
    %283 = vector.multi_reduction <add>, %282, %cst_112 [0] : vector<2x8x1xf32> to vector<8x1xf32>
    %284 = vector.shape_cast %283 : vector<8x1xf32> to vector<1x8x1xf32>
    %285 = vector.broadcast %284 : vector<1x8x1xf32> to vector<2x8x1xf32>
    %286 = arith.divf %282, %285 : vector<2x8x1xf32>
    %287 = vector.broadcast %286 : vector<2x8x1xf32> to vector<2x8x16xf32>
    %288 = arith.mulf %287, %248 : vector<2x8x16xf32>
    %cst_113 = arith.constant dense<0.000000e+00> : vector<8x16xf32>
    %289 = vector.multi_reduction <add>, %288, %cst_113 [0] : vector<2x8x16xf32> to vector<8x16xf32>
    %c8_114 = arith.constant 8 : index
    %c0_115 = arith.constant 0 : index
    %290 = vector.load %arg27[%c8_114, %c0_115] : memref<16x32xf32, #tpu.memory_space<vmem>>, vector<8x16xf32>
    tpu.vector_store %arg27[%c8_114, %c0_115], %289 {strides = array<i32>} : memref<16x32xf32, #tpu.memory_space<vmem>>, vector<8x16xf32>,
    %291 = vector.extract_strided_slice %244 {offsets = [0, 48], sizes = [16, 16], strides = [1, 1]} : vector<16x96xf32> to vector<16x16xf32>
    %292 = vector.shape_cast %291 : vector<16x16xf32> to vector<2x8x16xf32>
    %293 = vector.extract_strided_slice %244 {offsets = [0, 80], sizes = [16, 16], strides = [1, 1]} : vector<16x96xf32> to vector<16x16xf32>
    %294 = vector.shape_cast %293 : vector<16x16xf32> to vector<2x8x16xf32>
    %295 = vector.extract_strided_slice %244 {offsets = [0, 16], sizes = [8, 16], strides = [1, 1]} : vector<16x96xf32> to vector<8x16xf32>
    %296 = vector.shape_cast %295 : vector<8x16xf32> to vector<1x8x16xf32>
    %297 = vector.broadcast %296 : vector<1x8x16xf32> to vector<2x8x16xf32>
    %298 = arith.mulf %297, %292 : vector<2x8x16xf32>
    %cst_116 = arith.constant dense<0.000000e+00> : vector<2x8xf32>
    %299 = vector.multi_reduction <add>, %298, %cst_116 [2] : vector<2x8x16xf32> to vector<2x8xf32>
    %300 = vector.shape_cast %299 : vector<2x8xf32> to vector<2x8x1xf32>
    %cst_117 = arith.constant 2.500000e-01 : f32
    %301 = vector.broadcast %cst_117 : f32 to vector<2x8x1xf32>
    %302 = arith.mulf %300, %301 : vector<2x8x1xf32>
    %cst_118 = arith.constant dense<0xFF800000> : vector<8x1xf32>
    %303 = vector.multi_reduction <maximumf>, %302, %cst_118 [0] : vector<2x8x1xf32> to vector<8x1xf32>
    %304 = vector.shape_cast %303 : vector<8x1xf32> to vector<1x8x1xf32>
    %305 = vector.broadcast %304 : vector<1x8x1xf32> to vector<2x8x1xf32>
    %306 = arith.subf %302, %305 : vector<2x8x1xf32>
    %307 = math.exp %306 : vector<2x8x1xf32>
    %cst_119 = arith.constant dense<0.000000e+00> : vector<8x1xf32>
    %308 = vector.multi_reduction <add>, %307, %cst_119 [0] : vector<2x8x1xf32> to vector<8x1xf32>
    %309 = vector.shape_cast %308 : vector<8x1xf32> to vector<1x8x1xf32>
    %310 = vector.broadcast %309 : vector<1x8x1xf32> to vector<2x8x1xf32>
    %311 = arith.divf %307, %310 : vector<2x8x1xf32>
    %312 = vector.broadcast %311 : vector<2x8x1xf32> to vector<2x8x16xf32>
    %313 = arith.mulf %312, %294 : vector<2x8x16xf32>
    %cst_120 = arith.constant dense<0.000000e+00> : vector<8x16xf32>
    %314 = vector.multi_reduction <add>, %313, %cst_120 [0] : vector<2x8x16xf32> to vector<8x16xf32>
    %c0_121 = arith.constant 0 : index
    %c16_122 = arith.constant 16 : index
    %315 = vector.load %arg27[%c0_121, %c16_122] : memref<16x32xf32, #tpu.memory_space<vmem>>, vector<8x16xf32>
    tpu.vector_store %arg27[%c0_121, %c16_122], %314 {strides = array<i32>} : memref<16x32xf32, #tpu.memory_space<vmem>>, vector<8x16xf32>,
    %316 = vector.extract_strided_slice %244 {offsets = [8, 16], sizes = [8, 16], strides = [1, 1]} : vector<16x96xf32> to vector<8x16xf32>
    %317 = vector.shape_cast %316 : vector<8x16xf32> to vector<1x8x16xf32>
    %318 = vector.broadcast %317 : vector<1x8x16xf32> to vector<2x8x16xf32>
    %319 = arith.mulf %318, %292 : vector<2x8x16xf32>
    %cst_123 = arith.constant dense<0.000000e+00> : vector<2x8xf32>
    %320 = vector.multi_reduction <add>, %319, %cst_123 [2] : vector<2x8x16xf32> to vector<2x8xf32>
    %321 = vector.shape_cast %320 : vector<2x8xf32> to vector<2x8x1xf32>
    %cst_124 = arith.constant 2.500000e-01 : f32
    %322 = vector.broadcast %cst_124 : f32 to vector<2x8x1xf32>
    %323 = arith.mulf %321, %322 : vector<2x8x1xf32>
    %cst_125 = arith.constant dense<0xFF800000> : vector<8x1xf32>
    %324 = vector.multi_reduction <maximumf>, %323, %cst_125 [0] : vector<2x8x1xf32> to vector<8x1xf32>
    %325 = vector.shape_cast %324 : vector<8x1xf32> to vector<1x8x1xf32>
    %326 = vector.broadcast %325 : vector<1x8x1xf32> to vector<2x8x1xf32>
    %327 = arith.subf %323, %326 : vector<2x8x1xf32>
    %328 = math.exp %327 : vector<2x8x1xf32>
    %cst_126 = arith.constant dense<0.000000e+00> : vector<8x1xf32>
    %329 = vector.multi_reduction <add>, %328, %cst_126 [0] : vector<2x8x1xf32> to vector<8x1xf32>
    %330 = vector.shape_cast %329 : vector<8x1xf32> to vector<1x8x1xf32>
    %331 = vector.broadcast %330 : vector<1x8x1xf32> to vector<2x8x1xf32>
    %332 = arith.divf %328, %331 : vector<2x8x1xf32>
    %333 = vector.broadcast %332 : vector<2x8x1xf32> to vector<2x8x16xf32>
    %334 = arith.mulf %333, %294 : vector<2x8x16xf32>
    %cst_127 = arith.constant dense<0.000000e+00> : vector<8x16xf32>
    %335 = vector.multi_reduction <add>, %334, %cst_127 [0] : vector<2x8x16xf32> to vector<8x16xf32>
    %c8_128 = arith.constant 8 : index
    %c16_129 = arith.constant 16 : index
    %336 = vector.load %arg27[%c8_128, %c16_129] : memref<16x32xf32, #tpu.memory_space<vmem>>, vector<8x16xf32>
    tpu.vector_store %arg27[%c8_128, %c16_129], %335 {strides = array<i32>} : memref<16x32xf32, #tpu.memory_space<vmem>>, vector<8x16xf32>,
    %c0_130 = arith.constant 0 : index
    %c0_131 = arith.constant 0 : index
    %337 = vector.load %arg27[%c0_130, %c0_131] : memref<16x32xf32, #tpu.memory_space<vmem>>, vector<16x32xf32>
    %338 = arith.truncf %337 : vector<16x32xf32> to vector<16x32xbf16>
    %c1_132 = arith.constant 1 : index
    %c0_133 = arith.constant 0 : index
    %c0_134 = arith.constant 0 : index
    %339 = vector.load %arg3[%c1_132, %c0_133, %c0_134] : memref<4x32x32xbf16, #tpu.memory_space<vmem>>, vector<1x32x32xbf16>
    %340 = vector.shape_cast %339 : vector<1x32x32xbf16> to vector<32x32xbf16>
    %cst_135 = arith.constant dense<0.000000e+00> : vector<16x32xf32>
    %341 = tpu.matmul %338, %340, %cst_135 {dimension_numbers = #tpu.dot_dimension_numbers<[1], [0], [0], [1], [0, 0, 1, 1], [], []>} : vector<16x32xbf16>, vector<32x32xbf16>, vector<16x32xf32> -> vector<16x32xf32>
    %c1_136 = arith.constant 1 : index
    %c0_137 = arith.constant 0 : index
    %c0_138 = arith.constant 0 : index
    %342 = vector.load %arg4[%c1_136, %c0_137, %c0_138] : memref<4x1x32xf32, #tpu.memory_space<vmem>>, vector<1x1x32xf32>
    %343 = vector.shape_cast %342 : vector<1x1x32xf32> to vector<1x32xf32>
    %344 = vector.broadcast %343 : vector<1x32xf32> to vector<16x32xf32>
    %345 = arith.addf %341, %344 : vector<16x32xf32>
    %346 = arith.addf %236, %345 : vector<16x32xf32>
    %c1_139 = arith.constant 1 : index
    %c0_140 = arith.constant 0 : index
    %c0_141 = arith.constant 0 : index
    %347 = vector.load %arg5[%c1_139, %c0_140, %c0_141] : memref<4x1x32xf32, #tpu.memory_space<vmem>>, vector<1x1x32xf32>
    %348 = vector.shape_cast %347 : vector<1x1x32xf32> to vector<1x32xf32>
    %c1_142 = arith.constant 1 : index
    %c0_143 = arith.constant 0 : index
    %c0_144 = arith.constant 0 : index
    %349 = vector.load %arg6[%c1_142, %c0_143, %c0_144] : memref<4x1x32xf32, #tpu.memory_space<vmem>>, vector<1x1x32xf32>
    %350 = vector.shape_cast %349 : vector<1x1x32xf32> to vector<1x32xf32>
    %cst_145 = arith.constant dense<0.000000e+00> : vector<16xf32>
    %351 = vector.multi_reduction <add>, %346, %cst_145 [1] : vector<16x32xf32> to vector<16xf32>
    %352 = vector.shape_cast %351 : vector<16xf32> to vector<16x1xf32>
    %cst_146 = arith.constant 3.200000e+01 : f32
    %353 = vector.broadcast %cst_146 : f32 to vector<16x1xf32>
    %354 = arith.divf %352, %353 : vector<16x1xf32>
    %355 = vector.broadcast %354 : vector<16x1xf32> to vector<16x32xf32>
    %356 = arith.subf %346, %355 : vector<16x32xf32>
    %357 = arith.mulf %356, %356 : vector<16x32xf32>
    %cst_147 = arith.constant dense<0.000000e+00> : vector<16xf32>
    %358 = vector.multi_reduction <add>, %357, %cst_147 [1] : vector<16x32xf32> to vector<16xf32>
    %359 = vector.shape_cast %358 : vector<16xf32> to vector<16x1xf32>
    %cst_148 = arith.constant 3.200000e+01 : f32
    %360 = vector.broadcast %cst_148 : f32 to vector<16x1xf32>
    %361 = arith.divf %359, %360 : vector<16x1xf32>
    %362 = vector.broadcast %354 : vector<16x1xf32> to vector<16x32xf32>
    %363 = arith.subf %346, %362 : vector<16x32xf32>
    %cst_149 = arith.constant 9.99999974E-6 : f32
    %364 = vector.broadcast %cst_149 : f32 to vector<16x1xf32>
    %365 = arith.addf %361, %364 : vector<16x1xf32>
    %366 = math.rsqrt %365 : vector<16x1xf32>
    %367 = vector.broadcast %366 : vector<16x1xf32> to vector<16x32xf32>
    %368 = arith.mulf %363, %367 : vector<16x32xf32>
    %369 = vector.broadcast %348 : vector<1x32xf32> to vector<16x32xf32>
    %370 = arith.mulf %368, %369 : vector<16x32xf32>
    %371 = vector.broadcast %350 : vector<1x32xf32> to vector<16x32xf32>
    %372 = arith.addf %370, %371 : vector<16x32xf32>
    %c1_150 = arith.constant 1 : index
    %c0_151 = arith.constant 0 : index
    %c0_152 = arith.constant 0 : index
    %373 = vector.load %arg7[%c1_150, %c0_151, %c0_152] : memref<4x96x64xbf16, #tpu.memory_space<vmem>>, vector<1x96x64xbf16>
    %374 = vector.shape_cast %373 : vector<1x96x64xbf16> to vector<96x64xbf16>
    %c1_153 = arith.constant 1 : index
    %c0_154 = arith.constant 0 : index
    %c0_155 = arith.constant 0 : index
    %375 = vector.load %arg8[%c1_153, %c0_154, %c0_155] : memref<4x1x64xf32, #tpu.memory_space<vmem>>, vector<1x1x64xf32>
    %376 = vector.shape_cast %375 : vector<1x1x64xf32> to vector<1x64xf32>
    %377 = tpu.iota {dimensions = array<i32: 1>} : vector<2x8x32xi32>
    %378 = vector.shape_cast %377 : vector<2x8x32xi32> to vector<16x32xi32>
    %cst_156 = arith.constant 0.000000e+00 : f32
    %379 = vector.broadcast %cst_156 : f32 to vector<16x64xf32>
    %380 = vector.broadcast %376 : vector<1x64xf32> to vector<16x64xf32>
    %381 = arith.addf %379, %380 : vector<16x64xf32>
    %cst_157 = arith.constant 0.000000e+00 : f32
    %382 = vector.broadcast %cst_157 : f32 to vector<1x32xf32>
    %383 = vector.extract_strided_slice %372 {offsets = [0, 0], sizes = [15, 32], strides = [1, 1]} : vector<16x32xf32> to vector<15x32xf32>
    %384 = tpu.concatenate %382, %383 in 0 : vector<1x32xf32>, vector<15x32xf32> -> vector<16x32xf32>
    %c1_i32_158 = arith.constant 1 : i32
    %385 = vector.broadcast %c1_i32_158 : i32 to vector<16x32xi32>
    %386 = arith.cmpi sge, %378, %385 : vector<16x32xi32>
    %cst_159 = arith.constant 0.000000e+00 : f32
    %387 = vector.broadcast %cst_159 : f32 to vector<16x32xf32>
    %388 = arith.select %386, %384, %387 : vector<16x32xi1>, vector<16x32xf32>
    %389 = arith.truncf %388 : vector<16x32xf32> to vector<16x32xbf16>
    %390 = vector.extract_strided_slice %374 {offsets = [0, 0], sizes = [32, 64], strides = [1, 1]} : vector<96x64xbf16> to vector<32x64xbf16>
    %cst_160 = arith.constant dense<0.000000e+00> : vector<16x64xf32>
    %391 = tpu.matmul %389, %390, %cst_160 {dimension_numbers = #tpu.dot_dimension_numbers<[1], [0], [0], [1], [0, 0, 1, 1], [], []>} : vector<16x32xbf16>, vector<32x64xbf16>, vector<16x64xf32> -> vector<16x64xf32>
    %392 = arith.addf %381, %391 : vector<16x64xf32>
    %393 = arith.truncf %372 : vector<16x32xf32> to vector<16x32xbf16>
    %394 = vector.extract_strided_slice %374 {offsets = [32, 0], sizes = [32, 64], strides = [1, 1]} : vector<96x64xbf16> to vector<32x64xbf16>
    %cst_161 = arith.constant dense<0.000000e+00> : vector<16x64xf32>
    %395 = tpu.matmul %393, %394, %cst_161 {dimension_numbers = #tpu.dot_dimension_numbers<[1], [0], [0], [1], [0, 0, 1, 1], [], []>} : vector<16x32xbf16>, vector<32x64xbf16>, vector<16x64xf32> -> vector<16x64xf32>
    %396 = arith.addf %392, %395 : vector<16x64xf32>
    %397 = vector.extract_strided_slice %372 {offsets = [1, 0], sizes = [15, 32], strides = [1, 1]} : vector<16x32xf32> to vector<15x32xf32>
    %cst_162 = arith.constant 0.000000e+00 : f32
    %398 = vector.broadcast %cst_162 : f32 to vector<1x32xf32>
    %399 = tpu.concatenate %397, %398 in 0 : vector<15x32xf32>, vector<1x32xf32> -> vector<16x32xf32>
    %c7_i32_163 = arith.constant 7 : i32
    %400 = vector.broadcast %c7_i32_163 : i32 to vector<16x32xi32>
    %401 = arith.cmpi slt, %378, %400 : vector<16x32xi32>
    %cst_164 = arith.constant 0.000000e+00 : f32
    %402 = vector.broadcast %cst_164 : f32 to vector<16x32xf32>
    %403 = arith.select %401, %399, %402 : vector<16x32xi1>, vector<16x32xf32>
    %404 = arith.truncf %403 : vector<16x32xf32> to vector<16x32xbf16>
    %405 = vector.extract_strided_slice %374 {offsets = [64, 0], sizes = [32, 64], strides = [1, 1]} : vector<96x64xbf16> to vector<32x64xbf16>
    %cst_165 = arith.constant dense<0.000000e+00> : vector<16x64xf32>
    %406 = tpu.matmul %404, %405, %cst_165 {dimension_numbers = #tpu.dot_dimension_numbers<[1], [0], [0], [1], [0, 0, 1, 1], [], []>} : vector<16x32xbf16>, vector<32x64xbf16>, vector<16x64xf32> -> vector<16x64xf32>
    %407 = arith.addf %396, %406 : vector<16x64xf32>
    %cst_166 = arith.constant 0.000000e+00 : f32
    %408 = vector.broadcast %cst_166 : f32 to vector<16x64xf32>
    %409 = arith.maximumf %407, %408 : vector<16x64xf32>
    %c1_167 = arith.constant 1 : index
    %c0_168 = arith.constant 0 : index
    %c0_169 = arith.constant 0 : index
    %410 = vector.load %arg9[%c1_167, %c0_168, %c0_169] : memref<4x192x32xbf16, #tpu.memory_space<vmem>>, vector<1x192x32xbf16>
    %411 = vector.shape_cast %410 : vector<1x192x32xbf16> to vector<192x32xbf16>
    %c1_170 = arith.constant 1 : index
    %c0_171 = arith.constant 0 : index
    %c0_172 = arith.constant 0 : index
    %412 = vector.load %arg10[%c1_170, %c0_171, %c0_172] : memref<4x1x32xf32, #tpu.memory_space<vmem>>, vector<1x1x32xf32>
    %413 = vector.shape_cast %412 : vector<1x1x32xf32> to vector<1x32xf32>
    %414 = tpu.iota {dimensions = array<i32: 1>} : vector<2x8x64xi32>
    %415 = vector.shape_cast %414 : vector<2x8x64xi32> to vector<16x64xi32>
    %cst_173 = arith.constant 0.000000e+00 : f32
    %416 = vector.broadcast %cst_173 : f32 to vector<16x32xf32>
    %417 = vector.broadcast %413 : vector<1x32xf32> to vector<16x32xf32>
    %418 = arith.addf %416, %417 : vector<16x32xf32>
    %cst_174 = arith.constant 0.000000e+00 : f32
    %419 = vector.broadcast %cst_174 : f32 to vector<1x64xf32>
    %420 = vector.extract_strided_slice %409 {offsets = [0, 0], sizes = [15, 64], strides = [1, 1]} : vector<16x64xf32> to vector<15x64xf32>
    %421 = tpu.concatenate %419, %420 in 0 : vector<1x64xf32>, vector<15x64xf32> -> vector<16x64xf32>
    %c1_i32_175 = arith.constant 1 : i32
    %422 = vector.broadcast %c1_i32_175 : i32 to vector<16x64xi32>
    %423 = arith.cmpi sge, %415, %422 : vector<16x64xi32>
    %cst_176 = arith.constant 0.000000e+00 : f32
    %424 = vector.broadcast %cst_176 : f32 to vector<16x64xf32>
    %425 = arith.select %423, %421, %424 : vector<16x64xi1>, vector<16x64xf32>
    %426 = arith.truncf %425 : vector<16x64xf32> to vector<16x64xbf16>
    %427 = vector.extract_strided_slice %411 {offsets = [0, 0], sizes = [64, 32], strides = [1, 1]} : vector<192x32xbf16> to vector<64x32xbf16>
    %cst_177 = arith.constant dense<0.000000e+00> : vector<16x32xf32>
    %428 = tpu.matmul %426, %427, %cst_177 {dimension_numbers = #tpu.dot_dimension_numbers<[1], [0], [0], [1], [0, 0, 1, 1], [], []>} : vector<16x64xbf16>, vector<64x32xbf16>, vector<16x32xf32> -> vector<16x32xf32>
    %429 = arith.addf %418, %428 : vector<16x32xf32>
    %430 = arith.truncf %409 : vector<16x64xf32> to vector<16x64xbf16>
    %431 = vector.extract_strided_slice %411 {offsets = [64, 0], sizes = [64, 32], strides = [1, 1]} : vector<192x32xbf16> to vector<64x32xbf16>
    %cst_178 = arith.constant dense<0.000000e+00> : vector<16x32xf32>
    %432 = tpu.matmul %430, %431, %cst_178 {dimension_numbers = #tpu.dot_dimension_numbers<[1], [0], [0], [1], [0, 0, 1, 1], [], []>} : vector<16x64xbf16>, vector<64x32xbf16>, vector<16x32xf32> -> vector<16x32xf32>
    %433 = arith.addf %429, %432 : vector<16x32xf32>
    %434 = vector.extract_strided_slice %409 {offsets = [1, 0], sizes = [15, 64], strides = [1, 1]} : vector<16x64xf32> to vector<15x64xf32>
    %cst_179 = arith.constant 0.000000e+00 : f32
    %435 = vector.broadcast %cst_179 : f32 to vector<1x64xf32>
    %436 = tpu.concatenate %434, %435 in 0 : vector<15x64xf32>, vector<1x64xf32> -> vector<16x64xf32>
    %c7_i32_180 = arith.constant 7 : i32
    %437 = vector.broadcast %c7_i32_180 : i32 to vector<16x64xi32>
    %438 = arith.cmpi slt, %415, %437 : vector<16x64xi32>
    %cst_181 = arith.constant 0.000000e+00 : f32
    %439 = vector.broadcast %cst_181 : f32 to vector<16x64xf32>
    %440 = arith.select %438, %436, %439 : vector<16x64xi1>, vector<16x64xf32>
    %441 = arith.truncf %440 : vector<16x64xf32> to vector<16x64xbf16>
    %442 = vector.extract_strided_slice %411 {offsets = [128, 0], sizes = [64, 32], strides = [1, 1]} : vector<192x32xbf16> to vector<64x32xbf16>
    %cst_182 = arith.constant dense<0.000000e+00> : vector<16x32xf32>
    %443 = tpu.matmul %441, %442, %cst_182 {dimension_numbers = #tpu.dot_dimension_numbers<[1], [0], [0], [1], [0, 0, 1, 1], [], []>} : vector<16x64xbf16>, vector<64x32xbf16>, vector<16x32xf32> -> vector<16x32xf32>
    %444 = arith.addf %433, %443 : vector<16x32xf32>
    %445 = arith.addf %372, %444 : vector<16x32xf32>
    %c1_183 = arith.constant 1 : index
    %c0_184 = arith.constant 0 : index
    %c0_185 = arith.constant 0 : index
    %446 = vector.load %arg11[%c1_183, %c0_184, %c0_185] : memref<4x1x32xf32, #tpu.memory_space<vmem>>, vector<1x1x32xf32>
    %447 = vector.shape_cast %446 : vector<1x1x32xf32> to vector<1x32xf32>
    %c1_186 = arith.constant 1 : index
    %c0_187 = arith.constant 0 : index
    %c0_188 = arith.constant 0 : index
    %448 = vector.load %arg12[%c1_186, %c0_187, %c0_188] : memref<4x1x32xf32, #tpu.memory_space<vmem>>, vector<1x1x32xf32>
    %449 = vector.shape_cast %448 : vector<1x1x32xf32> to vector<1x32xf32>
    %cst_189 = arith.constant dense<0.000000e+00> : vector<16xf32>
    %450 = vector.multi_reduction <add>, %445, %cst_189 [1] : vector<16x32xf32> to vector<16xf32>
    %451 = vector.shape_cast %450 : vector<16xf32> to vector<16x1xf32>
    %cst_190 = arith.constant 3.200000e+01 : f32
    %452 = vector.broadcast %cst_190 : f32 to vector<16x1xf32>
    %453 = arith.divf %451, %452 : vector<16x1xf32>
    %454 = vector.broadcast %453 : vector<16x1xf32> to vector<16x32xf32>
    %455 = arith.subf %445, %454 : vector<16x32xf32>
    %456 = arith.mulf %455, %455 : vector<16x32xf32>
    %cst_191 = arith.constant dense<0.000000e+00> : vector<16xf32>
    %457 = vector.multi_reduction <add>, %456, %cst_191 [1] : vector<16x32xf32> to vector<16xf32>
    %458 = vector.shape_cast %457 : vector<16xf32> to vector<16x1xf32>
    %cst_192 = arith.constant 3.200000e+01 : f32
    %459 = vector.broadcast %cst_192 : f32 to vector<16x1xf32>
    %460 = arith.divf %458, %459 : vector<16x1xf32>
    %461 = vector.broadcast %453 : vector<16x1xf32> to vector<16x32xf32>
    %462 = arith.subf %445, %461 : vector<16x32xf32>
    %cst_193 = arith.constant 9.99999974E-6 : f32
    %463 = vector.broadcast %cst_193 : f32 to vector<16x1xf32>
    %464 = arith.addf %460, %463 : vector<16x1xf32>
    %465 = math.rsqrt %464 : vector<16x1xf32>
    %466 = vector.broadcast %465 : vector<16x1xf32> to vector<16x32xf32>
    %467 = arith.mulf %462, %466 : vector<16x32xf32>
    %468 = vector.broadcast %447 : vector<1x32xf32> to vector<16x32xf32>
    %469 = arith.mulf %467, %468 : vector<16x32xf32>
    %470 = vector.broadcast %449 : vector<1x32xf32> to vector<16x32xf32>
    %471 = arith.addf %469, %470 : vector<16x32xf32>
    %c0_194 = arith.constant 0 : index
    %c0_195 = arith.constant 0 : index
    %472 = vector.load %arg13[%c0_194, %c0_195] : memref<96x32xbf16, #tpu.memory_space<vmem>>, vector<96x32xbf16>
    %c0_196 = arith.constant 0 : index
    %c0_197 = arith.constant 0 : index
    %473 = vector.load %arg14[%c0_196, %c0_197] : memref<1x32xf32, #tpu.memory_space<vmem>>, vector<1x32xf32>
    %474 = tpu.iota {dimensions = array<i32: 1>} : vector<2x8x32xi32>
    %475 = vector.shape_cast %474 : vector<2x8x32xi32> to vector<16x32xi32>
    %cst_198 = arith.constant 0.000000e+00 : f32
    %476 = vector.broadcast %cst_198 : f32 to vector<16x32xf32>
    %477 = vector.broadcast %473 : vector<1x32xf32> to vector<16x32xf32>
    %478 = arith.addf %476, %477 : vector<16x32xf32>
    %cst_199 = arith.constant 0.000000e+00 : f32
    %479 = vector.broadcast %cst_199 : f32 to vector<1x32xf32>
    %480 = vector.extract_strided_slice %471 {offsets = [0, 0], sizes = [15, 32], strides = [1, 1]} : vector<16x32xf32> to vector<15x32xf32>
    %481 = tpu.concatenate %479, %480 in 0 : vector<1x32xf32>, vector<15x32xf32> -> vector<16x32xf32>
    %c1_i32_200 = arith.constant 1 : i32
    %482 = vector.broadcast %c1_i32_200 : i32 to vector<16x32xi32>
    %483 = arith.cmpi sge, %475, %482 : vector<16x32xi32>
    %cst_201 = arith.constant 0.000000e+00 : f32
    %484 = vector.broadcast %cst_201 : f32 to vector<16x32xf32>
    %485 = arith.select %483, %481, %484 : vector<16x32xi1>, vector<16x32xf32>
    %486 = arith.truncf %485 : vector<16x32xf32> to vector<16x32xbf16>
    %487 = vector.extract_strided_slice %472 {offsets = [0, 0], sizes = [32, 32], strides = [1, 1]} : vector<96x32xbf16> to vector<32x32xbf16>
    %cst_202 = arith.constant dense<0.000000e+00> : vector<16x32xf32>
    %488 = tpu.matmul %486, %487, %cst_202 {dimension_numbers = #tpu.dot_dimension_numbers<[1], [0], [0], [1], [0, 0, 1, 1], [], []>} : vector<16x32xbf16>, vector<32x32xbf16>, vector<16x32xf32> -> vector<16x32xf32>
    %489 = arith.addf %478, %488 : vector<16x32xf32>
    %490 = arith.truncf %471 : vector<16x32xf32> to vector<16x32xbf16>
    %491 = vector.extract_strided_slice %472 {offsets = [32, 0], sizes = [32, 32], strides = [1, 1]} : vector<96x32xbf16> to vector<32x32xbf16>
    %cst_203 = arith.constant dense<0.000000e+00> : vector<16x32xf32>
    %492 = tpu.matmul %490, %491, %cst_203 {dimension_numbers = #tpu.dot_dimension_numbers<[1], [0], [0], [1], [0, 0, 1, 1], [], []>} : vector<16x32xbf16>, vector<32x32xbf16>, vector<16x32xf32> -> vector<16x32xf32>
    %493 = arith.addf %489, %492 : vector<16x32xf32>
    %494 = vector.extract_strided_slice %471 {offsets = [1, 0], sizes = [15, 32], strides = [1, 1]} : vector<16x32xf32> to vector<15x32xf32>
    %cst_204 = arith.constant 0.000000e+00 : f32
    %495 = vector.broadcast %cst_204 : f32 to vector<1x32xf32>
    %496 = tpu.concatenate %494, %495 in 0 : vector<15x32xf32>, vector<1x32xf32> -> vector<16x32xf32>
    %c7_i32_205 = arith.constant 7 : i32
    %497 = vector.broadcast %c7_i32_205 : i32 to vector<16x32xi32>
    %498 = arith.cmpi slt, %475, %497 : vector<16x32xi32>
    %cst_206 = arith.constant 0.000000e+00 : f32
    %499 = vector.broadcast %cst_206 : f32 to vector<16x32xf32>
    %500 = arith.select %498, %496, %499 : vector<16x32xi1>, vector<16x32xf32>
    %501 = arith.truncf %500 : vector<16x32xf32> to vector<16x32xbf16>
    %502 = vector.extract_strided_slice %472 {offsets = [64, 0], sizes = [32, 32], strides = [1, 1]} : vector<96x32xbf16> to vector<32x32xbf16>
    %cst_207 = arith.constant dense<0.000000e+00> : vector<16x32xf32>
    %503 = tpu.matmul %501, %502, %cst_207 {dimension_numbers = #tpu.dot_dimension_numbers<[1], [0], [0], [1], [0, 0, 1, 1], [], []>} : vector<16x32xbf16>, vector<32x32xbf16>, vector<16x32xf32> -> vector<16x32xf32>
    %504 = arith.addf %493, %503 : vector<16x32xf32>
    %cst_208 = arith.constant 0.000000e+00 : f32
    %505 = vector.broadcast %cst_208 : f32 to vector<16x32xf32>
    %506 = arith.maximumf %504, %505 : vector<16x32xf32>
    %c0_209 = arith.constant 0 : index
    %c0_210 = arith.constant 0 : index
    %507 = vector.load %arg15[%c0_209, %c0_210] : memref<1x32xf32, #tpu.memory_space<vmem>>, vector<1x32xf32>
    %c0_211 = arith.constant 0 : index
    %c0_212 = arith.constant 0 : index
    %508 = vector.load %arg16[%c0_211, %c0_212] : memref<1x32xf32, #tpu.memory_space<vmem>>, vector<1x32xf32>
    %cst_213 = arith.constant dense<0.000000e+00> : vector<16xf32>
    %509 = vector.multi_reduction <add>, %506, %cst_213 [1] : vector<16x32xf32> to vector<16xf32>
    %510 = vector.shape_cast %509 : vector<16xf32> to vector<16x1xf32>
    %cst_214 = arith.constant 3.200000e+01 : f32
    %511 = vector.broadcast %cst_214 : f32 to vector<16x1xf32>
    %512 = arith.divf %510, %511 : vector<16x1xf32>
    %513 = vector.broadcast %512 : vector<16x1xf32> to vector<16x32xf32>
    %514 = arith.subf %506, %513 : vector<16x32xf32>
    %515 = arith.mulf %514, %514 : vector<16x32xf32>
    %cst_215 = arith.constant dense<0.000000e+00> : vector<16xf32>
    %516 = vector.multi_reduction <add>, %515, %cst_215 [1] : vector<16x32xf32> to vector<16xf32>
    %517 = vector.shape_cast %516 : vector<16xf32> to vector<16x1xf32>
    %cst_216 = arith.constant 3.200000e+01 : f32
    %518 = vector.broadcast %cst_216 : f32 to vector<16x1xf32>
    %519 = arith.divf %517, %518 : vector<16x1xf32>
    %520 = vector.broadcast %512 : vector<16x1xf32> to vector<16x32xf32>
    %521 = arith.subf %506, %520 : vector<16x32xf32>
    %cst_217 = arith.constant 9.99999974E-6 : f32
    %522 = vector.broadcast %cst_217 : f32 to vector<16x1xf32>
    %523 = arith.addf %519, %522 : vector<16x1xf32>
    %524 = math.rsqrt %523 : vector<16x1xf32>
    %525 = vector.broadcast %524 : vector<16x1xf32> to vector<16x32xf32>
    %526 = arith.mulf %521, %525 : vector<16x32xf32>
    %527 = vector.broadcast %507 : vector<1x32xf32> to vector<16x32xf32>
    %528 = arith.mulf %526, %527 : vector<16x32xf32>
    %529 = vector.broadcast %508 : vector<1x32xf32> to vector<16x32xf32>
    %530 = arith.addf %528, %529 : vector<16x32xf32>
    %c0_218 = arith.constant 0 : index
    %c0_219 = arith.constant 0 : index
    %531 = vector.load %arg17[%c0_218, %c0_219] : memref<96x32xbf16, #tpu.memory_space<vmem>>, vector<96x32xbf16>
    %c0_220 = arith.constant 0 : index
    %c0_221 = arith.constant 0 : index
    %532 = vector.load %arg18[%c0_220, %c0_221] : memref<1x32xf32, #tpu.memory_space<vmem>>, vector<1x32xf32>
    %533 = tpu.iota {dimensions = array<i32: 1>} : vector<2x8x32xi32>
    %534 = vector.shape_cast %533 : vector<2x8x32xi32> to vector<16x32xi32>
    %cst_222 = arith.constant 0.000000e+00 : f32
    %535 = vector.broadcast %cst_222 : f32 to vector<16x32xf32>
    %536 = vector.broadcast %532 : vector<1x32xf32> to vector<16x32xf32>
    %537 = arith.addf %535, %536 : vector<16x32xf32>
    %cst_223 = arith.constant 0.000000e+00 : f32
    %538 = vector.broadcast %cst_223 : f32 to vector<1x32xf32>
    %539 = vector.extract_strided_slice %530 {offsets = [0, 0], sizes = [15, 32], strides = [1, 1]} : vector<16x32xf32> to vector<15x32xf32>
    %540 = tpu.concatenate %538, %539 in 0 : vector<1x32xf32>, vector<15x32xf32> -> vector<16x32xf32>
    %c1_i32_224 = arith.constant 1 : i32
    %541 = vector.broadcast %c1_i32_224 : i32 to vector<16x32xi32>
    %542 = arith.cmpi sge, %534, %541 : vector<16x32xi32>
    %cst_225 = arith.constant 0.000000e+00 : f32
    %543 = vector.broadcast %cst_225 : f32 to vector<16x32xf32>
    %544 = arith.select %542, %540, %543 : vector<16x32xi1>, vector<16x32xf32>
    %545 = arith.truncf %544 : vector<16x32xf32> to vector<16x32xbf16>
    %546 = vector.extract_strided_slice %531 {offsets = [0, 0], sizes = [32, 32], strides = [1, 1]} : vector<96x32xbf16> to vector<32x32xbf16>
    %cst_226 = arith.constant dense<0.000000e+00> : vector<16x32xf32>
    %547 = tpu.matmul %545, %546, %cst_226 {dimension_numbers = #tpu.dot_dimension_numbers<[1], [0], [0], [1], [0, 0, 1, 1], [], []>} : vector<16x32xbf16>, vector<32x32xbf16>, vector<16x32xf32> -> vector<16x32xf32>
    %548 = arith.addf %537, %547 : vector<16x32xf32>
    %549 = arith.truncf %530 : vector<16x32xf32> to vector<16x32xbf16>
    %550 = vector.extract_strided_slice %531 {offsets = [32, 0], sizes = [32, 32], strides = [1, 1]} : vector<96x32xbf16> to vector<32x32xbf16>
    %cst_227 = arith.constant dense<0.000000e+00> : vector<16x32xf32>
    %551 = tpu.matmul %549, %550, %cst_227 {dimension_numbers = #tpu.dot_dimension_numbers<[1], [0], [0], [1], [0, 0, 1, 1], [], []>} : vector<16x32xbf16>, vector<32x32xbf16>, vector<16x32xf32> -> vector<16x32xf32>
    %552 = arith.addf %548, %551 : vector<16x32xf32>
    %553 = vector.extract_strided_slice %530 {offsets = [1, 0], sizes = [15, 32], strides = [1, 1]} : vector<16x32xf32> to vector<15x32xf32>
    %cst_228 = arith.constant 0.000000e+00 : f32
    %554 = vector.broadcast %cst_228 : f32 to vector<1x32xf32>
    %555 = tpu.concatenate %553, %554 in 0 : vector<15x32xf32>, vector<1x32xf32> -> vector<16x32xf32>
    %c7_i32_229 = arith.constant 7 : i32
    %556 = vector.broadcast %c7_i32_229 : i32 to vector<16x32xi32>
    %557 = arith.cmpi slt, %534, %556 : vector<16x32xi32>
    %cst_230 = arith.constant 0.000000e+00 : f32
    %558 = vector.broadcast %cst_230 : f32 to vector<16x32xf32>
    %559 = arith.select %557, %555, %558 : vector<16x32xi1>, vector<16x32xf32>
    %560 = arith.truncf %559 : vector<16x32xf32> to vector<16x32xbf16>
    %561 = vector.extract_strided_slice %531 {offsets = [64, 0], sizes = [32, 32], strides = [1, 1]} : vector<96x32xbf16> to vector<32x32xbf16>
    %cst_231 = arith.constant dense<0.000000e+00> : vector<16x32xf32>
    %562 = tpu.matmul %560, %561, %cst_231 {dimension_numbers = #tpu.dot_dimension_numbers<[1], [0], [0], [1], [0, 0, 1, 1], [], []>} : vector<16x32xbf16>, vector<32x32xbf16>, vector<16x32xf32> -> vector<16x32xf32>
    %563 = arith.addf %552, %562 : vector<16x32xf32>
    %cst_232 = arith.constant 0.000000e+00 : f32
    %564 = vector.broadcast %cst_232 : f32 to vector<16x32xf32>
    %565 = arith.maximumf %563, %564 : vector<16x32xf32>
    %c0_233 = arith.constant 0 : index
    %c0_234 = arith.constant 0 : index
    %566 = vector.load %arg19[%c0_233, %c0_234] : memref<1x32xf32, #tpu.memory_space<vmem>>, vector<1x32xf32>
    %c0_235 = arith.constant 0 : index
    %c0_236 = arith.constant 0 : index
    %567 = vector.load %arg20[%c0_235, %c0_236] : memref<1x32xf32, #tpu.memory_space<vmem>>, vector<1x32xf32>
    %cst_237 = arith.constant dense<0.000000e+00> : vector<16xf32>
    %568 = vector.multi_reduction <add>, %565, %cst_237 [1] : vector<16x32xf32> to vector<16xf32>
    %569 = vector.shape_cast %568 : vector<16xf32> to vector<16x1xf32>
    %cst_238 = arith.constant 3.200000e+01 : f32
    %570 = vector.broadcast %cst_238 : f32 to vector<16x1xf32>
    %571 = arith.divf %569, %570 : vector<16x1xf32>
    %572 = vector.broadcast %571 : vector<16x1xf32> to vector<16x32xf32>
    %573 = arith.subf %565, %572 : vector<16x32xf32>
    %574 = arith.mulf %573, %573 : vector<16x32xf32>
    %cst_239 = arith.constant dense<0.000000e+00> : vector<16xf32>
    %575 = vector.multi_reduction <add>, %574, %cst_239 [1] : vector<16x32xf32> to vector<16xf32>
    %576 = vector.shape_cast %575 : vector<16xf32> to vector<16x1xf32>
    %cst_240 = arith.constant 3.200000e+01 : f32
    %577 = vector.broadcast %cst_240 : f32 to vector<16x1xf32>
    %578 = arith.divf %576, %577 : vector<16x1xf32>
    %579 = vector.broadcast %571 : vector<16x1xf32> to vector<16x32xf32>
    %580 = arith.subf %565, %579 : vector<16x32xf32>
    %cst_241 = arith.constant 9.99999974E-6 : f32
    %581 = vector.broadcast %cst_241 : f32 to vector<16x1xf32>
    %582 = arith.addf %578, %581 : vector<16x1xf32>
    %583 = math.rsqrt %582 : vector<16x1xf32>
    %584 = vector.broadcast %583 : vector<16x1xf32> to vector<16x32xf32>
    %585 = arith.mulf %580, %584 : vector<16x32xf32>
    %586 = vector.broadcast %566 : vector<1x32xf32> to vector<16x32xf32>
    %587 = arith.mulf %585, %586 : vector<16x32xf32>
    %588 = vector.broadcast %567 : vector<1x32xf32> to vector<16x32xf32>
    %589 = arith.addf %587, %588 : vector<16x32xf32>
    %c0_242 = arith.constant 0 : index
    %c0_243 = arith.constant 0 : index
    %590 = vector.load %arg21[%c0_242, %c0_243] : memref<1x32xf32, #tpu.memory_space<vmem>>, vector<1x32xf32>
    %591 = tpu.transpose %589, [1, 0] : vector<16x32xf32> -> vector<32x16xf32>
    %cst_244 = arith.constant dense<0.000000e+00> : vector<1x16xf32>
    %592 = tpu.matmul %590, %591, %cst_244 {dimension_numbers = #tpu.dot_dimension_numbers<[1], [0], [0], [1], [0, 0, 1, 1], [], []>} : vector<1x32xf32>, vector<32x16xf32>, vector<1x16xf32> -> vector<1x16xf32>
    %c0_245 = arith.constant 0 : index
    %c0_246 = arith.constant 0 : index
    %593 = vector.load %arg22[%c0_245, %c0_246] : memref<1x1xf32, #tpu.memory_space<vmem>>, vector<1x1xf32>
    %594 = vector.broadcast %593 : vector<1x1xf32> to vector<1x16xf32>
    %595 = arith.addf %592, %594 : vector<1x16xf32>
    %c0_247 = arith.constant 0 : index
    %c0_248 = arith.constant 0 : index
    %596 = vector.load %arg26[%c0_247, %c0_248] : memref<1x16xf32, #tpu.memory_space<vmem>>, vector<1x16xf32>
    tpu.vector_store %arg26[%c0_247, %c0_248], %595 {strides = array<i32>} : memref<1x16xf32, #tpu.memory_space<vmem>>, vector<1x16xf32>,
    %597 = arith.truncf %471 : vector<16x32xf32> to vector<16x32xbf16>
    %c2 = arith.constant 2 : index
    %c0_249 = arith.constant 0 : index
    %c0_250 = arith.constant 0 : index
    %598 = vector.load %arg1[%c2, %c0_249, %c0_250] : memref<4x32x96xbf16, #tpu.memory_space<vmem>>, vector<1x32x96xbf16>
    %599 = vector.shape_cast %598 : vector<1x32x96xbf16> to vector<32x96xbf16>
    %cst_251 = arith.constant dense<0.000000e+00> : vector<16x96xf32>
    %600 = tpu.matmul %597, %599, %cst_251 {dimension_numbers = #tpu.dot_dimension_numbers<[1], [0], [0], [1], [0, 0, 1, 1], [], []>} : vector<16x32xbf16>, vector<32x96xbf16>, vector<16x96xf32> -> vector<16x96xf32>
    %c2_252 = arith.constant 2 : index
    %c0_253 = arith.constant 0 : index
    %c0_254 = arith.constant 0 : index
    %601 = vector.load %arg2[%c2_252, %c0_253, %c0_254] : memref<4x1x96xf32, #tpu.memory_space<vmem>>, vector<1x1x96xf32>
    %602 = vector.shape_cast %601 : vector<1x1x96xf32> to vector<1x96xf32>
    %603 = vector.broadcast %602 : vector<1x96xf32> to vector<16x96xf32>
    %604 = arith.addf %600, %603 : vector<16x96xf32>
    %605 = vector.extract_strided_slice %604 {offsets = [0, 32], sizes = [16, 16], strides = [1, 1]} : vector<16x96xf32> to vector<16x16xf32>
    %606 = vector.shape_cast %605 : vector<16x16xf32> to vector<2x8x16xf32>
    %607 = vector.extract_strided_slice %604 {offsets = [0, 64], sizes = [16, 16], strides = [1, 1]} : vector<16x96xf32> to vector<16x16xf32>
    %608 = vector.shape_cast %607 : vector<16x16xf32> to vector<2x8x16xf32>
    %609 = vector.extract_strided_slice %604 {offsets = [0, 0], sizes = [8, 16], strides = [1, 1]} : vector<16x96xf32> to vector<8x16xf32>
    %610 = vector.shape_cast %609 : vector<8x16xf32> to vector<1x8x16xf32>
    %611 = vector.broadcast %610 : vector<1x8x16xf32> to vector<2x8x16xf32>
    %612 = arith.mulf %611, %606 : vector<2x8x16xf32>
    %cst_255 = arith.constant dense<0.000000e+00> : vector<2x8xf32>
    %613 = vector.multi_reduction <add>, %612, %cst_255 [2] : vector<2x8x16xf32> to vector<2x8xf32>
    %614 = vector.shape_cast %613 : vector<2x8xf32> to vector<2x8x1xf32>
    %cst_256 = arith.constant 2.500000e-01 : f32
    %615 = vector.broadcast %cst_256 : f32 to vector<2x8x1xf32>
    %616 = arith.mulf %614, %615 : vector<2x8x1xf32>
    %cst_257 = arith.constant dense<0xFF800000> : vector<8x1xf32>
    %617 = vector.multi_reduction <maximumf>, %616, %cst_257 [0] : vector<2x8x1xf32> to vector<8x1xf32>
    %618 = vector.shape_cast %617 : vector<8x1xf32> to vector<1x8x1xf32>
    %619 = vector.broadcast %618 : vector<1x8x1xf32> to vector<2x8x1xf32>
    %620 = arith.subf %616, %619 : vector<2x8x1xf32>
    %621 = math.exp %620 : vector<2x8x1xf32>
    %cst_258 = arith.constant dense<0.000000e+00> : vector<8x1xf32>
    %622 = vector.multi_reduction <add>, %621, %cst_258 [0] : vector<2x8x1xf32> to vector<8x1xf32>
    %623 = vector.shape_cast %622 : vector<8x1xf32> to vector<1x8x1xf32>
    %624 = vector.broadcast %623 : vector<1x8x1xf32> to vector<2x8x1xf32>
    %625 = arith.divf %621, %624 : vector<2x8x1xf32>
    %626 = vector.broadcast %625 : vector<2x8x1xf32> to vector<2x8x16xf32>
    %627 = arith.mulf %626, %608 : vector<2x8x16xf32>
    %cst_259 = arith.constant dense<0.000000e+00> : vector<8x16xf32>
    %628 = vector.multi_reduction <add>, %627, %cst_259 [0] : vector<2x8x16xf32> to vector<8x16xf32>
    %c0_260 = arith.constant 0 : index
    %c0_261 = arith.constant 0 : index
    %629 = vector.load %arg27[%c0_260, %c0_261] : memref<16x32xf32, #tpu.memory_space<vmem>>, vector<8x16xf32>
    tpu.vector_store %arg27[%c0_260, %c0_261], %628 {strides = array<i32>} : memref<16x32xf32, #tpu.memory_space<vmem>>, vector<8x16xf32>,
    %630 = vector.extract_strided_slice %604 {offsets = [8, 0], sizes = [8, 16], strides = [1, 1]} : vector<16x96xf32> to vector<8x16xf32>
    %631 = vector.shape_cast %630 : vector<8x16xf32> to vector<1x8x16xf32>
    %632 = vector.broadcast %631 : vector<1x8x16xf32> to vector<2x8x16xf32>
    %633 = arith.mulf %632, %606 : vector<2x8x16xf32>
    %cst_262 = arith.constant dense<0.000000e+00> : vector<2x8xf32>
    %634 = vector.multi_reduction <add>, %633, %cst_262 [2] : vector<2x8x16xf32> to vector<2x8xf32>
    %635 = vector.shape_cast %634 : vector<2x8xf32> to vector<2x8x1xf32>
    %cst_263 = arith.constant 2.500000e-01 : f32
    %636 = vector.broadcast %cst_263 : f32 to vector<2x8x1xf32>
    %637 = arith.mulf %635, %636 : vector<2x8x1xf32>
    %cst_264 = arith.constant dense<0xFF800000> : vector<8x1xf32>
    %638 = vector.multi_reduction <maximumf>, %637, %cst_264 [0] : vector<2x8x1xf32> to vector<8x1xf32>
    %639 = vector.shape_cast %638 : vector<8x1xf32> to vector<1x8x1xf32>
    %640 = vector.broadcast %639 : vector<1x8x1xf32> to vector<2x8x1xf32>
    %641 = arith.subf %637, %640 : vector<2x8x1xf32>
    %642 = math.exp %641 : vector<2x8x1xf32>
    %cst_265 = arith.constant dense<0.000000e+00> : vector<8x1xf32>
    %643 = vector.multi_reduction <add>, %642, %cst_265 [0] : vector<2x8x1xf32> to vector<8x1xf32>
    %644 = vector.shape_cast %643 : vector<8x1xf32> to vector<1x8x1xf32>
    %645 = vector.broadcast %644 : vector<1x8x1xf32> to vector<2x8x1xf32>
    %646 = arith.divf %642, %645 : vector<2x8x1xf32>
    %647 = vector.broadcast %646 : vector<2x8x1xf32> to vector<2x8x16xf32>
    %648 = arith.mulf %647, %608 : vector<2x8x16xf32>
    %cst_266 = arith.constant dense<0.000000e+00> : vector<8x16xf32>
    %649 = vector.multi_reduction <add>, %648, %cst_266 [0] : vector<2x8x16xf32> to vector<8x16xf32>
    %c8_267 = arith.constant 8 : index
    %c0_268 = arith.constant 0 : index
    %650 = vector.load %arg27[%c8_267, %c0_268] : memref<16x32xf32, #tpu.memory_space<vmem>>, vector<8x16xf32>
    tpu.vector_store %arg27[%c8_267, %c0_268], %649 {strides = array<i32>} : memref<16x32xf32, #tpu.memory_space<vmem>>, vector<8x16xf32>,
    %651 = vector.extract_strided_slice %604 {offsets = [0, 48], sizes = [16, 16], strides = [1, 1]} : vector<16x96xf32> to vector<16x16xf32>
    %652 = vector.shape_cast %651 : vector<16x16xf32> to vector<2x8x16xf32>
    %653 = vector.extract_strided_slice %604 {offsets = [0, 80], sizes = [16, 16], strides = [1, 1]} : vector<16x96xf32> to vector<16x16xf32>
    %654 = vector.shape_cast %653 : vector<16x16xf32> to vector<2x8x16xf32>
    %655 = vector.extract_strided_slice %604 {offsets = [0, 16], sizes = [8, 16], strides = [1, 1]} : vector<16x96xf32> to vector<8x16xf32>
    %656 = vector.shape_cast %655 : vector<8x16xf32> to vector<1x8x16xf32>
    %657 = vector.broadcast %656 : vector<1x8x16xf32> to vector<2x8x16xf32>
    %658 = arith.mulf %657, %652 : vector<2x8x16xf32>
    %cst_269 = arith.constant dense<0.000000e+00> : vector<2x8xf32>
    %659 = vector.multi_reduction <add>, %658, %cst_269 [2] : vector<2x8x16xf32> to vector<2x8xf32>
    %660 = vector.shape_cast %659 : vector<2x8xf32> to vector<2x8x1xf32>
    %cst_270 = arith.constant 2.500000e-01 : f32
    %661 = vector.broadcast %cst_270 : f32 to vector<2x8x1xf32>
    %662 = arith.mulf %660, %661 : vector<2x8x1xf32>
    %cst_271 = arith.constant dense<0xFF800000> : vector<8x1xf32>
    %663 = vector.multi_reduction <maximumf>, %662, %cst_271 [0] : vector<2x8x1xf32> to vector<8x1xf32>
    %664 = vector.shape_cast %663 : vector<8x1xf32> to vector<1x8x1xf32>
    %665 = vector.broadcast %664 : vector<1x8x1xf32> to vector<2x8x1xf32>
    %666 = arith.subf %662, %665 : vector<2x8x1xf32>
    %667 = math.exp %666 : vector<2x8x1xf32>
    %cst_272 = arith.constant dense<0.000000e+00> : vector<8x1xf32>
    %668 = vector.multi_reduction <add>, %667, %cst_272 [0] : vector<2x8x1xf32> to vector<8x1xf32>
    %669 = vector.shape_cast %668 : vector<8x1xf32> to vector<1x8x1xf32>
    %670 = vector.broadcast %669 : vector<1x8x1xf32> to vector<2x8x1xf32>
    %671 = arith.divf %667, %670 : vector<2x8x1xf32>
    %672 = vector.broadcast %671 : vector<2x8x1xf32> to vector<2x8x16xf32>
    %673 = arith.mulf %672, %654 : vector<2x8x16xf32>
    %cst_273 = arith.constant dense<0.000000e+00> : vector<8x16xf32>
    %674 = vector.multi_reduction <add>, %673, %cst_273 [0] : vector<2x8x16xf32> to vector<8x16xf32>
    %c0_274 = arith.constant 0 : index
    %c16_275 = arith.constant 16 : index
    %675 = vector.load %arg27[%c0_274, %c16_275] : memref<16x32xf32, #tpu.memory_space<vmem>>, vector<8x16xf32>
    tpu.vector_store %arg27[%c0_274, %c16_275], %674 {strides = array<i32>} : memref<16x32xf32, #tpu.memory_space<vmem>>, vector<8x16xf32>,
    %676 = vector.extract_strided_slice %604 {offsets = [8, 16], sizes = [8, 16], strides = [1, 1]} : vector<16x96xf32> to vector<8x16xf32>
    %677 = vector.shape_cast %676 : vector<8x16xf32> to vector<1x8x16xf32>
    %678 = vector.broadcast %677 : vector<1x8x16xf32> to vector<2x8x16xf32>
    %679 = arith.mulf %678, %652 : vector<2x8x16xf32>
    %cst_276 = arith.constant dense<0.000000e+00> : vector<2x8xf32>
    %680 = vector.multi_reduction <add>, %679, %cst_276 [2] : vector<2x8x16xf32> to vector<2x8xf32>
    %681 = vector.shape_cast %680 : vector<2x8xf32> to vector<2x8x1xf32>
    %cst_277 = arith.constant 2.500000e-01 : f32
    %682 = vector.broadcast %cst_277 : f32 to vector<2x8x1xf32>
    %683 = arith.mulf %681, %682 : vector<2x8x1xf32>
    %cst_278 = arith.constant dense<0xFF800000> : vector<8x1xf32>
    %684 = vector.multi_reduction <maximumf>, %683, %cst_278 [0] : vector<2x8x1xf32> to vector<8x1xf32>
    %685 = vector.shape_cast %684 : vector<8x1xf32> to vector<1x8x1xf32>
    %686 = vector.broadcast %685 : vector<1x8x1xf32> to vector<2x8x1xf32>
    %687 = arith.subf %683, %686 : vector<2x8x1xf32>
    %688 = math.exp %687 : vector<2x8x1xf32>
    %cst_279 = arith.constant dense<0.000000e+00> : vector<8x1xf32>
    %689 = vector.multi_reduction <add>, %688, %cst_279 [0] : vector<2x8x1xf32> to vector<8x1xf32>
    %690 = vector.shape_cast %689 : vector<8x1xf32> to vector<1x8x1xf32>
    %691 = vector.broadcast %690 : vector<1x8x1xf32> to vector<2x8x1xf32>
    %692 = arith.divf %688, %691 : vector<2x8x1xf32>
    %693 = vector.broadcast %692 : vector<2x8x1xf32> to vector<2x8x16xf32>
    %694 = arith.mulf %693, %654 : vector<2x8x16xf32>
    %cst_280 = arith.constant dense<0.000000e+00> : vector<8x16xf32>
    %695 = vector.multi_reduction <add>, %694, %cst_280 [0] : vector<2x8x16xf32> to vector<8x16xf32>
    %c8_281 = arith.constant 8 : index
    %c16_282 = arith.constant 16 : index
    %696 = vector.load %arg27[%c8_281, %c16_282] : memref<16x32xf32, #tpu.memory_space<vmem>>, vector<8x16xf32>
    tpu.vector_store %arg27[%c8_281, %c16_282], %695 {strides = array<i32>} : memref<16x32xf32, #tpu.memory_space<vmem>>, vector<8x16xf32>,
    %c0_283 = arith.constant 0 : index
    %c0_284 = arith.constant 0 : index
    %697 = vector.load %arg27[%c0_283, %c0_284] : memref<16x32xf32, #tpu.memory_space<vmem>>, vector<16x32xf32>
    %698 = arith.truncf %697 : vector<16x32xf32> to vector<16x32xbf16>
    %c2_285 = arith.constant 2 : index
    %c0_286 = arith.constant 0 : index
    %c0_287 = arith.constant 0 : index
    %699 = vector.load %arg3[%c2_285, %c0_286, %c0_287] : memref<4x32x32xbf16, #tpu.memory_space<vmem>>, vector<1x32x32xbf16>
    %700 = vector.shape_cast %699 : vector<1x32x32xbf16> to vector<32x32xbf16>
    %cst_288 = arith.constant dense<0.000000e+00> : vector<16x32xf32>
    %701 = tpu.matmul %698, %700, %cst_288 {dimension_numbers = #tpu.dot_dimension_numbers<[1], [0], [0], [1], [0, 0, 1, 1], [], []>} : vector<16x32xbf16>, vector<32x32xbf16>, vector<16x32xf32> -> vector<16x32xf32>
    %c2_289 = arith.constant 2 : index
    %c0_290 = arith.constant 0 : index
    %c0_291 = arith.constant 0 : index
    %702 = vector.load %arg4[%c2_289, %c0_290, %c0_291] : memref<4x1x32xf32, #tpu.memory_space<vmem>>, vector<1x1x32xf32>
    %703 = vector.shape_cast %702 : vector<1x1x32xf32> to vector<1x32xf32>
    %704 = vector.broadcast %703 : vector<1x32xf32> to vector<16x32xf32>
    %705 = arith.addf %701, %704 : vector<16x32xf32>
    %706 = arith.addf %471, %705 : vector<16x32xf32>
    %c2_292 = arith.constant 2 : index
    %c0_293 = arith.constant 0 : index
    %c0_294 = arith.constant 0 : index
    %707 = vector.load %arg5[%c2_292, %c0_293, %c0_294] : memref<4x1x32xf32, #tpu.memory_space<vmem>>, vector<1x1x32xf32>
    %708 = vector.shape_cast %707 : vector<1x1x32xf32> to vector<1x32xf32>
    %c2_295 = arith.constant 2 : index
    %c0_296 = arith.constant 0 : index
    %c0_297 = arith.constant 0 : index
    %709 = vector.load %arg6[%c2_295, %c0_296, %c0_297] : memref<4x1x32xf32, #tpu.memory_space<vmem>>, vector<1x1x32xf32>
    %710 = vector.shape_cast %709 : vector<1x1x32xf32> to vector<1x32xf32>
    %cst_298 = arith.constant dense<0.000000e+00> : vector<16xf32>
    %711 = vector.multi_reduction <add>, %706, %cst_298 [1] : vector<16x32xf32> to vector<16xf32>
    %712 = vector.shape_cast %711 : vector<16xf32> to vector<16x1xf32>
    %cst_299 = arith.constant 3.200000e+01 : f32
    %713 = vector.broadcast %cst_299 : f32 to vector<16x1xf32>
    %714 = arith.divf %712, %713 : vector<16x1xf32>
    %715 = vector.broadcast %714 : vector<16x1xf32> to vector<16x32xf32>
    %716 = arith.subf %706, %715 : vector<16x32xf32>
    %717 = arith.mulf %716, %716 : vector<16x32xf32>
    %cst_300 = arith.constant dense<0.000000e+00> : vector<16xf32>
    %718 = vector.multi_reduction <add>, %717, %cst_300 [1] : vector<16x32xf32> to vector<16xf32>
    %719 = vector.shape_cast %718 : vector<16xf32> to vector<16x1xf32>
    %cst_301 = arith.constant 3.200000e+01 : f32
    %720 = vector.broadcast %cst_301 : f32 to vector<16x1xf32>
    %721 = arith.divf %719, %720 : vector<16x1xf32>
    %722 = vector.broadcast %714 : vector<16x1xf32> to vector<16x32xf32>
    %723 = arith.subf %706, %722 : vector<16x32xf32>
    %cst_302 = arith.constant 9.99999974E-6 : f32
    %724 = vector.broadcast %cst_302 : f32 to vector<16x1xf32>
    %725 = arith.addf %721, %724 : vector<16x1xf32>
    %726 = math.rsqrt %725 : vector<16x1xf32>
    %727 = vector.broadcast %726 : vector<16x1xf32> to vector<16x32xf32>
    %728 = arith.mulf %723, %727 : vector<16x32xf32>
    %729 = vector.broadcast %708 : vector<1x32xf32> to vector<16x32xf32>
    %730 = arith.mulf %728, %729 : vector<16x32xf32>
    %731 = vector.broadcast %710 : vector<1x32xf32> to vector<16x32xf32>
    %732 = arith.addf %730, %731 : vector<16x32xf32>
    %c2_303 = arith.constant 2 : index
    %c0_304 = arith.constant 0 : index
    %c0_305 = arith.constant 0 : index
    %733 = vector.load %arg7[%c2_303, %c0_304, %c0_305] : memref<4x96x64xbf16, #tpu.memory_space<vmem>>, vector<1x96x64xbf16>
    %734 = vector.shape_cast %733 : vector<1x96x64xbf16> to vector<96x64xbf16>
    %c2_306 = arith.constant 2 : index
    %c0_307 = arith.constant 0 : index
    %c0_308 = arith.constant 0 : index
    %735 = vector.load %arg8[%c2_306, %c0_307, %c0_308] : memref<4x1x64xf32, #tpu.memory_space<vmem>>, vector<1x1x64xf32>
    %736 = vector.shape_cast %735 : vector<1x1x64xf32> to vector<1x64xf32>
    %737 = tpu.iota {dimensions = array<i32: 1>} : vector<2x8x32xi32>
    %738 = vector.shape_cast %737 : vector<2x8x32xi32> to vector<16x32xi32>
    %cst_309 = arith.constant 0.000000e+00 : f32
    %739 = vector.broadcast %cst_309 : f32 to vector<16x64xf32>
    %740 = vector.broadcast %736 : vector<1x64xf32> to vector<16x64xf32>
    %741 = arith.addf %739, %740 : vector<16x64xf32>
    %cst_310 = arith.constant 0.000000e+00 : f32
    %742 = vector.broadcast %cst_310 : f32 to vector<1x32xf32>
    %743 = vector.extract_strided_slice %732 {offsets = [0, 0], sizes = [15, 32], strides = [1, 1]} : vector<16x32xf32> to vector<15x32xf32>
    %744 = tpu.concatenate %742, %743 in 0 : vector<1x32xf32>, vector<15x32xf32> -> vector<16x32xf32>
    %c1_i32_311 = arith.constant 1 : i32
    %745 = vector.broadcast %c1_i32_311 : i32 to vector<16x32xi32>
    %746 = arith.cmpi sge, %738, %745 : vector<16x32xi32>
    %cst_312 = arith.constant 0.000000e+00 : f32
    %747 = vector.broadcast %cst_312 : f32 to vector<16x32xf32>
    %748 = arith.select %746, %744, %747 : vector<16x32xi1>, vector<16x32xf32>
    %749 = arith.truncf %748 : vector<16x32xf32> to vector<16x32xbf16>
    %750 = vector.extract_strided_slice %734 {offsets = [0, 0], sizes = [32, 64], strides = [1, 1]} : vector<96x64xbf16> to vector<32x64xbf16>
    %cst_313 = arith.constant dense<0.000000e+00> : vector<16x64xf32>
    %751 = tpu.matmul %749, %750, %cst_313 {dimension_numbers = #tpu.dot_dimension_numbers<[1], [0], [0], [1], [0, 0, 1, 1], [], []>} : vector<16x32xbf16>, vector<32x64xbf16>, vector<16x64xf32> -> vector<16x64xf32>
    %752 = arith.addf %741, %751 : vector<16x64xf32>
    %753 = arith.truncf %732 : vector<16x32xf32> to vector<16x32xbf16>
    %754 = vector.extract_strided_slice %734 {offsets = [32, 0], sizes = [32, 64], strides = [1, 1]} : vector<96x64xbf16> to vector<32x64xbf16>
    %cst_314 = arith.constant dense<0.000000e+00> : vector<16x64xf32>
    %755 = tpu.matmul %753, %754, %cst_314 {dimension_numbers = #tpu.dot_dimension_numbers<[1], [0], [0], [1], [0, 0, 1, 1], [], []>} : vector<16x32xbf16>, vector<32x64xbf16>, vector<16x64xf32> -> vector<16x64xf32>
    %756 = arith.addf %752, %755 : vector<16x64xf32>
    %757 = vector.extract_strided_slice %732 {offsets = [1, 0], sizes = [15, 32], strides = [1, 1]} : vector<16x32xf32> to vector<15x32xf32>
    %cst_315 = arith.constant 0.000000e+00 : f32
    %758 = vector.broadcast %cst_315 : f32 to vector<1x32xf32>
    %759 = tpu.concatenate %757, %758 in 0 : vector<15x32xf32>, vector<1x32xf32> -> vector<16x32xf32>
    %c7_i32_316 = arith.constant 7 : i32
    %760 = vector.broadcast %c7_i32_316 : i32 to vector<16x32xi32>
    %761 = arith.cmpi slt, %738, %760 : vector<16x32xi32>
    %cst_317 = arith.constant 0.000000e+00 : f32
    %762 = vector.broadcast %cst_317 : f32 to vector<16x32xf32>
    %763 = arith.select %761, %759, %762 : vector<16x32xi1>, vector<16x32xf32>
    %764 = arith.truncf %763 : vector<16x32xf32> to vector<16x32xbf16>
    %765 = vector.extract_strided_slice %734 {offsets = [64, 0], sizes = [32, 64], strides = [1, 1]} : vector<96x64xbf16> to vector<32x64xbf16>
    %cst_318 = arith.constant dense<0.000000e+00> : vector<16x64xf32>
    %766 = tpu.matmul %764, %765, %cst_318 {dimension_numbers = #tpu.dot_dimension_numbers<[1], [0], [0], [1], [0, 0, 1, 1], [], []>} : vector<16x32xbf16>, vector<32x64xbf16>, vector<16x64xf32> -> vector<16x64xf32>
    %767 = arith.addf %756, %766 : vector<16x64xf32>
    %cst_319 = arith.constant 0.000000e+00 : f32
    %768 = vector.broadcast %cst_319 : f32 to vector<16x64xf32>
    %769 = arith.maximumf %767, %768 : vector<16x64xf32>
    %c2_320 = arith.constant 2 : index
    %c0_321 = arith.constant 0 : index
    %c0_322 = arith.constant 0 : index
    %770 = vector.load %arg9[%c2_320, %c0_321, %c0_322] : memref<4x192x32xbf16, #tpu.memory_space<vmem>>, vector<1x192x32xbf16>
    %771 = vector.shape_cast %770 : vector<1x192x32xbf16> to vector<192x32xbf16>
    %c2_323 = arith.constant 2 : index
    %c0_324 = arith.constant 0 : index
    %c0_325 = arith.constant 0 : index
    %772 = vector.load %arg10[%c2_323, %c0_324, %c0_325] : memref<4x1x32xf32, #tpu.memory_space<vmem>>, vector<1x1x32xf32>
    %773 = vector.shape_cast %772 : vector<1x1x32xf32> to vector<1x32xf32>
    %774 = tpu.iota {dimensions = array<i32: 1>} : vector<2x8x64xi32>
    %775 = vector.shape_cast %774 : vector<2x8x64xi32> to vector<16x64xi32>
    %cst_326 = arith.constant 0.000000e+00 : f32
    %776 = vector.broadcast %cst_326 : f32 to vector<16x32xf32>
    %777 = vector.broadcast %773 : vector<1x32xf32> to vector<16x32xf32>
    %778 = arith.addf %776, %777 : vector<16x32xf32>
    %cst_327 = arith.constant 0.000000e+00 : f32
    %779 = vector.broadcast %cst_327 : f32 to vector<1x64xf32>
    %780 = vector.extract_strided_slice %769 {offsets = [0, 0], sizes = [15, 64], strides = [1, 1]} : vector<16x64xf32> to vector<15x64xf32>
    %781 = tpu.concatenate %779, %780 in 0 : vector<1x64xf32>, vector<15x64xf32> -> vector<16x64xf32>
    %c1_i32_328 = arith.constant 1 : i32
    %782 = vector.broadcast %c1_i32_328 : i32 to vector<16x64xi32>
    %783 = arith.cmpi sge, %775, %782 : vector<16x64xi32>
    %cst_329 = arith.constant 0.000000e+00 : f32
    %784 = vector.broadcast %cst_329 : f32 to vector<16x64xf32>
    %785 = arith.select %783, %781, %784 : vector<16x64xi1>, vector<16x64xf32>
    %786 = arith.truncf %785 : vector<16x64xf32> to vector<16x64xbf16>
    %787 = vector.extract_strided_slice %771 {offsets = [0, 0], sizes = [64, 32], strides = [1, 1]} : vector<192x32xbf16> to vector<64x32xbf16>
    %cst_330 = arith.constant dense<0.000000e+00> : vector<16x32xf32>
    %788 = tpu.matmul %786, %787, %cst_330 {dimension_numbers = #tpu.dot_dimension_numbers<[1], [0], [0], [1], [0, 0, 1, 1], [], []>} : vector<16x64xbf16>, vector<64x32xbf16>, vector<16x32xf32> -> vector<16x32xf32>
    %789 = arith.addf %778, %788 : vector<16x32xf32>
    %790 = arith.truncf %769 : vector<16x64xf32> to vector<16x64xbf16>
    %791 = vector.extract_strided_slice %771 {offsets = [64, 0], sizes = [64, 32], strides = [1, 1]} : vector<192x32xbf16> to vector<64x32xbf16>
    %cst_331 = arith.constant dense<0.000000e+00> : vector<16x32xf32>
    %792 = tpu.matmul %790, %791, %cst_331 {dimension_numbers = #tpu.dot_dimension_numbers<[1], [0], [0], [1], [0, 0, 1, 1], [], []>} : vector<16x64xbf16>, vector<64x32xbf16>, vector<16x32xf32> -> vector<16x32xf32>
    %793 = arith.addf %789, %792 : vector<16x32xf32>
    %794 = vector.extract_strided_slice %769 {offsets = [1, 0], sizes = [15, 64], strides = [1, 1]} : vector<16x64xf32> to vector<15x64xf32>
    %cst_332 = arith.constant 0.000000e+00 : f32
    %795 = vector.broadcast %cst_332 : f32 to vector<1x64xf32>
    %796 = tpu.concatenate %794, %795 in 0 : vector<15x64xf32>, vector<1x64xf32> -> vector<16x64xf32>
    %c7_i32_333 = arith.constant 7 : i32
    %797 = vector.broadcast %c7_i32_333 : i32 to vector<16x64xi32>
    %798 = arith.cmpi slt, %775, %797 : vector<16x64xi32>
    %cst_334 = arith.constant 0.000000e+00 : f32
    %799 = vector.broadcast %cst_334 : f32 to vector<16x64xf32>
    %800 = arith.select %798, %796, %799 : vector<16x64xi1>, vector<16x64xf32>
    %801 = arith.truncf %800 : vector<16x64xf32> to vector<16x64xbf16>
    %802 = vector.extract_strided_slice %771 {offsets = [128, 0], sizes = [64, 32], strides = [1, 1]} : vector<192x32xbf16> to vector<64x32xbf16>
    %cst_335 = arith.constant dense<0.000000e+00> : vector<16x32xf32>
    %803 = tpu.matmul %801, %802, %cst_335 {dimension_numbers = #tpu.dot_dimension_numbers<[1], [0], [0], [1], [0, 0, 1, 1], [], []>} : vector<16x64xbf16>, vector<64x32xbf16>, vector<16x32xf32> -> vector<16x32xf32>
    %804 = arith.addf %793, %803 : vector<16x32xf32>
    %805 = arith.addf %732, %804 : vector<16x32xf32>
    %c2_336 = arith.constant 2 : index
    %c0_337 = arith.constant 0 : index
    %c0_338 = arith.constant 0 : index
    %806 = vector.load %arg11[%c2_336, %c0_337, %c0_338] : memref<4x1x32xf32, #tpu.memory_space<vmem>>, vector<1x1x32xf32>
    %807 = vector.shape_cast %806 : vector<1x1x32xf32> to vector<1x32xf32>
    %c2_339 = arith.constant 2 : index
    %c0_340 = arith.constant 0 : index
    %c0_341 = arith.constant 0 : index
    %808 = vector.load %arg12[%c2_339, %c0_340, %c0_341] : memref<4x1x32xf32, #tpu.memory_space<vmem>>, vector<1x1x32xf32>
    %809 = vector.shape_cast %808 : vector<1x1x32xf32> to vector<1x32xf32>
    %cst_342 = arith.constant dense<0.000000e+00> : vector<16xf32>
    %810 = vector.multi_reduction <add>, %805, %cst_342 [1] : vector<16x32xf32> to vector<16xf32>
    %811 = vector.shape_cast %810 : vector<16xf32> to vector<16x1xf32>
    %cst_343 = arith.constant 3.200000e+01 : f32
    %812 = vector.broadcast %cst_343 : f32 to vector<16x1xf32>
    %813 = arith.divf %811, %812 : vector<16x1xf32>
    %814 = vector.broadcast %813 : vector<16x1xf32> to vector<16x32xf32>
    %815 = arith.subf %805, %814 : vector<16x32xf32>
    %816 = arith.mulf %815, %815 : vector<16x32xf32>
    %cst_344 = arith.constant dense<0.000000e+00> : vector<16xf32>
    %817 = vector.multi_reduction <add>, %816, %cst_344 [1] : vector<16x32xf32> to vector<16xf32>
    %818 = vector.shape_cast %817 : vector<16xf32> to vector<16x1xf32>
    %cst_345 = arith.constant 3.200000e+01 : f32
    %819 = vector.broadcast %cst_345 : f32 to vector<16x1xf32>
    %820 = arith.divf %818, %819 : vector<16x1xf32>
    %821 = vector.broadcast %813 : vector<16x1xf32> to vector<16x32xf32>
    %822 = arith.subf %805, %821 : vector<16x32xf32>
    %cst_346 = arith.constant 9.99999974E-6 : f32
    %823 = vector.broadcast %cst_346 : f32 to vector<16x1xf32>
    %824 = arith.addf %820, %823 : vector<16x1xf32>
    %825 = math.rsqrt %824 : vector<16x1xf32>
    %826 = vector.broadcast %825 : vector<16x1xf32> to vector<16x32xf32>
    %827 = arith.mulf %822, %826 : vector<16x32xf32>
    %828 = vector.broadcast %807 : vector<1x32xf32> to vector<16x32xf32>
    %829 = arith.mulf %827, %828 : vector<16x32xf32>
    %830 = vector.broadcast %809 : vector<1x32xf32> to vector<16x32xf32>
    %831 = arith.addf %829, %830 : vector<16x32xf32>
    %832 = arith.truncf %831 : vector<16x32xf32> to vector<16x32xbf16>
    %c3 = arith.constant 3 : index
    %c0_347 = arith.constant 0 : index
    %c0_348 = arith.constant 0 : index
    %833 = vector.load %arg1[%c3, %c0_347, %c0_348] : memref<4x32x96xbf16, #tpu.memory_space<vmem>>, vector<1x32x96xbf16>
    %834 = vector.shape_cast %833 : vector<1x32x96xbf16> to vector<32x96xbf16>
    %cst_349 = arith.constant dense<0.000000e+00> : vector<16x96xf32>
    %835 = tpu.matmul %832, %834, %cst_349 {dimension_numbers = #tpu.dot_dimension_numbers<[1], [0], [0], [1], [0, 0, 1, 1], [], []>} : vector<16x32xbf16>, vector<32x96xbf16>, vector<16x96xf32> -> vector<16x96xf32>
    %c3_350 = arith.constant 3 : index
    %c0_351 = arith.constant 0 : index
    %c0_352 = arith.constant 0 : index
    %836 = vector.load %arg2[%c3_350, %c0_351, %c0_352] : memref<4x1x96xf32, #tpu.memory_space<vmem>>, vector<1x1x96xf32>
    %837 = vector.shape_cast %836 : vector<1x1x96xf32> to vector<1x96xf32>
    %838 = vector.broadcast %837 : vector<1x96xf32> to vector<16x96xf32>
    %839 = arith.addf %835, %838 : vector<16x96xf32>
    %840 = vector.extract_strided_slice %839 {offsets = [0, 32], sizes = [16, 16], strides = [1, 1]} : vector<16x96xf32> to vector<16x16xf32>
    %841 = vector.shape_cast %840 : vector<16x16xf32> to vector<2x8x16xf32>
    %842 = vector.extract_strided_slice %839 {offsets = [0, 64], sizes = [16, 16], strides = [1, 1]} : vector<16x96xf32> to vector<16x16xf32>
    %843 = vector.shape_cast %842 : vector<16x16xf32> to vector<2x8x16xf32>
    %844 = vector.extract_strided_slice %839 {offsets = [0, 0], sizes = [8, 16], strides = [1, 1]} : vector<16x96xf32> to vector<8x16xf32>
    %845 = vector.shape_cast %844 : vector<8x16xf32> to vector<1x8x16xf32>
    %846 = vector.broadcast %845 : vector<1x8x16xf32> to vector<2x8x16xf32>
    %847 = arith.mulf %846, %841 : vector<2x8x16xf32>
    %cst_353 = arith.constant dense<0.000000e+00> : vector<2x8xf32>
    %848 = vector.multi_reduction <add>, %847, %cst_353 [2] : vector<2x8x16xf32> to vector<2x8xf32>
    %849 = vector.shape_cast %848 : vector<2x8xf32> to vector<2x8x1xf32>
    %cst_354 = arith.constant 2.500000e-01 : f32
    %850 = vector.broadcast %cst_354 : f32 to vector<2x8x1xf32>
    %851 = arith.mulf %849, %850 : vector<2x8x1xf32>
    %cst_355 = arith.constant dense<0xFF800000> : vector<8x1xf32>
    %852 = vector.multi_reduction <maximumf>, %851, %cst_355 [0] : vector<2x8x1xf32> to vector<8x1xf32>
    %853 = vector.shape_cast %852 : vector<8x1xf32> to vector<1x8x1xf32>
    %854 = vector.broadcast %853 : vector<1x8x1xf32> to vector<2x8x1xf32>
    %855 = arith.subf %851, %854 : vector<2x8x1xf32>
    %856 = math.exp %855 : vector<2x8x1xf32>
    %cst_356 = arith.constant dense<0.000000e+00> : vector<8x1xf32>
    %857 = vector.multi_reduction <add>, %856, %cst_356 [0] : vector<2x8x1xf32> to vector<8x1xf32>
    %858 = vector.shape_cast %857 : vector<8x1xf32> to vector<1x8x1xf32>
    %859 = vector.broadcast %858 : vector<1x8x1xf32> to vector<2x8x1xf32>
    %860 = arith.divf %856, %859 : vector<2x8x1xf32>
    %861 = vector.broadcast %860 : vector<2x8x1xf32> to vector<2x8x16xf32>
    %862 = arith.mulf %861, %843 : vector<2x8x16xf32>
    %cst_357 = arith.constant dense<0.000000e+00> : vector<8x16xf32>
    %863 = vector.multi_reduction <add>, %862, %cst_357 [0] : vector<2x8x16xf32> to vector<8x16xf32>
    %c0_358 = arith.constant 0 : index
    %c0_359 = arith.constant 0 : index
    %864 = vector.load %arg27[%c0_358, %c0_359] : memref<16x32xf32, #tpu.memory_space<vmem>>, vector<8x16xf32>
    tpu.vector_store %arg27[%c0_358, %c0_359], %863 {strides = array<i32>} : memref<16x32xf32, #tpu.memory_space<vmem>>, vector<8x16xf32>,
    %865 = vector.extract_strided_slice %839 {offsets = [8, 0], sizes = [8, 16], strides = [1, 1]} : vector<16x96xf32> to vector<8x16xf32>
    %866 = vector.shape_cast %865 : vector<8x16xf32> to vector<1x8x16xf32>
    %867 = vector.broadcast %866 : vector<1x8x16xf32> to vector<2x8x16xf32>
    %868 = arith.mulf %867, %841 : vector<2x8x16xf32>
    %cst_360 = arith.constant dense<0.000000e+00> : vector<2x8xf32>
    %869 = vector.multi_reduction <add>, %868, %cst_360 [2] : vector<2x8x16xf32> to vector<2x8xf32>
    %870 = vector.shape_cast %869 : vector<2x8xf32> to vector<2x8x1xf32>
    %cst_361 = arith.constant 2.500000e-01 : f32
    %871 = vector.broadcast %cst_361 : f32 to vector<2x8x1xf32>
    %872 = arith.mulf %870, %871 : vector<2x8x1xf32>
    %cst_362 = arith.constant dense<0xFF800000> : vector<8x1xf32>
    %873 = vector.multi_reduction <maximumf>, %872, %cst_362 [0] : vector<2x8x1xf32> to vector<8x1xf32>
    %874 = vector.shape_cast %873 : vector<8x1xf32> to vector<1x8x1xf32>
    %875 = vector.broadcast %874 : vector<1x8x1xf32> to vector<2x8x1xf32>
    %876 = arith.subf %872, %875 : vector<2x8x1xf32>
    %877 = math.exp %876 : vector<2x8x1xf32>
    %cst_363 = arith.constant dense<0.000000e+00> : vector<8x1xf32>
    %878 = vector.multi_reduction <add>, %877, %cst_363 [0] : vector<2x8x1xf32> to vector<8x1xf32>
    %879 = vector.shape_cast %878 : vector<8x1xf32> to vector<1x8x1xf32>
    %880 = vector.broadcast %879 : vector<1x8x1xf32> to vector<2x8x1xf32>
    %881 = arith.divf %877, %880 : vector<2x8x1xf32>
    %882 = vector.broadcast %881 : vector<2x8x1xf32> to vector<2x8x16xf32>
    %883 = arith.mulf %882, %843 : vector<2x8x16xf32>
    %cst_364 = arith.constant dense<0.000000e+00> : vector<8x16xf32>
    %884 = vector.multi_reduction <add>, %883, %cst_364 [0] : vector<2x8x16xf32> to vector<8x16xf32>
    %c8_365 = arith.constant 8 : index
    %c0_366 = arith.constant 0 : index
    %885 = vector.load %arg27[%c8_365, %c0_366] : memref<16x32xf32, #tpu.memory_space<vmem>>, vector<8x16xf32>
    tpu.vector_store %arg27[%c8_365, %c0_366], %884 {strides = array<i32>} : memref<16x32xf32, #tpu.memory_space<vmem>>, vector<8x16xf32>,
    %886 = vector.extract_strided_slice %839 {offsets = [0, 48], sizes = [16, 16], strides = [1, 1]} : vector<16x96xf32> to vector<16x16xf32>
    %887 = vector.shape_cast %886 : vector<16x16xf32> to vector<2x8x16xf32>
    %888 = vector.extract_strided_slice %839 {offsets = [0, 80], sizes = [16, 16], strides = [1, 1]} : vector<16x96xf32> to vector<16x16xf32>
    %889 = vector.shape_cast %888 : vector<16x16xf32> to vector<2x8x16xf32>
    %890 = vector.extract_strided_slice %839 {offsets = [0, 16], sizes = [8, 16], strides = [1, 1]} : vector<16x96xf32> to vector<8x16xf32>
    %891 = vector.shape_cast %890 : vector<8x16xf32> to vector<1x8x16xf32>
    %892 = vector.broadcast %891 : vector<1x8x16xf32> to vector<2x8x16xf32>
    %893 = arith.mulf %892, %887 : vector<2x8x16xf32>
    %cst_367 = arith.constant dense<0.000000e+00> : vector<2x8xf32>
    %894 = vector.multi_reduction <add>, %893, %cst_367 [2] : vector<2x8x16xf32> to vector<2x8xf32>
    %895 = vector.shape_cast %894 : vector<2x8xf32> to vector<2x8x1xf32>
    %cst_368 = arith.constant 2.500000e-01 : f32
    %896 = vector.broadcast %cst_368 : f32 to vector<2x8x1xf32>
    %897 = arith.mulf %895, %896 : vector<2x8x1xf32>
    %cst_369 = arith.constant dense<0xFF800000> : vector<8x1xf32>
    %898 = vector.multi_reduction <maximumf>, %897, %cst_369 [0] : vector<2x8x1xf32> to vector<8x1xf32>
    %899 = vector.shape_cast %898 : vector<8x1xf32> to vector<1x8x1xf32>
    %900 = vector.broadcast %899 : vector<1x8x1xf32> to vector<2x8x1xf32>
    %901 = arith.subf %897, %900 : vector<2x8x1xf32>
    %902 = math.exp %901 : vector<2x8x1xf32>
    %cst_370 = arith.constant dense<0.000000e+00> : vector<8x1xf32>
    %903 = vector.multi_reduction <add>, %902, %cst_370 [0] : vector<2x8x1xf32> to vector<8x1xf32>
    %904 = vector.shape_cast %903 : vector<8x1xf32> to vector<1x8x1xf32>
    %905 = vector.broadcast %904 : vector<1x8x1xf32> to vector<2x8x1xf32>
    %906 = arith.divf %902, %905 : vector<2x8x1xf32>
    %907 = vector.broadcast %906 : vector<2x8x1xf32> to vector<2x8x16xf32>
    %908 = arith.mulf %907, %889 : vector<2x8x16xf32>
    %cst_371 = arith.constant dense<0.000000e+00> : vector<8x16xf32>
    %909 = vector.multi_reduction <add>, %908, %cst_371 [0] : vector<2x8x16xf32> to vector<8x16xf32>
    %c0_372 = arith.constant 0 : index
    %c16_373 = arith.constant 16 : index
    %910 = vector.load %arg27[%c0_372, %c16_373] : memref<16x32xf32, #tpu.memory_space<vmem>>, vector<8x16xf32>
    tpu.vector_store %arg27[%c0_372, %c16_373], %909 {strides = array<i32>} : memref<16x32xf32, #tpu.memory_space<vmem>>, vector<8x16xf32>,
    %911 = vector.extract_strided_slice %839 {offsets = [8, 16], sizes = [8, 16], strides = [1, 1]} : vector<16x96xf32> to vector<8x16xf32>
    %912 = vector.shape_cast %911 : vector<8x16xf32> to vector<1x8x16xf32>
    %913 = vector.broadcast %912 : vector<1x8x16xf32> to vector<2x8x16xf32>
    %914 = arith.mulf %913, %887 : vector<2x8x16xf32>
    %cst_374 = arith.constant dense<0.000000e+00> : vector<2x8xf32>
    %915 = vector.multi_reduction <add>, %914, %cst_374 [2] : vector<2x8x16xf32> to vector<2x8xf32>
    %916 = vector.shape_cast %915 : vector<2x8xf32> to vector<2x8x1xf32>
    %cst_375 = arith.constant 2.500000e-01 : f32
    %917 = vector.broadcast %cst_375 : f32 to vector<2x8x1xf32>
    %918 = arith.mulf %916, %917 : vector<2x8x1xf32>
    %cst_376 = arith.constant dense<0xFF800000> : vector<8x1xf32>
    %919 = vector.multi_reduction <maximumf>, %918, %cst_376 [0] : vector<2x8x1xf32> to vector<8x1xf32>
    %920 = vector.shape_cast %919 : vector<8x1xf32> to vector<1x8x1xf32>
    %921 = vector.broadcast %920 : vector<1x8x1xf32> to vector<2x8x1xf32>
    %922 = arith.subf %918, %921 : vector<2x8x1xf32>
    %923 = math.exp %922 : vector<2x8x1xf32>
    %cst_377 = arith.constant dense<0.000000e+00> : vector<8x1xf32>
    %924 = vector.multi_reduction <add>, %923, %cst_377 [0] : vector<2x8x1xf32> to vector<8x1xf32>
    %925 = vector.shape_cast %924 : vector<8x1xf32> to vector<1x8x1xf32>
    %926 = vector.broadcast %925 : vector<1x8x1xf32> to vector<2x8x1xf32>
    %927 = arith.divf %923, %926 : vector<2x8x1xf32>
    %928 = vector.broadcast %927 : vector<2x8x1xf32> to vector<2x8x16xf32>
    %929 = arith.mulf %928, %889 : vector<2x8x16xf32>
    %cst_378 = arith.constant dense<0.000000e+00> : vector<8x16xf32>
    %930 = vector.multi_reduction <add>, %929, %cst_378 [0] : vector<2x8x16xf32> to vector<8x16xf32>
    %c8_379 = arith.constant 8 : index
    %c16_380 = arith.constant 16 : index
    %931 = vector.load %arg27[%c8_379, %c16_380] : memref<16x32xf32, #tpu.memory_space<vmem>>, vector<8x16xf32>
    tpu.vector_store %arg27[%c8_379, %c16_380], %930 {strides = array<i32>} : memref<16x32xf32, #tpu.memory_space<vmem>>, vector<8x16xf32>,
    %c0_381 = arith.constant 0 : index
    %c0_382 = arith.constant 0 : index
    %932 = vector.load %arg27[%c0_381, %c0_382] : memref<16x32xf32, #tpu.memory_space<vmem>>, vector<16x32xf32>
    %933 = arith.truncf %932 : vector<16x32xf32> to vector<16x32xbf16>
    %c3_383 = arith.constant 3 : index
    %c0_384 = arith.constant 0 : index
    %c0_385 = arith.constant 0 : index
    %934 = vector.load %arg3[%c3_383, %c0_384, %c0_385] : memref<4x32x32xbf16, #tpu.memory_space<vmem>>, vector<1x32x32xbf16>
    %935 = vector.shape_cast %934 : vector<1x32x32xbf16> to vector<32x32xbf16>
    %cst_386 = arith.constant dense<0.000000e+00> : vector<16x32xf32>
    %936 = tpu.matmul %933, %935, %cst_386 {dimension_numbers = #tpu.dot_dimension_numbers<[1], [0], [0], [1], [0, 0, 1, 1], [], []>} : vector<16x32xbf16>, vector<32x32xbf16>, vector<16x32xf32> -> vector<16x32xf32>
    %c3_387 = arith.constant 3 : index
    %c0_388 = arith.constant 0 : index
    %c0_389 = arith.constant 0 : index
    %937 = vector.load %arg4[%c3_387, %c0_388, %c0_389] : memref<4x1x32xf32, #tpu.memory_space<vmem>>, vector<1x1x32xf32>
    %938 = vector.shape_cast %937 : vector<1x1x32xf32> to vector<1x32xf32>
    %939 = vector.broadcast %938 : vector<1x32xf32> to vector<16x32xf32>
    %940 = arith.addf %936, %939 : vector<16x32xf32>
    %941 = arith.addf %831, %940 : vector<16x32xf32>
    %c3_390 = arith.constant 3 : index
    %c0_391 = arith.constant 0 : index
    %c0_392 = arith.constant 0 : index
    %942 = vector.load %arg5[%c3_390, %c0_391, %c0_392] : memref<4x1x32xf32, #tpu.memory_space<vmem>>, vector<1x1x32xf32>
    %943 = vector.shape_cast %942 : vector<1x1x32xf32> to vector<1x32xf32>
    %c3_393 = arith.constant 3 : index
    %c0_394 = arith.constant 0 : index
    %c0_395 = arith.constant 0 : index
    %944 = vector.load %arg6[%c3_393, %c0_394, %c0_395] : memref<4x1x32xf32, #tpu.memory_space<vmem>>, vector<1x1x32xf32>
    %945 = vector.shape_cast %944 : vector<1x1x32xf32> to vector<1x32xf32>
    %cst_396 = arith.constant dense<0.000000e+00> : vector<16xf32>
    %946 = vector.multi_reduction <add>, %941, %cst_396 [1] : vector<16x32xf32> to vector<16xf32>
    %947 = vector.shape_cast %946 : vector<16xf32> to vector<16x1xf32>
    %cst_397 = arith.constant 3.200000e+01 : f32
    %948 = vector.broadcast %cst_397 : f32 to vector<16x1xf32>
    %949 = arith.divf %947, %948 : vector<16x1xf32>
    %950 = vector.broadcast %949 : vector<16x1xf32> to vector<16x32xf32>
    %951 = arith.subf %941, %950 : vector<16x32xf32>
    %952 = arith.mulf %951, %951 : vector<16x32xf32>
    %cst_398 = arith.constant dense<0.000000e+00> : vector<16xf32>
    %953 = vector.multi_reduction <add>, %952, %cst_398 [1] : vector<16x32xf32> to vector<16xf32>
    %954 = vector.shape_cast %953 : vector<16xf32> to vector<16x1xf32>
    %cst_399 = arith.constant 3.200000e+01 : f32
    %955 = vector.broadcast %cst_399 : f32 to vector<16x1xf32>
    %956 = arith.divf %954, %955 : vector<16x1xf32>
    %957 = vector.broadcast %949 : vector<16x1xf32> to vector<16x32xf32>
    %958 = arith.subf %941, %957 : vector<16x32xf32>
    %cst_400 = arith.constant 9.99999974E-6 : f32
    %959 = vector.broadcast %cst_400 : f32 to vector<16x1xf32>
    %960 = arith.addf %956, %959 : vector<16x1xf32>
    %961 = math.rsqrt %960 : vector<16x1xf32>
    %962 = vector.broadcast %961 : vector<16x1xf32> to vector<16x32xf32>
    %963 = arith.mulf %958, %962 : vector<16x32xf32>
    %964 = vector.broadcast %943 : vector<1x32xf32> to vector<16x32xf32>
    %965 = arith.mulf %963, %964 : vector<16x32xf32>
    %966 = vector.broadcast %945 : vector<1x32xf32> to vector<16x32xf32>
    %967 = arith.addf %965, %966 : vector<16x32xf32>
    %c3_401 = arith.constant 3 : index
    %c0_402 = arith.constant 0 : index
    %c0_403 = arith.constant 0 : index
    %968 = vector.load %arg7[%c3_401, %c0_402, %c0_403] : memref<4x96x64xbf16, #tpu.memory_space<vmem>>, vector<1x96x64xbf16>
    %969 = vector.shape_cast %968 : vector<1x96x64xbf16> to vector<96x64xbf16>
    %c3_404 = arith.constant 3 : index
    %c0_405 = arith.constant 0 : index
    %c0_406 = arith.constant 0 : index
    %970 = vector.load %arg8[%c3_404, %c0_405, %c0_406] : memref<4x1x64xf32, #tpu.memory_space<vmem>>, vector<1x1x64xf32>
    %971 = vector.shape_cast %970 : vector<1x1x64xf32> to vector<1x64xf32>
    %972 = tpu.iota {dimensions = array<i32: 1>} : vector<2x8x32xi32>
    %973 = vector.shape_cast %972 : vector<2x8x32xi32> to vector<16x32xi32>
    %cst_407 = arith.constant 0.000000e+00 : f32
    %974 = vector.broadcast %cst_407 : f32 to vector<16x64xf32>
    %975 = vector.broadcast %971 : vector<1x64xf32> to vector<16x64xf32>
    %976 = arith.addf %974, %975 : vector<16x64xf32>
    %cst_408 = arith.constant 0.000000e+00 : f32
    %977 = vector.broadcast %cst_408 : f32 to vector<1x32xf32>
    %978 = vector.extract_strided_slice %967 {offsets = [0, 0], sizes = [15, 32], strides = [1, 1]} : vector<16x32xf32> to vector<15x32xf32>
    %979 = tpu.concatenate %977, %978 in 0 : vector<1x32xf32>, vector<15x32xf32> -> vector<16x32xf32>
    %c1_i32_409 = arith.constant 1 : i32
    %980 = vector.broadcast %c1_i32_409 : i32 to vector<16x32xi32>
    %981 = arith.cmpi sge, %973, %980 : vector<16x32xi32>
    %cst_410 = arith.constant 0.000000e+00 : f32
    %982 = vector.broadcast %cst_410 : f32 to vector<16x32xf32>
    %983 = arith.select %981, %979, %982 : vector<16x32xi1>, vector<16x32xf32>
    %984 = arith.truncf %983 : vector<16x32xf32> to vector<16x32xbf16>
    %985 = vector.extract_strided_slice %969 {offsets = [0, 0], sizes = [32, 64], strides = [1, 1]} : vector<96x64xbf16> to vector<32x64xbf16>
    %cst_411 = arith.constant dense<0.000000e+00> : vector<16x64xf32>
    %986 = tpu.matmul %984, %985, %cst_411 {dimension_numbers = #tpu.dot_dimension_numbers<[1], [0], [0], [1], [0, 0, 1, 1], [], []>} : vector<16x32xbf16>, vector<32x64xbf16>, vector<16x64xf32> -> vector<16x64xf32>
    %987 = arith.addf %976, %986 : vector<16x64xf32>
    %988 = arith.truncf %967 : vector<16x32xf32> to vector<16x32xbf16>
    %989 = vector.extract_strided_slice %969 {offsets = [32, 0], sizes = [32, 64], strides = [1, 1]} : vector<96x64xbf16> to vector<32x64xbf16>
    %cst_412 = arith.constant dense<0.000000e+00> : vector<16x64xf32>
    %990 = tpu.matmul %988, %989, %cst_412 {dimension_numbers = #tpu.dot_dimension_numbers<[1], [0], [0], [1], [0, 0, 1, 1], [], []>} : vector<16x32xbf16>, vector<32x64xbf16>, vector<16x64xf32> -> vector<16x64xf32>
    %991 = arith.addf %987, %990 : vector<16x64xf32>
    %992 = vector.extract_strided_slice %967 {offsets = [1, 0], sizes = [15, 32], strides = [1, 1]} : vector<16x32xf32> to vector<15x32xf32>
    %cst_413 = arith.constant 0.000000e+00 : f32
    %993 = vector.broadcast %cst_413 : f32 to vector<1x32xf32>
    %994 = tpu.concatenate %992, %993 in 0 : vector<15x32xf32>, vector<1x32xf32> -> vector<16x32xf32>
    %c7_i32_414 = arith.constant 7 : i32
    %995 = vector.broadcast %c7_i32_414 : i32 to vector<16x32xi32>
    %996 = arith.cmpi slt, %973, %995 : vector<16x32xi32>
    %cst_415 = arith.constant 0.000000e+00 : f32
    %997 = vector.broadcast %cst_415 : f32 to vector<16x32xf32>
    %998 = arith.select %996, %994, %997 : vector<16x32xi1>, vector<16x32xf32>
    %999 = arith.truncf %998 : vector<16x32xf32> to vector<16x32xbf16>
    %1000 = vector.extract_strided_slice %969 {offsets = [64, 0], sizes = [32, 64], strides = [1, 1]} : vector<96x64xbf16> to vector<32x64xbf16>
    %cst_416 = arith.constant dense<0.000000e+00> : vector<16x64xf32>
    %1001 = tpu.matmul %999, %1000, %cst_416 {dimension_numbers = #tpu.dot_dimension_numbers<[1], [0], [0], [1], [0, 0, 1, 1], [], []>} : vector<16x32xbf16>, vector<32x64xbf16>, vector<16x64xf32> -> vector<16x64xf32>
    %1002 = arith.addf %991, %1001 : vector<16x64xf32>
    %cst_417 = arith.constant 0.000000e+00 : f32
    %1003 = vector.broadcast %cst_417 : f32 to vector<16x64xf32>
    %1004 = arith.maximumf %1002, %1003 : vector<16x64xf32>
    %c3_418 = arith.constant 3 : index
    %c0_419 = arith.constant 0 : index
    %c0_420 = arith.constant 0 : index
    %1005 = vector.load %arg9[%c3_418, %c0_419, %c0_420] : memref<4x192x32xbf16, #tpu.memory_space<vmem>>, vector<1x192x32xbf16>
    %1006 = vector.shape_cast %1005 : vector<1x192x32xbf16> to vector<192x32xbf16>
    %c3_421 = arith.constant 3 : index
    %c0_422 = arith.constant 0 : index
    %c0_423 = arith.constant 0 : index
    %1007 = vector.load %arg10[%c3_421, %c0_422, %c0_423] : memref<4x1x32xf32, #tpu.memory_space<vmem>>, vector<1x1x32xf32>
    %1008 = vector.shape_cast %1007 : vector<1x1x32xf32> to vector<1x32xf32>
    %1009 = tpu.iota {dimensions = array<i32: 1>} : vector<2x8x64xi32>
    %1010 = vector.shape_cast %1009 : vector<2x8x64xi32> to vector<16x64xi32>
    %cst_424 = arith.constant 0.000000e+00 : f32
    %1011 = vector.broadcast %cst_424 : f32 to vector<16x32xf32>
    %1012 = vector.broadcast %1008 : vector<1x32xf32> to vector<16x32xf32>
    %1013 = arith.addf %1011, %1012 : vector<16x32xf32>
    %cst_425 = arith.constant 0.000000e+00 : f32
    %1014 = vector.broadcast %cst_425 : f32 to vector<1x64xf32>
    %1015 = vector.extract_strided_slice %1004 {offsets = [0, 0], sizes = [15, 64], strides = [1, 1]} : vector<16x64xf32> to vector<15x64xf32>
    %1016 = tpu.concatenate %1014, %1015 in 0 : vector<1x64xf32>, vector<15x64xf32> -> vector<16x64xf32>
    %c1_i32_426 = arith.constant 1 : i32
    %1017 = vector.broadcast %c1_i32_426 : i32 to vector<16x64xi32>
    %1018 = arith.cmpi sge, %1010, %1017 : vector<16x64xi32>
    %cst_427 = arith.constant 0.000000e+00 : f32
    %1019 = vector.broadcast %cst_427 : f32 to vector<16x64xf32>
    %1020 = arith.select %1018, %1016, %1019 : vector<16x64xi1>, vector<16x64xf32>
    %1021 = arith.truncf %1020 : vector<16x64xf32> to vector<16x64xbf16>
    %1022 = vector.extract_strided_slice %1006 {offsets = [0, 0], sizes = [64, 32], strides = [1, 1]} : vector<192x32xbf16> to vector<64x32xbf16>
    %cst_428 = arith.constant dense<0.000000e+00> : vector<16x32xf32>
    %1023 = tpu.matmul %1021, %1022, %cst_428 {dimension_numbers = #tpu.dot_dimension_numbers<[1], [0], [0], [1], [0, 0, 1, 1], [], []>} : vector<16x64xbf16>, vector<64x32xbf16>, vector<16x32xf32> -> vector<16x32xf32>
    %1024 = arith.addf %1013, %1023 : vector<16x32xf32>
    %1025 = arith.truncf %1004 : vector<16x64xf32> to vector<16x64xbf16>
    %1026 = vector.extract_strided_slice %1006 {offsets = [64, 0], sizes = [64, 32], strides = [1, 1]} : vector<192x32xbf16> to vector<64x32xbf16>
    %cst_429 = arith.constant dense<0.000000e+00> : vector<16x32xf32>
    %1027 = tpu.matmul %1025, %1026, %cst_429 {dimension_numbers = #tpu.dot_dimension_numbers<[1], [0], [0], [1], [0, 0, 1, 1], [], []>} : vector<16x64xbf16>, vector<64x32xbf16>, vector<16x32xf32> -> vector<16x32xf32>
    %1028 = arith.addf %1024, %1027 : vector<16x32xf32>
    %1029 = vector.extract_strided_slice %1004 {offsets = [1, 0], sizes = [15, 64], strides = [1, 1]} : vector<16x64xf32> to vector<15x64xf32>
    %cst_430 = arith.constant 0.000000e+00 : f32
    %1030 = vector.broadcast %cst_430 : f32 to vector<1x64xf32>
    %1031 = tpu.concatenate %1029, %1030 in 0 : vector<15x64xf32>, vector<1x64xf32> -> vector<16x64xf32>
    %c7_i32_431 = arith.constant 7 : i32
    %1032 = vector.broadcast %c7_i32_431 : i32 to vector<16x64xi32>
    %1033 = arith.cmpi slt, %1010, %1032 : vector<16x64xi32>
    %cst_432 = arith.constant 0.000000e+00 : f32
    %1034 = vector.broadcast %cst_432 : f32 to vector<16x64xf32>
    %1035 = arith.select %1033, %1031, %1034 : vector<16x64xi1>, vector<16x64xf32>
    %1036 = arith.truncf %1035 : vector<16x64xf32> to vector<16x64xbf16>
    %1037 = vector.extract_strided_slice %1006 {offsets = [128, 0], sizes = [64, 32], strides = [1, 1]} : vector<192x32xbf16> to vector<64x32xbf16>
    %cst_433 = arith.constant dense<0.000000e+00> : vector<16x32xf32>
    %1038 = tpu.matmul %1036, %1037, %cst_433 {dimension_numbers = #tpu.dot_dimension_numbers<[1], [0], [0], [1], [0, 0, 1, 1], [], []>} : vector<16x64xbf16>, vector<64x32xbf16>, vector<16x32xf32> -> vector<16x32xf32>
    %1039 = arith.addf %1028, %1038 : vector<16x32xf32>
    %1040 = arith.addf %967, %1039 : vector<16x32xf32>
    %c3_434 = arith.constant 3 : index
    %c0_435 = arith.constant 0 : index
    %c0_436 = arith.constant 0 : index
    %1041 = vector.load %arg11[%c3_434, %c0_435, %c0_436] : memref<4x1x32xf32, #tpu.memory_space<vmem>>, vector<1x1x32xf32>
    %1042 = vector.shape_cast %1041 : vector<1x1x32xf32> to vector<1x32xf32>
    %c3_437 = arith.constant 3 : index
    %c0_438 = arith.constant 0 : index
    %c0_439 = arith.constant 0 : index
    %1043 = vector.load %arg12[%c3_437, %c0_438, %c0_439] : memref<4x1x32xf32, #tpu.memory_space<vmem>>, vector<1x1x32xf32>
    %1044 = vector.shape_cast %1043 : vector<1x1x32xf32> to vector<1x32xf32>
    %cst_440 = arith.constant dense<0.000000e+00> : vector<16xf32>
    %1045 = vector.multi_reduction <add>, %1040, %cst_440 [1] : vector<16x32xf32> to vector<16xf32>
    %1046 = vector.shape_cast %1045 : vector<16xf32> to vector<16x1xf32>
    %cst_441 = arith.constant 3.200000e+01 : f32
    %1047 = vector.broadcast %cst_441 : f32 to vector<16x1xf32>
    %1048 = arith.divf %1046, %1047 : vector<16x1xf32>
    %1049 = vector.broadcast %1048 : vector<16x1xf32> to vector<16x32xf32>
    %1050 = arith.subf %1040, %1049 : vector<16x32xf32>
    %1051 = arith.mulf %1050, %1050 : vector<16x32xf32>
    %cst_442 = arith.constant dense<0.000000e+00> : vector<16xf32>
    %1052 = vector.multi_reduction <add>, %1051, %cst_442 [1] : vector<16x32xf32> to vector<16xf32>
    %1053 = vector.shape_cast %1052 : vector<16xf32> to vector<16x1xf32>
    %cst_443 = arith.constant 3.200000e+01 : f32
    %1054 = vector.broadcast %cst_443 : f32 to vector<16x1xf32>
    %1055 = arith.divf %1053, %1054 : vector<16x1xf32>
    %1056 = vector.broadcast %1048 : vector<16x1xf32> to vector<16x32xf32>
    %1057 = arith.subf %1040, %1056 : vector<16x32xf32>
    %cst_444 = arith.constant 9.99999974E-6 : f32
    %1058 = vector.broadcast %cst_444 : f32 to vector<16x1xf32>
    %1059 = arith.addf %1055, %1058 : vector<16x1xf32>
    %1060 = math.rsqrt %1059 : vector<16x1xf32>
    %1061 = vector.broadcast %1060 : vector<16x1xf32> to vector<16x32xf32>
    %1062 = arith.mulf %1057, %1061 : vector<16x32xf32>
    %1063 = vector.broadcast %1042 : vector<1x32xf32> to vector<16x32xf32>
    %1064 = arith.mulf %1062, %1063 : vector<16x32xf32>
    %1065 = vector.broadcast %1044 : vector<1x32xf32> to vector<16x32xf32>
    %1066 = arith.addf %1064, %1065 : vector<16x32xf32>
    %1067 = arith.truncf %1066 : vector<16x32xf32> to vector<16x32xbf16>
    %c0_445 = arith.constant 0 : index
    %c0_446 = arith.constant 0 : index
    %1068 = vector.load %arg23[%c0_445, %c0_446] : memref<32x128xbf16, #tpu.memory_space<vmem>>, vector<32x128xbf16>
    %cst_447 = arith.constant dense<0.000000e+00> : vector<16x128xf32>
    %1069 = tpu.matmul %1067, %1068, %cst_447 {dimension_numbers = #tpu.dot_dimension_numbers<[1], [0], [0], [1], [0, 0, 1, 1], [], []>} : vector<16x32xbf16>, vector<32x128xbf16>, vector<16x128xf32> -> vector<16x128xf32>
    %c0_448 = arith.constant 0 : index
    %c0_449 = arith.constant 0 : index
    %1070 = vector.load %arg24[%c0_448, %c0_449] : memref<1x128xf32, #tpu.memory_space<vmem>>, vector<1x128xf32>
    %1071 = vector.broadcast %1070 : vector<1x128xf32> to vector<16x128xf32>
    %1072 = arith.addf %1069, %1071 : vector<16x128xf32>
    %c0_450 = arith.constant 0 : index
    %c0_451 = arith.constant 0 : index
    %1073 = vector.load %arg25[%c0_450, %c0_451] : memref<16x128xf32, #tpu.memory_space<vmem>>, vector<16x128xf32>
    tpu.vector_store %arg25[%c0_450, %c0_451], %1072 {strides = array<i32>} : memref<16x128xf32, #tpu.memory_space<vmem>>, vector<16x128xf32>,
    return
  }
}

</mosaic_0001>

<bundles_post_ra>
// kernel: fastspeech_forward.1
= control target key start
LH: loop header
LB: loop body
LE: loop exit
PB: predicated region body
PF: predicated region fallthrough
CT: control target
= control target key end

     0   :  { %v5401_v0 = vmov 0.0   ;;  %vm5402_vm0 = vmmov 0   ;;  %vm111_vm1 = vcmask 261120   ;;  %vm166_vm2 = vcmask 130048   ;;  %s6707_s27 = smov 64   ;;  %s6744_s29 = smov 112   ;;  %s6669_s1 = inlined_call_operand.vmem [shape: bf16[4,32,96], index: 1, kind: input, shape index: {}]   ;;  %s6670_s0 = inlined_call_operand.vmem [shape: f32[2,8,32], index: 0, kind: input, shape index: {}]   ;;  %s6671_s2 = inlined_call_operand.vmem [shape: f32[4,1,96], index: 2, kind: input, shape index: {}]   ;;  %s6672_s3 = inlined_call_operand.vmem [shape: bf16[4,32,32], index: 3, kind: input, shape index: {}]   ;;  %s6673_s4 = inlined_call_operand.vmem [shape: f32[4,1,32], index: 4, kind: input, shape index: {}]   ;;  %s6674_s7 = inlined_call_operand.vmem [shape: bf16[4,96,64], index: 7, kind: input, shape index: {}]   ;;  %s6675_s9 = inlined_call_operand.vmem [shape: bf16[4,192,32], index: 9, kind: input, shape index: {}]   ;;  %s6676_s5 = inlined_call_operand.vmem [shape: f32[4,1,32], index: 5, kind: input, shape index: {}]   ;;  %s6677_s6 = inlined_call_operand.vmem [shape: f32[4,1,32], index: 6, kind: input, shape index: {}]   ;;  %s6678_s8 = inlined_call_operand.vmem [shape: f32[4,1,64], index: 8, kind: input, shape index: {}]   ;;  %s6679_s10 = inlined_call_operand.vmem [shape: f32[4,1,32], index: 10, kind: input, shape index: {}]   ;;  %s6680_s11 = inlined_call_operand.vmem [shape: f32[4,1,32], index: 11, kind: input, shape index: {}]   ;;  %s6681_s12 = inlined_call_operand.vmem [shape: f32[4,1,32], index: 12, kind: input, shape index: {}]   ;;  %s6682_s13 = inlined_call_operand.vmem [shape: bf16[96,32], index: 13, kind: input, shape index: {}]   ;;  %s6683_s14 = inlined_call_operand.vmem [shape: f32[1,32], index: 14, kind: input, shape index: {}]   ;;  %s6684_s17 = inlined_call_operand.vmem [shape: bf16[96,32], index: 17, kind: input, shape index: {}]   ;;  %s6685_s15 = inlined_call_operand.vmem [shape: f32[1,32], index: 15, kind: input, shape index: {}]   ;;  %s6686_s16 = inlined_call_operand.vmem [shape: f32[1,32], index: 16, kind: input, shape index: {}]   ;;  %s6687_s18 = inlined_call_operand.vmem [shape: f32[1,32], index: 18, kind: input, shape index: {}]   ;;  %s6688_s19 = inlined_call_operand.vmem [shape: f32[1,32], index: 19, kind: input, shape index: {}]   ;;  %s6689_s20 = inlined_call_operand.vmem [shape: f32[1,32], index: 20, kind: input, shape index: {}]   ;;  %s6690_s21 = inlined_call_operand.vmem [shape: f32[1,32], index: 21, kind: input, shape index: {}]   ;;  %s6691_s22 = inlined_call_operand.<no memory space> [shape: f32[1,1], index: 22, kind: input, shape index: {}]   ;;  %s6692_s23 = inlined_call_operand.vmem [shape: bf16[32,128], index: 23, kind: input, shape index: {}]   ;;  %s6693_s26 = inlined_call_operand.vmem [shape: f32[1,16], index: 26, kind: output, shape index: {1}]   ;;  %s6694_s24 = inlined_call_operand.vmem [shape: f32[1,128], index: 24, kind: input, shape index: {}]   ;;  %s6695_s25 = inlined_call_operand.vmem [shape: f32[16,128], index: 25, kind: output, shape index: {0}]  }
   0x1   :  { %6716 = sst [smem:[#allocation4_spill]] %s6669_s1  ;;  %4723 = vmatprep.subr.bf16.mxu0 %v5401_v0  ;;  %4727 = vmatprep.mubr.msk.bf16.mxu0 %vm5402_vm0, %v5401_v0  ;;  %vm188_vm3 = vcmask 654848   ;;  %vm257_vm4 = vcmask 786048   ;;  %vm265_vm5 = vcmask 261248   ;;  %vm445_vm6 = vcmask 1040384   ;;  %vm5092_vm11 = vmpackc.low %vm111_vm1, %vm111_vm1 }
   0x2   :  { %6717 = sst [smem:[#allocation5_spill]] %s6670_s0  ;;  %4731 = vmatprep.subr.bf16.mxu1 %v5401_v0  ;;  %4735 = vmatprep.mubr.msk.bf16.mxu1 %vm5402_vm0, %v5401_v0  ;;  %s6709_s0 = smov 112   ;;  %vm573_vm8 = vcmask 1046528   ;;  %vm711_vm10 = vcmask 523264   ;;  %vm2432_vm12 = vcmask 122880  }
   0x3   :  { %6718 = sst [smem:[#allocation6_spill]] %s6671_s2  ;;  %s6733_s1 = sld [smem:[#allocation5_spill]] }
   0x4   :  { %6719 = sst [smem:[#allocation7_spill]] %s6672_s3 }
   0x5   :  { %6720 = sst [smem:[#allocation8_spill]] %s6673_s4  ;;  %s6743_s4 = smov 96  }
   0x6   :  { %6721 = sst [smem:[#allocation9_spill]] %s6674_s7  ;;  %s6736_s30 = sld [smem:[#allocation8_spill]] }
   0x7   :  { %6722 = sst [smem:[#allocation10_spill]] %s6675_s9  ;;  %s6711_s9 = smov 96  }
   0x8   :  { %6723 = sst [smem:[#allocation11_spill]] %s6676_s5  ;;  %s6732_s5 = sld [smem:[#allocation4_spill]] }
   0x9   :  { %6724 = sst [smem:[#allocation12_spill]] %s6677_s6  ;;  %v5558_v3 = vld [vmem:[%s6733_s1] sm:$0xff]  ;;  %v5563_v4 = vld [vmem:[%s6733_s1 + $0x8] sm:$0xff]  ;;  %s6735_s6 = sld [smem:[#allocation7_spill]] }
   0xa   :  { %6725 = sst [smem:[#allocation13_spill]] %s6678_s8  ;;  %v87_v5 = vpack.c.bf16 %v5563_v4, %v5558_v3  ;;  %s6737_s3 = sld [smem:[#allocation9_spill]] }
   0xb   :  { %6726 = sst [smem:[#allocation14_spill]] %s6679_s10  ;;  %s6738_s8 = sld [smem:[#allocation10_spill]] }
   0xc   :  { %6727 = sst [smem:[#allocation15_spill]] %s6691_s22  ;;  %s6734_s10 = sld [smem:[#allocation6_spill]] }
   0xd   :  { %6728 = sst [smem:[#allocation16_spill]] %s6692_s23  ;;  %s6739_s28 = sld [smem:[#allocation11_spill]] }
   0xe   :  { %6729 = sst [smem:[#allocation17_spill]] %s6693_s26  ;;  %v5163_v1 = vld [vmem:[%s6732_s5] sm:$0xff]   ;;  %v5164_v2 = vld [vmem:[%s6732_s5 + $0x8] sm:$0xff]   ;;  %s6740_s1 = sld [smem:[#allocation12_spill]] }
   0xf   :  { %6730 = sst [smem:[#allocation18_spill]] %s6694_s24  ;;  %4724 = vmatpush3.bf16.msra.mxu0 %v5163_v1  ;;  %s6742_s2 = sld [smem:[#allocation14_spill]] }
  0x10   :  { %6731 = sst [smem:[#allocation19_spill]] %s6695_s25  ;;  %4725 = vmatprep.subr.bf16.mxu0 %v5401_v0  ;;  %s6745_s7 = smov 64  }
  0x12   :  { %v4240_v6 = vld [vmem:[%s6734_s10] ss:$0 sm:$0xff] }
  0x13   :  { %4726 = vmatpush3.bf16.msra.mxu0 %v5164_v2 }
  0x14   :  { %4739 = vmatprep.subr.bf16.mxu0 %v5401_v0 }
  0x16   :  { %4728 = vmatmul.mubr.msk.bf16.vlgmr.msra.gmra.mrb[0].mxu0 %vm111_vm1, %v87_v5 }
  0x17   :  { %4743 = vmatprep.mubr.msk.bf16.mxu0 %vm5402_vm0, %v5401_v0 }
  0xe9   :  { %v149_v7 = vpop.f32.mrb[0].mxu0 }
  0xea   :  { %v5575_v8 = vadd.f32 %v4240_v6, %v149_v7  ;;  %v4729_v9 = vpop.f32.mrb[1].mxu0 }
  0xeb   :  { %v152_v10 = vpop.f32.mrb[2].mxu0 }
  0xec   :  { %158 = vrot.lane.b32.xlu0 %v5575_v8, %s6711_s9  ;;  %v4730_v11 = vpop.f32.mrb[3].mxu0  ;;  %v5579_v12 = vadd.f32 %v4240_v6, %v152_v10 }
  0xf0   :  { %160 = vrot.lane.b32.xlu0 %v5579_v12, %s6711_s9 }
 0x15e   :  { %v159_v13 = vpop.permute.xlu0 %158 }
 0x15f   :  { %v197_v14 = vmul.f32 %v159_v13, %v5579_v12  ;;  %v164_v15 = vmul.f32 %v159_v13, %v5575_v8 }
 0x161   :  { %230 = vrot.lane.b32.xlu1 %v164_v15, %s6709_s0  ;;  %269 = vrot.lane.b32.xlu0 %v197_v14, %s6709_s0  ;;  %v167_v19 = vsel %vm166_vm2, %v164_v15, 0.0  ;;  %v199_v20 = vsel %vm166_vm2, %v197_v14, 0.0 }
 0x162   :  { %v161_v16 = vpop.permute.xlu0 %160 }
 0x163   :  { %v165_v17 = vmul.f32 %v161_v16, %v5575_v8  ;;  %v198_v18 = vmul.f32 %v161_v16, %v5579_v12 }
 0x165   :  { %232 = vrot.lane.b32.xlu1 %v165_v17, %s6709_s0  ;;  %v202_v21 = vsel %vm166_vm2, %v198_v18, 0.0  ;;  %v170_v22 = vsel %vm166_vm2, %v165_v17, 0.0 }
 0x169   :  { %271 = vrot.lane.b32.xlu1 %v198_v18, %s6709_s0  ;;  %s6741_s0 = sld [smem:[#allocation13_spill]] }
 0x180   :  { %168 = vadd.xlane.f32.xlu0 %v167_v19 }
 0x184   :  { %200 = vadd.xlane.f32.xlu0 %v199_v20 }
 0x188   :  { %203 = vadd.xlane.f32.xlu0 %v202_v21 }
 0x18d   :  { %171 = vadd.xlane.f32.xlu1 %v170_v22 }
 0x1d3   :  { %v231_v23 = vpop.permute.xlu1 %230  ;;  %v270_v25 = vpop.permute.xlu0 %269 }
 0x1d4   :  { %v236_v24 = vsel %vm166_vm2, %v231_v23, 0.0  ;;  %v275_v27 = vsel %vm166_vm2, %v270_v25, 0.0 }
 0x1d5   :  { %237 = vadd.xlane.f32.xlu1 %v236_v24 }
 0x1d7   :  { %v233_v26 = vpop.permute.xlu1 %232 }
 0x1d8   :  { %v239_v28 = vsel %vm166_vm2, %v233_v26, 0.0 }
 0x1d9   :  { %276 = vadd.xlane.f32.xlu1 %v275_v27  ;;  %240 = vadd.xlane.f32.xlu0 %v239_v28 }
 0x1db   :  { %v272_v29 = vpop.permute.xlu1 %271 }
 0x1dc   :  { %v278_v30 = vsel %vm166_vm2, %v272_v29, 0.0 }
 0x1dd   :  { %279 = vadd.xlane.f32.xlu0 %v278_v30 }
 0x20d   :  { %v169_v31 = vpop.xlane.xlu0 %168 }
 0x20e   :  { %v173_v40 = vmul.f32 0.25, %v169_v31 }
 0x211   :  { %v201_v32 = vpop.xlane.xlu0 %200 }
 0x212   :  { %v205_v34 = vmul.f32 0.25, %v201_v32 }
 0x215   :  { %v204_v33 = vpop.xlane.xlu0 %203 }
 0x216   :  { %v206_v35 = vmul.f32 0.25, %v204_v33 }
 0x218   :  { %v207_v36 = vmax.f32 %v205_v34, %v206_v35 }
 0x21a   :  { %v208_v37 = vsub.f32 %v205_v34, %v207_v36  ;;  %v209_v38 = vsub.f32 %v206_v35, %v207_v36  ;;  %v172_v39 = vpop.xlane.xlu1 %171 }
 0x21b   :  { %v174_v41 = vmul.f32 0.25, %v172_v39 }
 0x21c   :  { %v210_v42 = vmul.f32 1.442695, %v208_v37  ;;  %v212_v43 = vmul.f32 1.442695, %v209_v38  ;;  %v5165_v37 = vld [vmem:[%s6735_s6] sm:$0xff]  }
 0x21d   :  { %v175_v44 = vmax.f32 %v173_v40, %v174_v41  ;;  %4732 = vmatpush3.bf16.msra.mxu1 %v5165_v37 }
 0x21e   :  { %5265 = vpow2.f32 %v210_v42  ;;  %4733 = vmatprep.subr.bf16.mxu1 %v5401_v0 }
 0x21f   :  { %5267 = vpow2.f32 %v212_v43  ;;  %v176_v45 = vsub.f32 %v173_v40, %v175_v44  ;;  %v177_v46 = vsub.f32 %v174_v41, %v175_v44  ;;  %v5166_v40 = vld [vmem:[%s6735_s6 + $0x8] sm:$0xff]  }
 0x221   :  { %v178_v47 = vmul.f32 1.442695, %v176_v45  ;;  %v180_v48 = vmul.f32 1.442695, %v177_v46  ;;  %4734 = vmatpush3.bf16.msra.mxu1 %v5166_v40 }
 0x222   :  { %4763 = vmatprep.subr.bf16.mxu1 %v5401_v0 }
 0x223   :  { %5269 = vpow2.f32 %v178_v47 }
 0x224   :  { %5271 = vpow2.f32 %v180_v48 }
 0x228   :  { %v5266_v49 = vpop.eup %5265 }
 0x229   :  { %v5268_v50 = vpop.eup %5267 }
 0x22a   :  { %v214_v51 = vadd.f32 %v5268_v50, %v5266_v49 }
 0x22c   :  { %5273 = vrcp.f32 %v214_v51 }
 0x22d   :  { %v5270_v52 = vpop.eup %5269 }
 0x22e   :  { %v5272_v53 = vpop.eup %5271 }
 0x22f   :  { %v182_v54 = vadd.f32 %v5272_v53, %v5270_v52 }
 0x231   :  { %5275 = vrcp.f32 %v182_v54 }
 0x236   :  { %v5274_v55 = vpop.eup %5273 }
 0x237   :  { %v216_v56 = vmul.f32 %v5274_v55, %v5266_v49  ;;  %v217_v57 = vmul.f32 %v5274_v55, %v5268_v50 }
 0x239   :  { %v218_v58 = vmul.f32 %v216_v56, %v5575_v8  ;;  %v219_v59 = vmul.f32 %v217_v57, %v5579_v12 }
 0x23b   :  { %v5276_v60 = vpop.eup %5275  ;;  %v220_v61 = vsel %vm188_vm3, %v218_v58, 0.0  ;;  %v221_v62 = vsel %vm188_vm3, %v219_v59, 0.0  ;;  %v4244_v59 = vld [vmem:[%s6736_s30] ss:$0 sm:$0xff] }
 0x23c   :  { %v222_v63 = vadd.f32 %v221_v62, %v220_v61  ;;  %v184_v1 = vmul.f32 %v5276_v60, %v5270_v52  ;;  %v185_v2 = vmul.f32 %v5276_v60, %v5272_v53 }
 0x23e   :  { %224 = vrot.lane.b32.xlu0 %v222_v63, %s6707_s27  ;;  %v186_v5 = vmul.f32 %v184_v1, %v5575_v8  ;;  %v187_v6 = vmul.f32 %v185_v2, %v5579_v12 }
 0x240   :  { %v189_v7 = vsel %vm188_vm3, %v186_v5, 0.0  ;;  %v190_v9 = vsel %vm188_vm3, %v187_v6, 0.0 }
 0x241   :  { %v191_v10 = vadd.f32 %v190_v9, %v189_v7 }
 0x243   :  { %193 = vrot.lane.b32.xlu1 %v191_v10, %s6707_s27 }
 0x262   :  { %v238_v11 = vpop.xlane.xlu1 %237 }
 0x263   :  { %v242_v14 = vmul.f32 0.25, %v238_v11 }
 0x266   :  { %v241_v13 = vpop.xlane.xlu0 %240  ;;  %v277_v16 = vpop.xlane.xlu1 %276 }
 0x267   :  { %v243_v15 = vmul.f32 0.25, %v241_v13  ;;  %v281_v19 = vmul.f32 0.25, %v277_v16 }
 0x269   :  { %v244_v17 = vmax.f32 %v242_v14, %v243_v15 }
 0x26a   :  { %v280_v18 = vpop.xlane.xlu0 %279 }
 0x26b   :  { %v245_v20 = vsub.f32 %v242_v14, %v244_v17  ;;  %v246_v21 = vsub.f32 %v243_v15, %v244_v17  ;;  %v282_v22 = vmul.f32 0.25, %v280_v18 }
 0x26d   :  { %v247_v23 = vmul.f32 1.442695, %v245_v20  ;;  %v249_v24 = vmul.f32 1.442695, %v246_v21  ;;  %v283_v25 = vmax.f32 %v281_v19, %v282_v22  ;;  %v5168_v20 = vld [vmem:[%s6737_s3 + $0x8] sm:$0xff]   ;;  %v5173_v21 = vld [vmem:[%s6738_s8] sm:$0xff]  }
 0x26f   :  { %5277 = vpow2.f32 %v247_v23  ;;  %v284_v26 = vsub.f32 %v281_v19, %v283_v25  ;;  %v285_v27 = vsub.f32 %v282_v22, %v283_v25 }
 0x270   :  { %5279 = vpow2.f32 %v249_v24 }
 0x271   :  { %v286_v28 = vmul.f32 1.442695, %v284_v26  ;;  %v288_v29 = vmul.f32 1.442695, %v285_v27 }
 0x273   :  { %5281 = vpow2.f32 %v286_v28 }
 0x274   :  { %5283 = vpow2.f32 %v288_v29  ;;  %v4248_v29 = vld [vmem:[%s6739_s28] ss:$0 sm:$0xff] }
 0x279   :  { %v5278_v30 = vpop.eup %5277 }
 0x27a   :  { %v5280_v31 = vpop.eup %5279 }
 0x27b   :  { %v251_v32 = vadd.f32 %v5280_v31, %v5278_v30 }
 0x27d   :  { %v5282_v33 = vpop.eup %5281  ;;  %5285 = vrcp.f32 %v251_v32 }
 0x27e   :  { %v5284_v34 = vpop.eup %5283 }
 0x27f   :  { %v290_v35 = vadd.f32 %v5284_v34, %v5282_v33 }
 0x281   :  { %5287 = vrcp.f32 %v290_v35 }
 0x287   :  { %v5286_v36 = vpop.eup %5285 }
 0x288   :  { %v253_v38 = vmul.f32 %v5286_v36, %v5278_v30  ;;  %v254_v39 = vmul.f32 %v5286_v36, %v5280_v31  ;;  %v4249_v31 = vld [vmem:[%s6740_s1] ss:$0 sm:$0xff] }
 0x28a   :  { %v255_v41 = vmul.f32 %v253_v38, %v5575_v8  ;;  %v256_v42 = vmul.f32 %v254_v39, %v5579_v12 }
 0x28b   :  { %v5288_v43 = vpop.eup %5287 }
 0x28c   :  { %v258_v44 = vsel %vm257_vm4, %v255_v41, 0.0  ;;  %v259_v45 = vsel %vm257_vm4, %v256_v42, 0.0  ;;  %v292_v46 = vmul.f32 %v5288_v43, %v5282_v33  ;;  %v293_v47 = vmul.f32 %v5288_v43, %v5284_v34 }
 0x28d   :  { %v260_v48 = vadd.f32 %v259_v45, %v258_v44  ;;  %v434_v33 = vlaneseq }
 0x28e   :  { %v294_v49 = vmul.f32 %v292_v46, %v5575_v8  ;;  %v295_v50 = vmul.f32 %v293_v47, %v5579_v12  ;;  %v5169_v46 = vld [vmem:[%s6737_s3 + $0x10] sm:$0xff]  }
 0x28f   :  { %262 = vrot.lane.b32.xlu1 %v260_v48, %s6707_s27  ;;  %v5663_v38 = vshrl.u32 %v434_v33, 7  ;;  %v5170_v48 = vld [vmem:[%s6737_s3 + $0x18] sm:$0xff]  }
 0x290   :  { %v296_v51 = vsel %vm257_vm4, %v294_v49, 0.0  ;;  %v297_v52 = vsel %vm257_vm4, %v295_v50, 0.0  ;;  %v5171_v49 = vld [vmem:[%s6737_s3 + $0x20] sm:$0xff]  }
 0x291   :  { %v298_v53 = vadd.f32 %v297_v52, %v296_v51  ;;  %vm452_vm7 = vcmp.ge.s32.totalorder %v5663_v38, 1  ;;  %v5172_v52 = vld [vmem:[%s6737_s3 + $0x28] sm:$0xff]   ;;  %vm580_vm9 = vcmp.lt.s32.totalorder %v5663_v38, 7 }
 0x293   :  { %300 = vrot.lane.b32.xlu1 %v298_v53, %s6707_s27 }
 0x2b0   :  { %v225_v54 = vpop.permute.xlu0 %224 }
 0x2b1   :  { %227 = vst.msk [vmem:[#allocation2 + $0x8] sm:$0xff] %vm166_vm2, %v225_v54 }
 0x2b5   :  { %v194_v55 = vpop.permute.xlu1 %193 }
 0x2b6   :  { %196 = vst.msk [vmem:[#allocation2] sm:$0xff] %vm166_vm2, %v194_v55 }
 0x301   :  { %v263_v8 = vpop.permute.xlu1 %262 }
 0x302   :  { %266 = vst.msk [vmem:[#allocation2] sm:$0xff] %vm265_vm5, %v263_v8 }
 0x305   :  { %v301_v12 = vpop.permute.xlu1 %300 }
 0x306   :  { %303 = vst.msk [vmem:[#allocation2 + $0x8] sm:$0xff] %vm265_vm5, %v301_v12 }
 0x309   :  { %v304_v56 = vld [vmem:[#allocation2] sm:$0xff] }
 0x30d   :  { %v305_v57 = vld [vmem:[#allocation2 + $0x8] sm:$0xff] }
 0x30e   :  { %v306_v58 = vpack.c.bf16 %v305_v57, %v304_v56  ;;  %v5174_v56 = vld [vmem:[%s6738_s8 + $0x40] sm:$0xff]  }
 0x310   :  { %4736 = vmatmul.mubr.msk.bf16.vlgmr.msra.gmra.mrb[0].mxu1 %vm111_vm1, %v306_v58  ;;  %v5175_v58 = vld [vmem:[%s6738_s8 + $0x8] sm:$0xff]  }
 0x311   :  { %4771 = vmatprep.mubr.msk.bf16.mxu1 %vm5402_vm0, %v5401_v0  ;;  %4764 = vmatpush3.bf16.msra.mxu1 %v5173_v21 }
 0x312   :  { %4765 = vmatprep.subr.bf16.mxu1 %v5401_v0 }
 0x315   :  { %4766 = vmatpush3.bf16.msra.mxu1 %v5175_v58 }
 0x316   :  { %4767 = vmatprep.subr.bf16.mxu1 %v5401_v0 }
 0x3e3   :  { %v367_v60 = vpop.f32.mrb[0].mxu1 }
 0x3e4   :  { %v368_v61 = vadd.f32 %v4244_v59, %v367_v60  ;;  %v4737_v62 = vpop.f32.mrb[1].mxu1  ;;  %v5177_v60 = vld [vmem:[%s6738_s8 + $0x10] sm:$0xff]  }
 0x3e5   :  { %v370_v63 = vpop.f32.mrb[2].mxu1  ;;  %4768 = vmatpush3.bf16.msra.mxu1 %v5177_v60  ;;  %v5179_v62 = vld [vmem:[%s6738_s8 + $0x18] sm:$0xff]  }
 0x3e6   :  { %v371_v1 = vadd.f32 %v4244_v59, %v370_v63  ;;  %v4738_v2 = vpop.f32.mrb[3].mxu1  ;;  %v374_v5 = vadd.f32 %v368_v61, %v5558_v3  ;;  %v5176_v59 = vld [vmem:[%s6738_s8 + $0x48] sm:$0xff]   ;;  %v5178_v61 = vld [vmem:[%s6738_s8 + $0x50] sm:$0xff]   ;;  %4769 = vmatprep.subr.bf16.mxu1 %v5401_v0  ;;  %v5180_v63 = vld [vmem:[%s6738_s8 + $0x58] sm:$0xff]  }
 0x3e8   :  { %v378_v6 = vsel %vm111_vm1, %v374_v5, 0.0  ;;  %v375_v7 = vadd.f32 %v371_v1, %v5563_v4  ;;  %v5167_v4 = vld [vmem:[%s6737_s3] sm:$0xff]  }
 0x3e9   :  { %379 = vadd.xlane.f32.xlu0 %v378_v6  ;;  %4740 = vmatpush3.bf16.msra.mxu0 %v5167_v4  ;;  %v4250_v1 = vld [vmem:[%s6741_s0] ss:$0 sm:$0xff] }
 0x3ea   :  { %v381_v9 = vsel %vm111_vm1, %v375_v7, 0.0  ;;  %4741 = vmatprep.subr.bf16.mxu0 %v5401_v0  ;;  %4770 = vmatpush3.bf16.msra.mxu1 %v5179_v62 }
 0x3eb   :  { %382 = vadd.xlane.f32.xlu1 %v381_v9  ;;  %4775 = vmatprep.subr.bf16.mxu1 %v5401_v0 }
 0x3ed   :  { %4742 = vmatpush3.bf16.msra.mxu0 %v5168_v20 }
 0x3ee   :  { %4747 = vmatprep.subr.bf16.mxu0 %v5401_v0 }
 0x476   :  { %v380_v10 = vpop.xlane.xlu0 %379 }
 0x477   :  { %v385_v11 = vmul.f32 0.03125, %v380_v10 }
 0x478   :  { %v383_v13 = vpop.xlane.xlu1 %382 }
 0x479   :  { %v387_v14 = vsub.f32 %v374_v5, %v385_v11  ;;  %v386_v15 = vmul.f32 0.03125, %v383_v13 }
 0x47b   :  { %v388_v16 = vsub.f32 %v375_v7, %v386_v15  ;;  %v389_v17 = vmul.f32 %v387_v14, %v387_v14 }
 0x47d   :  { %v391_v18 = vsel %vm111_vm1, %v389_v17, 0.0  ;;  %v390_v19 = vmul.f32 %v388_v16, %v388_v16 }
 0x47e   :  { %392 = vadd.xlane.f32.xlu0 %v391_v18 }
 0x47f   :  { %v394_v3 = vsel %vm111_vm1, %v390_v19, 0.0 }
 0x482   :  { %395 = vadd.xlane.f32.xlu0 %v394_v3 }
 0x50b   :  { %v393_v22 = vpop.xlane.xlu0 %392 }
 0x50c   :  { %v397_v23 = vmul.f32 0.03125, %v393_v22 }
 0x50e   :  { %v399_v24 = vadd.f32 1e-05, %v397_v23 }
 0x50f   :  { %v396_v25 = vpop.xlane.xlu0 %395 }
 0x510   :  { %5289 = vrsqrt.f32 %v399_v24  ;;  %v398_v26 = vmul.f32 0.03125, %v396_v25  ;;  %v5181_v25 = vld [vmem:[%s6738_s8 + $0x20] sm:$0xff]  }
 0x512   :  { %v400_v27 = vadd.f32 1e-05, %v398_v26 }
 0x514   :  { %5291 = vrsqrt.f32 %v400_v27 }
 0x51a   :  { %v5290_v28 = vpop.eup %5289 }
 0x51b   :  { %v403_v30 = vmul.f32 %v5290_v28, %v387_v14  ;;  %v5182_v28 = vld [vmem:[%s6738_s8 + $0x28] sm:$0xff]  }
 0x51d   :  { %v411_v32 = vmul.f32 %v4248_v29, %v403_v30  ;;  %v5184_v30 = vld [vmem:[%s6738_s8 + $0x38] sm:$0xff]  }
 0x51e   :  { %v5292_v34 = vpop.eup %5291 }
 0x51f   :  { %v5661_v35 = vadd.f32 %v4249_v31, %v411_v32  ;;  %v404_v36 = vmul.f32 %v5292_v34, %v388_v16 }
 0x521   :  { %v412_v37 = vmul.f32 %v4248_v29, %v404_v36  ;;  %v446_v39 = vrot.slane %v5661_v35, 7  ;;  %v574_v53 = vrot.slane %v5661_v35, 1  ;;  %v5183_v29 = vld [vmem:[%s6738_s8 + $0x30] sm:$0xff]  }
 0x523   :  { %v5666_v40 = vadd.f32 %v4249_v31, %v412_v37  ;;  %v451_v42 = vsel %vm445_vm6, 0.0, %v446_v39 }
 0x524   :  { %v453_v44 = vsel %vm452_vm7, %v451_v42, 0.0  ;;  %v4260_v42 = vld [vmem:[%s6742_s2] ss:$0 sm:$0xff] }
 0x525   :  { %v447_v41 = vrot.slane %v5666_v40, 7  ;;  %v514_v50 = vpack.c.bf16 %v5666_v40, %v5661_v35  ;;  %v575_v51 = vrot.slane %v5666_v40, 1 }
 0x527   :  { %v448_v43 = vsel %vm445_vm6, %v446_v39, %v447_v41  ;;  %v576_v54 = vsel %vm573_vm8, %v574_v53, %v575_v51  ;;  %v579_v55 = vsel %vm573_vm8, %v575_v51, 0.0 }
 0x528   :  { %v454_v45 = vsel %vm452_vm7, %v448_v43, 0.0  ;;  %v581_v8 = vsel %vm580_vm9, %v576_v54, 0.0  ;;  %v582_v12 = vsel %vm580_vm9, %v579_v55, 0.0 }
 0x529   :  { %v455_v47 = vpack.c.bf16 %v454_v45, %v453_v44  ;;  %v583_v57 = vpack.c.bf16 %v582_v12, %v581_v8 }
 0x52b   :  { %4744 = vmatmul.mubr.msk.bf16.vlgmr.msra.gmra.mrb[4].mxu0 %vm111_vm1, %v455_v47 }
 0x52c   :  { %4748 = vmatpush3.bf16.msra.mxu0 %v5169_v46  ;;  %4751 = vmatprep.mubr.msk.bf16.mxu0 %vm5402_vm0, %v5401_v0 }
 0x52d   :  { %4749 = vmatprep.subr.bf16.mxu0 %v5401_v0 }
 0x530   :  { %4750 = vmatpush3.bf16.msra.mxu0 %v5170_v48 }
 0x531   :  { %4755 = vmatprep.subr.bf16.mxu0 %v5401_v0 }
 0x537   :  { %4752 = vmatmul.mubr.msk.bf16.vlgmr.msra.gmra.mrb[4].mxu0 %vm111_vm1, %v514_v50 }
 0x538   :  { %4756 = vmatpush3.bf16.msra.mxu0 %v5171_v49  ;;  %4759 = vmatprep.mubr.msk.bf16.mxu0 %vm5402_vm0, %v5401_v0 }
 0x539   :  { %4757 = vmatprep.subr.bf16.mxu0 %v5401_v0 }
 0x53c   :  { %4758 = vmatpush3.bf16.msra.mxu0 %v5172_v52 }
 0x53d   :  { %4787 = vmatprep.subr.bf16.mxu0 %v5401_v0 }
 0x543   :  { %4760 = vmatmul.mubr.msk.bf16.vlgmr.msra.gmra.mrb[4].mxu0 %vm111_vm1, %v583_v57 }
 0x544   :  { %4788 = vmatpush3.bf16.msra.mxu0 %v5174_v56  ;;  %4795 = vmatprep.mubr.msk.bf16.mxu0 %vm5402_vm0, %v5401_v0 }
 0x545   :  { %4789 = vmatprep.subr.bf16.mxu0 %v5401_v0 }
 0x548   :  { %4790 = vmatpush3.bf16.msra.mxu0 %v5176_v59 }
 0x549   :  { %4791 = vmatprep.subr.bf16.mxu0 %v5401_v0 }
 0x54c   :  { %4792 = vmatpush3.bf16.msra.mxu0 %v5178_v61 }
 0x54d   :  { %4793 = vmatprep.subr.bf16.mxu0 %v5401_v0 }
 0x550   :  { %4794 = vmatpush3.bf16.msra.mxu0 %v5180_v63 }
 0x551   :  { %4807 = vmatprep.subr.bf16.mxu0 %v5401_v0 }
 0x616   :  { %v633_v2 = vpop.f32.mrb[4].mxu0 }
 0x617   :  { %v5094_v5 = vadd.f32 %v4250_v1, %v633_v2  ;;  %v4761_v6 = vpop.f32.mrb[5].mxu0 }
 0x618   :  { %v636_v7 = vpop.f32.mrb[6].mxu0 }
 0x619   :  { %v642_v9 = vmax.f32 %v5094_v5, 0.0  ;;  %v5095_v10 = vadd.f32 %v4250_v1, %v636_v7  ;;  %v4762_v11 = vpop.f32.mrb[7].mxu0  ;;  %v5186_v1 = vld [vmem:[%s6732_s5 + $0x18] sm:$0xff]  }
 0x61b   :  { %v678_v13 = vrot.slane %v642_v9, 7  ;;  %v643_v14 = vmax.f32 %v5095_v10, 0.0  ;;  %v829_v15 = vrot.slane %v642_v9, 1 }
 0x61d   :  { %v683_v16 = vsel %vm445_vm6, 0.0, %v678_v13  ;;  %v679_v17 = vrot.slane %v643_v14, 7  ;;  %v758_v18 = vpack.c.bf16 %v643_v14, %v642_v9  ;;  %v830_v19 = vrot.slane %v643_v14, 1 }
 0x61e   :  { %v684_v21 = vsel %vm452_vm7, %v683_v16, 0.0 }
 0x61f   :  { %v680_v3 = vsel %vm445_vm6, %v678_v13, %v679_v17  ;;  %v831_v4 = vsel %vm573_vm8, %v829_v15, %v830_v19  ;;  %v834_v20 = vsel %vm573_vm8, %v830_v19, 0.0  ;;  %v4276_v13 = vld [vmem:[%s6680_s11] ss:$0 sm:$0xff] }
 0x620   :  { %v685_v22 = vsel %vm452_vm7, %v680_v3, 0.0  ;;  %v835_v23 = vsel %vm580_vm9, %v831_v4, 0.0  ;;  %v836_v24 = vsel %vm580_vm9, %v834_v20, 0.0 }
 0x621   :  { %v837_v26 = vpack.c.bf16 %v836_v24, %v835_v23  ;;  %v686_v27 = vpack.c.bf16 %v685_v22, %v684_v21  ;;  %v4283_v21 = vld [vmem:[%s6734_s10 + $0x1] ss:$0 sm:$0xff] }
 0x623   :  { %4772 = vmatmul.mubr.msk.bf16.vlgmr.msra.gmra.mrb[4].mxu1 %vm711_vm10, %v686_v27  ;;  %4796 = vmatmul.mubr.msk.bf16.vlgmr.msra.gmra.mrb[8].mxu0 %vm711_vm10, %v837_v26 }
 0x624   :  { %4776 = vmatpush3.bf16.msra.mxu1 %v5181_v25  ;;  %4783 = vmatprep.mubr.msk.bf16.mxu1 %vm5402_vm0, %v5401_v0 }
 0x625   :  { %4777 = vmatprep.subr.bf16.mxu1 %v5401_v0  ;;  %4811 = vmatprep.mubr.msk.bf16.mxu0 %vm5402_vm0, %v5401_v0 }
 0x628   :  { %4778 = vmatpush3.bf16.msra.mxu1 %v5182_v28 }
 0x629   :  { %4779 = vmatprep.subr.bf16.mxu1 %v5401_v0 }
 0x62c   :  { %4780 = vmatpush3.bf16.msra.mxu1 %v5183_v29 }
 0x62d   :  { %4781 = vmatprep.subr.bf16.mxu1 %v5401_v0 }
 0x630   :  { %4782 = vmatpush3.bf16.msra.mxu1 %v5184_v30 }
 0x631   :  { %4799 = vmatprep.subr.bf16.mxu1 %v5401_v0 }
 0x633   :  { %4784 = vmatmul.mubr.msk.bf16.vlgmr.msra.gmra.mrb[8].mxu1 %vm711_vm10, %v758_v18  ;;  %v4277_v18 = vld [vmem:[%s6681_s12] ss:$0 sm:$0xff] }
 0x634   :  { %4803 = vmatprep.mubr.msk.bf16.mxu1 %vm5402_vm0, %v5401_v0 }
 0x6f6   :  { %v749_v31 = vpop.f32.mrb[4].mxu1  ;;  %v899_v32 = vpop.f32.mrb[8].mxu0 }
 0x6f7   :  { %v4773_v33 = vpop.f32.mrb[5].mxu1  ;;  %v4797_v34 = vpop.f32.mrb[9].mxu0  ;;  %v756_v43 = vadd.f32 %v4260_v42, %v749_v31 }
 0x6f8   :  { %v752_v36 = vpop.f32.mrb[6].mxu1  ;;  %v902_v37 = vpop.f32.mrb[10].mxu0 }
 0x6f9   :  { %v4774_v39 = vpop.f32.mrb[7].mxu1  ;;  %v4798_v41 = vpop.f32.mrb[11].mxu0  ;;  %v757_v45 = vadd.f32 %v4260_v42, %v752_v36 }
 0x706   :  { %v820_v44 = vpop.f32.mrb[8].mxu1 }
 0x707   :  { %v827_v46 = vadd.f32 %v820_v44, %v756_v43  ;;  %v4785_v47 = vpop.f32.mrb[9].mxu1 }
 0x708   :  { %v823_v48 = vpop.f32.mrb[10].mxu1 }
 0x709   :  { %v906_v49 = vadd.f32 %v899_v32, %v827_v46  ;;  %v828_v50 = vadd.f32 %v823_v48, %v757_v45  ;;  %v4786_v51 = vpop.f32.mrb[11].mxu1 }
 0x70b   :  { %v907_v52 = vadd.f32 %v902_v37, %v828_v50  ;;  %v908_v53 = vadd.f32 %v906_v49, %v5661_v35 }
 0x70d   :  { %v912_v54 = vsel %vm111_vm1, %v908_v53, 0.0  ;;  %v909_v55 = vadd.f32 %v907_v52, %v5666_v40  ;;  %v5185_v40 = vld [vmem:[%s6732_s5 + $0x10] sm:$0xff]  }
 0x70e   :  { %913 = vadd.xlane.f32.xlu1 %v912_v54  ;;  %4800 = vmatpush3.bf16.msra.mxu1 %v5185_v40 }
 0x70f   :  { %v915_v8 = vsel %vm111_vm1, %v909_v55, 0.0  ;;  %4801 = vmatprep.subr.bf16.mxu1 %v5401_v0 }
 0x710   :  { %916 = vadd.xlane.f32.xlu0 %v915_v8 }
 0x712   :  { %4802 = vmatpush3.bf16.msra.mxu1 %v5186_v1 }
 0x713   :  { %4815 = vmatprep.subr.bf16.mxu1 %v5401_v0 }
 0x79b   :  { %v914_v12 = vpop.xlane.xlu1 %913 }
 0x79c   :  { %v918_v56 = vmul.f32 0.03125, %v914_v12 }
 0x79d   :  { %v917_v57 = vpop.xlane.xlu0 %916 }
 0x79e   :  { %v920_v58 = vsub.f32 %v908_v53, %v918_v56  ;;  %v919_v59 = vmul.f32 0.03125, %v917_v57 }
 0x7a0   :  { %v921_v60 = vsub.f32 %v909_v55, %v919_v59  ;;  %v922_v61 = vmul.f32 %v920_v58, %v920_v58 }
 0x7a2   :  { %v924_v62 = vsel %vm111_vm1, %v922_v61, 0.0  ;;  %v923_v63 = vmul.f32 %v921_v60, %v921_v60 }
 0x7a3   :  { %925 = vadd.xlane.f32.xlu1 %v924_v62 }
 0x7a4   :  { %v927_v35 = vsel %vm111_vm1, %v923_v63, 0.0 }
 0x7a5   :  { %928 = vadd.xlane.f32.xlu0 %v927_v35 }
 0x830   :  { %v926_v2 = vpop.xlane.xlu1 %925 }
 0x831   :  { %v930_v5 = vmul.f32 0.03125, %v926_v2 }
 0x832   :  { %v929_v6 = vpop.xlane.xlu0 %928 }
 0x833   :  { %v932_v7 = vadd.f32 1e-05, %v930_v5  ;;  %v931_v9 = vmul.f32 0.03125, %v929_v6 }
 0x835   :  { %5293 = vrsqrt.f32 %v932_v7  ;;  %v933_v10 = vadd.f32 1e-05, %v931_v9 }
 0x837   :  { %5295 = vrsqrt.f32 %v933_v10 }
 0x83f   :  { %v5294_v11 = vpop.eup %5293 }
 0x840   :  { %v936_v14 = vmul.f32 %v5294_v11, %v920_v58 }
 0x841   :  { %v5296_v15 = vpop.eup %5295 }
 0x842   :  { %v944_v16 = vmul.f32 %v4276_v13, %v936_v14  ;;  %v937_v17 = vmul.f32 %v5296_v15, %v921_v60 }
 0x844   :  { %v945_v19 = vmul.f32 %v4276_v13, %v937_v17  ;;  %v5803_v3 = vadd.f32 %v4277_v18, %v944_v16 }
 0x846   :  { %v5805_v4 = vadd.f32 %v4277_v18, %v945_v19 }
 0x848   :  { %v954_v20 = vpack.c.bf16 %v5805_v4, %v5803_v3 }
 0x84a   :  { %4804 = vmatmul.mubr.msk.bf16.vlgmr.msra.gmra.mrb[12].mxu1 %vm111_vm1, %v954_v20 }
 0x84b   :  { %4819 = vmatprep.mubr.msk.bf16.mxu1 %vm5402_vm0, %v5401_v0 }
 0x91d   :  { %v1017_v22 = vpop.f32.mrb[12].mxu1 }
 0x91e   :  { %v5815_v23 = vadd.f32 %v4283_v21, %v1017_v22  ;;  %v4805_v24 = vpop.f32.mrb[13].mxu1 }
 0x91f   :  { %v1020_v25 = vpop.f32.mrb[14].mxu1 }
 0x920   :  { %v5817_v26 = vadd.f32 %v4283_v21, %v1020_v25  ;;  %1026 = vrot.lane.b32.xlu1 %v5815_v23, %s6743_s4  ;;  %v4806_v27 = vpop.f32.mrb[15].mxu1 }
 0x922   :  { %1028 = vrot.lane.b32.xlu0 %v5817_v26, %s6743_s4 }
 0x992   :  { %v1027_v28 = vpop.permute.xlu1 %1026 }
 0x993   :  { %v1032_v29 = vmul.f32 %v1027_v28, %v5815_v23  ;;  %v1063_v30 = vmul.f32 %v1027_v28, %v5817_v26 }
 0x994   :  { %v1029_v31 = vpop.permute.xlu0 %1028 }
 0x995   :  { %1096 = vrot.lane.b32.xlu1 %v1032_v29, %s6744_s29  ;;  %1133 = vrot.lane.b32.xlu0 %v1063_v30, %s6744_s29  ;;  %v1033_v32 = vmul.f32 %v1029_v31, %v5815_v23  ;;  %v1064_v33 = vmul.f32 %v1029_v31, %v5817_v26  ;;  %v1034_v34 = vsel %vm166_vm2, %v1032_v29, 0.0  ;;  %v1065_v36 = vsel %vm166_vm2, %v1063_v30, 0.0 }
 0x997   :  { %v1068_v37 = vsel %vm166_vm2, %v1064_v33, 0.0  ;;  %v1037_v39 = vsel %vm166_vm2, %v1033_v32, 0.0 }
 0x999   :  { %1098 = vrot.lane.b32.xlu1 %v1033_v32, %s6744_s29 }
 0x99d   :  { %1135 = vrot.lane.b32.xlu1 %v1064_v33, %s6744_s29 }
 0x9b4   :  { %1035 = vadd.xlane.f32.xlu0 %v1034_v34 }
 0x9b8   :  { %1066 = vadd.xlane.f32.xlu0 %v1065_v36 }
 0x9bc   :  { %1069 = vadd.xlane.f32.xlu0 %v1068_v37 }
 0x9c1   :  { %1038 = vadd.xlane.f32.xlu1 %v1037_v39 }
 0xa07   :  { %v1097_v41 = vpop.permute.xlu1 %1096  ;;  %v1134_v43 = vpop.permute.xlu0 %1133 }
 0xa08   :  { %v1102_v42 = vsel %vm166_vm2, %v1097_v41, 0.0  ;;  %v1139_v45 = vsel %vm166_vm2, %v1134_v43, 0.0 }
 0xa09   :  { %1103 = vadd.xlane.f32.xlu1 %v1102_v42 }
 0xa0b   :  { %v1099_v44 = vpop.permute.xlu1 %1098 }
 0xa0c   :  { %v1105_v46 = vsel %vm166_vm2, %v1099_v44, 0.0 }
 0xa0d   :  { %1140 = vadd.xlane.f32.xlu1 %v1139_v45  ;;  %1106 = vadd.xlane.f32.xlu0 %v1105_v46 }
 0xa0f   :  { %v1136_v47 = vpop.permute.xlu1 %1135 }
 0xa10   :  { %v1142_v48 = vsel %vm166_vm2, %v1136_v47, 0.0 }
 0xa11   :  { %1143 = vadd.xlane.f32.xlu0 %v1142_v48 }
 0xa41   :  { %v1036_v49 = vpop.xlane.xlu0 %1035 }
 0xa42   :  { %v1040_v56 = vmul.f32 0.25, %v1036_v49 }
 0xa45   :  { %v1067_v50 = vpop.xlane.xlu0 %1066 }
 0xa46   :  { %v1071_v52 = vmul.f32 0.25, %v1067_v50 }
 0xa49   :  { %v1070_v51 = vpop.xlane.xlu0 %1069 }
 0xa4a   :  { %v1072_v53 = vmul.f32 0.25, %v1070_v51 }
 0xa4c   :  { %v1073_v54 = vmax.f32 %v1071_v52, %v1072_v53 }
 0xa4e   :  { %v1074_v55 = vsub.f32 %v1071_v52, %v1073_v54  ;;  %v1075_v8 = vsub.f32 %v1072_v53, %v1073_v54  ;;  %v1039_v12 = vpop.xlane.xlu1 %1038 }
 0xa4f   :  { %v1041_v57 = vmul.f32 0.25, %v1039_v12 }
 0xa50   :  { %v1076_v58 = vmul.f32 1.442695, %v1074_v55  ;;  %v1078_v59 = vmul.f32 1.442695, %v1075_v8  ;;  %v5187_v55 = vld [vmem:[%s6735_s6 + $0x10] sm:$0xff]  }
 0xa51   :  { %v1042_v60 = vmax.f32 %v1040_v56, %v1041_v57  ;;  %4808 = vmatpush3.bf16.msra.mxu0 %v5187_v55 }
 0xa52   :  { %5297 = vpow2.f32 %v1076_v58  ;;  %4809 = vmatprep.subr.bf16.mxu0 %v5401_v0 }
 0xa53   :  { %5299 = vpow2.f32 %v1078_v59  ;;  %v1043_v61 = vsub.f32 %v1040_v56, %v1042_v60  ;;  %v1044_v62 = vsub.f32 %v1041_v57, %v1042_v60  ;;  %v5188_v57 = vld [vmem:[%s6735_s6 + $0x18] sm:$0xff]  }
 0xa55   :  { %v1045_v63 = vmul.f32 1.442695, %v1043_v61  ;;  %v1047_v35 = vmul.f32 1.442695, %v1044_v62  ;;  %4810 = vmatpush3.bf16.msra.mxu0 %v5188_v57 }
 0xa56   :  { %4839 = vmatprep.subr.bf16.mxu0 %v5401_v0 }
 0xa57   :  { %5301 = vpow2.f32 %v1045_v63 }
 0xa58   :  { %5303 = vpow2.f32 %v1047_v35 }
 0xa5c   :  { %v5298_v40 = vpop.eup %5297 }
 0xa5d   :  { %v5300_v1 = vpop.eup %5299 }
 0xa5e   :  { %v1080_v2 = vadd.f32 %v5300_v1, %v5298_v40 }
 0xa60   :  { %5305 = vrcp.f32 %v1080_v2 }
 0xa61   :  { %v5302_v5 = vpop.eup %5301 }
 0xa62   :  { %v5304_v6 = vpop.eup %5303 }
 0xa63   :  { %v1049_v7 = vadd.f32 %v5304_v6, %v5302_v5 }
 0xa65   :  { %5307 = vrcp.f32 %v1049_v7 }
 0xa6a   :  { %v5306_v9 = vpop.eup %5305 }
 0xa6b   :  { %v1082_v10 = vmul.f32 %v5306_v9, %v5298_v40  ;;  %v1083_v11 = vmul.f32 %v5306_v9, %v5300_v1 }
 0xa6d   :  { %v1084_v13 = vmul.f32 %v1082_v10, %v5815_v23  ;;  %v1085_v14 = vmul.f32 %v1083_v11, %v5817_v26 }
 0xa6f   :  { %v5308_v15 = vpop.eup %5307  ;;  %v1086_v16 = vsel %vm188_vm3, %v1084_v13, 0.0  ;;  %v1087_v17 = vsel %vm188_vm3, %v1085_v14, 0.0 }
 0xa70   :  { %v1088_v18 = vadd.f32 %v1087_v17, %v1086_v16  ;;  %v1051_v19 = vmul.f32 %v5308_v15, %v5302_v5  ;;  %v1052_v20 = vmul.f32 %v5308_v15, %v5304_v6  ;;  %v4292_v15 = vld [vmem:[%s6736_s30 + $0x1] ss:$0 sm:$0xff] }
 0xa72   :  { %1090 = vrot.lane.b32.xlu0 %v1088_v18, %s6745_s7  ;;  %v1053_v21 = vmul.f32 %v1051_v19, %v5815_v23  ;;  %v1054_v22 = vmul.f32 %v1052_v20, %v5817_v26 }
 0xa74   :  { %v1055_v24 = vsel %vm188_vm3, %v1053_v21, 0.0  ;;  %v1056_v25 = vsel %vm188_vm3, %v1054_v22, 0.0 }
 0xa75   :  { %v1057_v27 = vadd.f32 %v1056_v25, %v1055_v24 }
 0xa77   :  { %1059 = vrot.lane.b32.xlu1 %v1057_v27, %s6745_s7 }
 0xa96   :  { %v1104_v28 = vpop.xlane.xlu1 %1103 }
 0xa97   :  { %v1108_v30 = vmul.f32 0.25, %v1104_v28 }
 0xa9a   :  { %v1107_v29 = vpop.xlane.xlu0 %1106  ;;  %v1141_v32 = vpop.xlane.xlu1 %1140 }
 0xa9b   :  { %v1109_v31 = vmul.f32 0.25, %v1107_v29  ;;  %v1145_v36 = vmul.f32 0.25, %v1141_v32 }
 0xa9d   :  { %v1110_v33 = vmax.f32 %v1108_v30, %v1109_v31 }
 0xa9e   :  { %v1144_v34 = vpop.xlane.xlu0 %1143 }
 0xa9f   :  { %v1111_v37 = vsub.f32 %v1108_v30, %v1110_v33  ;;  %v1112_v39 = vsub.f32 %v1109_v31, %v1110_v33  ;;  %v1146_v41 = vmul.f32 0.25, %v1144_v34 }
 0xaa1   :  { %v1113_v42 = vmul.f32 1.442695, %v1111_v37  ;;  %v1115_v43 = vmul.f32 1.442695, %v1112_v39  ;;  %v1147_v44 = vmax.f32 %v1145_v36, %v1146_v41  ;;  %v5190_v39 = vld [vmem:[%s6737_s3 + $0x38] sm:$0xff]  }
 0xaa3   :  { %5309 = vpow2.f32 %v1113_v42  ;;  %v1148_v45 = vsub.f32 %v1145_v36, %v1147_v44  ;;  %v1149_v46 = vsub.f32 %v1146_v41, %v1147_v44  ;;  %v5195_v41 = vld [vmem:[%s6738_s8 + $0x60] sm:$0xff]  }
 0xaa4   :  { %5311 = vpow2.f32 %v1115_v43 }
 0xaa5   :  { %v1150_v47 = vmul.f32 1.442695, %v1148_v45  ;;  %v1152_v48 = vmul.f32 1.442695, %v1149_v46 }
 0xaa7   :  { %5313 = vpow2.f32 %v1150_v47 }
 0xaa8   :  { %5315 = vpow2.f32 %v1152_v48 }
 0xaad   :  { %v5310_v49 = vpop.eup %5309 }
 0xaae   :  { %v5312_v50 = vpop.eup %5311 }
 0xaaf   :  { %v1117_v51 = vadd.f32 %v5312_v50, %v5310_v49 }
 0xab1   :  { %v5314_v52 = vpop.eup %5313  ;;  %5317 = vrcp.f32 %v1117_v51  ;;  %v4299_v51 = vld [vmem:[%s6740_s1 + $0x1] ss:$0 sm:$0xff] }
 0xab2   :  { %v5316_v53 = vpop.eup %5315 }
 0xab3   :  { %v1154_v54 = vadd.f32 %v5316_v53, %v5314_v52 }
 0xab5   :  { %5319 = vrcp.f32 %v1154_v54 }
 0xabb   :  { %v5318_v8 = vpop.eup %5317 }
 0xabc   :  { %v1119_v12 = vmul.f32 %v5318_v8, %v5310_v49  ;;  %v1120_v56 = vmul.f32 %v5318_v8, %v5312_v50  ;;  %v4298_v49 = vld [vmem:[%s6739_s28 + $0x1] ss:$0 sm:$0xff] }
 0xabe   :  { %v1121_v58 = vmul.f32 %v1119_v12, %v5815_v23  ;;  %v1122_v59 = vmul.f32 %v1120_v56, %v5817_v26 }
 0xabf   :  { %v5320_v60 = vpop.eup %5319 }
 0xac0   :  { %v1123_v61 = vsel %vm257_vm4, %v1121_v58, 0.0  ;;  %v1124_v62 = vsel %vm257_vm4, %v1122_v59, 0.0  ;;  %v1156_v63 = vmul.f32 %v5320_v60, %v5314_v52  ;;  %v1157_v35 = vmul.f32 %v5320_v60, %v5316_v53 }
 0xac1   :  { %v1125_v40 = vadd.f32 %v1124_v62, %v1123_v61  ;;  %v5191_v62 = vld [vmem:[%s6737_s3 + $0x40] sm:$0xff]  }
 0xac2   :  { %v1158_v1 = vmul.f32 %v1156_v63, %v5815_v23  ;;  %v1159_v2 = vmul.f32 %v1157_v35, %v5817_v26  ;;  %v5192_v35 = vld [vmem:[%s6737_s3 + $0x48] sm:$0xff]  }
 0xac3   :  { %1127 = vrot.lane.b32.xlu1 %v1125_v40, %s6745_s7  ;;  %v5193_v40 = vld [vmem:[%s6737_s3 + $0x50] sm:$0xff]  }
 0xac4   :  { %v1160_v5 = vsel %vm257_vm4, %v1158_v1, 0.0  ;;  %v1161_v6 = vsel %vm257_vm4, %v1159_v2, 0.0 }
 0xac5   :  { %v1162_v7 = vadd.f32 %v1161_v6, %v1160_v5  ;;  %v5194_v5 = vld [vmem:[%s6737_s3 + $0x58] sm:$0xff]  }
 0xac7   :  { %1164 = vrot.lane.b32.xlu1 %v1162_v7, %s6745_s7 }
 0xae4   :  { %v1091_v9 = vpop.permute.xlu0 %1090 }
 0xae5   :  { %1093 = vst.msk [vmem:[#allocation2 + $0x8] sm:$0xff] %vm166_vm2, %v1091_v9 }
 0xae9   :  { %v1060_v10 = vpop.permute.xlu1 %1059 }
 0xaea   :  { %1062 = vst.msk [vmem:[#allocation2] sm:$0xff] %vm166_vm2, %v1060_v10 }
 0xb35   :  { %v1128_v11 = vpop.permute.xlu1 %1127 }
 0xb36   :  { %1130 = vst.msk [vmem:[#allocation2] sm:$0xff] %vm265_vm5, %v1128_v11 }
 0xb39   :  { %v1165_v23 = vpop.permute.xlu1 %1164 }
 0xb3a   :  { %1167 = vst.msk [vmem:[#allocation2 + $0x8] sm:$0xff] %vm265_vm5, %v1165_v23  ;;  %v5196_v23 = vld [vmem:[%s6738_s8 + $0xa0] sm:$0xff]  }
 0xb3d   :  { %v1168_v26 = vld [vmem:[#allocation2] sm:$0xff] }
 0xb41   :  { %v1169_v13 = vld [vmem:[#allocation2 + $0x8] sm:$0xff] }
 0xb42   :  { %v1170_v14 = vpack.c.bf16 %v1169_v13, %v1168_v26  ;;  %v5197_v13 = vld [vmem:[%s6738_s8 + $0x68] sm:$0xff]  }
 0xb44   :  { %4812 = vmatmul.mubr.msk.bf16.vlgmr.msra.gmra.mrb[12].mxu0 %vm111_vm1, %v1170_v14  ;;  %v5198_v14 = vld [vmem:[%s6738_s8 + $0xa8] sm:$0xff]  }
 0xb45   :  { %4847 = vmatprep.mubr.msk.bf16.mxu0 %vm5402_vm0, %v5401_v0  ;;  %4840 = vmatpush3.bf16.msra.mxu0 %v5195_v41 }
 0xb46   :  { %4841 = vmatprep.subr.bf16.mxu0 %v5401_v0 }
 0xb49   :  { %4842 = vmatpush3.bf16.msra.mxu0 %v5197_v13 }
 0xb4a   :  { %4843 = vmatprep.subr.bf16.mxu0 %v5401_v0 }
 0xc17   :  { %v1233_v16 = vpop.f32.mrb[12].mxu0 }
 0xc18   :  { %v1234_v17 = vadd.f32 %v4292_v15, %v1233_v16  ;;  %v4813_v18 = vpop.f32.mrb[13].mxu0  ;;  %v5200_v16 = vld [vmem:[%s6738_s8 + $0xb0] sm:$0xff]  }
 0xc19   :  { %v1236_v19 = vpop.f32.mrb[14].mxu0  ;;  %v5202_v18 = vld [vmem:[%s6738_s8 + $0xb8] sm:$0xff]  }
 0xc1a   :  { %v1237_v20 = vadd.f32 %v4292_v15, %v1236_v19  ;;  %v4814_v21 = vpop.f32.mrb[15].mxu0  ;;  %v1240_v22 = vadd.f32 %v1234_v17, %v5803_v3  ;;  %v5199_v15 = vld [vmem:[%s6738_s8 + $0x70] sm:$0xff]   ;;  %v5201_v17 = vld [vmem:[%s6738_s8 + $0x78] sm:$0xff]   ;;  %v4313_v19 = vld [vmem:[%s6741_s0 + $0x1] ss:$0 sm:$0xff] }
 0xc1b   :  { %4844 = vmatpush3.bf16.msra.mxu0 %v5199_v15 }
 0xc1c   :  { %v1246_v24 = vsel %vm111_vm1, %v1240_v22, 0.0  ;;  %v1241_v25 = vadd.f32 %v1237_v20, %v5805_v4  ;;  %v5189_v4 = vld [vmem:[%s6737_s3 + $0x30] sm:$0xff]   ;;  %4845 = vmatprep.subr.bf16.mxu0 %v5401_v0 }
 0xc1d   :  { %1247 = vadd.xlane.f32.xlu0 %v1246_v24  ;;  %4816 = vmatpush3.bf16.msra.mxu1 %v5189_v4 }
 0xc1e   :  { %v1249_v27 = vsel %vm111_vm1, %v1241_v25, 0.0  ;;  %4817 = vmatprep.subr.bf16.mxu1 %v5401_v0 }
 0xc1f   :  { %1250 = vadd.xlane.f32.xlu1 %v1249_v27  ;;  %4846 = vmatpush3.bf16.msra.mxu0 %v5201_v17 }
 0xc20   :  { %4851 = vmatprep.subr.bf16.mxu0 %v5401_v0 }
 0xc21   :  { %4818 = vmatpush3.bf16.msra.mxu1 %v5190_v39 }
 0xc22   :  { %4823 = vmatprep.subr.bf16.mxu1 %v5401_v0 }
 0xcaa   :  { %v1248_v28 = vpop.xlane.xlu0 %1247 }
 0xcab   :  { %v1252_v29 = vmul.f32 0.03125, %v1248_v28 }
 0xcac   :  { %v1251_v30 = vpop.xlane.xlu1 %1250 }
 0xcad   :  { %v1254_v31 = vsub.f32 %v1240_v22, %v1252_v29  ;;  %v1253_v32 = vmul.f32 0.03125, %v1251_v30 }
 0xcaf   :  { %v1255_v33 = vsub.f32 %v1241_v25, %v1253_v32  ;;  %v1256_v34 = vmul.f32 %v1254_v31, %v1254_v31 }
 0xcb1   :  { %v1258_v36 = vsel %vm111_vm1, %v1256_v34, 0.0  ;;  %v1257_v37 = vmul.f32 %v1255_v33, %v1255_v33 }
 0xcb2   :  { %1259 = vadd.xlane.f32.xlu0 %v1258_v36 }
 0xcb3   :  { %v1261_v3 = vsel %vm111_vm1, %v1257_v37, 0.0 }
 0xcb6   :  { %1262 = vadd.xlane.f32.xlu0 %v1261_v3 }
 0xd3f   :  { %v1260_v42 = vpop.xlane.xlu0 %1259 }
 0xd40   :  { %v1264_v43 = vmul.f32 0.03125, %v1260_v42 }
 0xd42   :  { %v1266_v44 = vadd.f32 1e-05, %v1264_v43 }
 0xd43   :  { %v1263_v45 = vpop.xlane.xlu0 %1262 }
 0xd44   :  { %5321 = vrsqrt.f32 %v1266_v44  ;;  %v1265_v46 = vmul.f32 0.03125, %v1263_v45  ;;  %v5203_v44 = vld [vmem:[%s6738_s8 + $0x80] sm:$0xff]  }
 0xd46   :  { %v1267_v47 = vadd.f32 1e-05, %v1265_v46 }
 0xd48   :  { %5323 = vrsqrt.f32 %v1267_v47  ;;  %v5204_v47 = vld [vmem:[%s6738_s8 + $0x88] sm:$0xff]  }
 0xd4e   :  { %v5322_v48 = vpop.eup %5321 }
 0xd4f   :  { %v1270_v50 = vmul.f32 %v5322_v48, %v1254_v31  ;;  %v5205_v48 = vld [vmem:[%s6738_s8 + $0x90] sm:$0xff]  }
 0xd51   :  { %v1278_v52 = vmul.f32 %v4298_v49, %v1270_v50 }
 0xd52   :  { %v5324_v53 = vpop.eup %5323 }
 0xd53   :  { %v5901_v54 = vadd.f32 %v4299_v51, %v1278_v52  ;;  %v1271_v55 = vmul.f32 %v5324_v53, %v1255_v33 }
 0xd55   :  { %v1279_v8 = vmul.f32 %v4298_v49, %v1271_v55  ;;  %v1312_v12 = vrot.slane %v5901_v54, 7  ;;  %v1438_v6 = vrot.slane %v5901_v54, 1  ;;  %v5206_v49 = vld [vmem:[%s6738_s8 + $0x98] sm:$0xff]  }
 0xd57   :  { %v5904_v56 = vadd.f32 %v4299_v51, %v1279_v8  ;;  %v1317_v58 = vsel %vm445_vm6, 0.0, %v1312_v12 }
 0xd58   :  { %v1318_v60 = vsel %vm452_vm7, %v1317_v58, 0.0  ;;  %v4348_v58 = vld [vmem:[%s6742_s2 + $0x1] ss:$0 sm:$0xff] }
 0xd59   :  { %v1313_v57 = vrot.slane %v5904_v56, 7  ;;  %v1379_v1 = vpack.c.bf16 %v5904_v56, %v5901_v54  ;;  %v1439_v2 = vrot.slane %v5904_v56, 1 }
 0xd5b   :  { %v1314_v59 = vsel %vm445_vm6, %v1312_v12, %v1313_v57  ;;  %v1440_v7 = vsel %vm573_vm8, %v1438_v6, %v1439_v2  ;;  %v1443_v9 = vsel %vm573_vm8, %v1439_v2, 0.0 }
 0xd5c   :  { %v1319_v61 = vsel %vm452_vm7, %v1314_v59, 0.0  ;;  %v1444_v10 = vsel %vm580_vm9, %v1440_v7, 0.0  ;;  %v1445_v11 = vsel %vm580_vm9, %v1443_v9, 0.0 }
 0xd5d   :  { %v1320_v63 = vpack.c.bf16 %v1319_v61, %v1318_v60  ;;  %v1446_v26 = vpack.c.bf16 %v1445_v11, %v1444_v10 }
 0xd5f   :  { %4820 = vmatmul.mubr.msk.bf16.vlgmr.msra.gmra.mrb[16].mxu1 %vm111_vm1, %v1320_v63 }
 0xd60   :  { %4824 = vmatpush3.bf16.msra.mxu1 %v5191_v62  ;;  %4827 = vmatprep.mubr.msk.bf16.mxu1 %vm5402_vm0, %v5401_v0 }
 0xd61   :  { %4825 = vmatprep.subr.bf16.mxu1 %v5401_v0 }
 0xd64   :  { %4826 = vmatpush3.bf16.msra.mxu1 %v5192_v35 }
 0xd65   :  { %4831 = vmatprep.subr.bf16.mxu1 %v5401_v0 }
 0xd6b   :  { %4828 = vmatmul.mubr.msk.bf16.vlgmr.msra.gmra.mrb[16].mxu1 %vm111_vm1, %v1379_v1 }
 0xd6c   :  { %4832 = vmatpush3.bf16.msra.mxu1 %v5193_v40  ;;  %4835 = vmatprep.mubr.msk.bf16.mxu1 %vm5402_vm0, %v5401_v0 }
 0xd6d   :  { %4833 = vmatprep.subr.bf16.mxu1 %v5401_v0 }
 0xd70   :  { %4834 = vmatpush3.bf16.msra.mxu1 %v5194_v5 }
 0xd71   :  { %4863 = vmatprep.subr.bf16.mxu1 %v5401_v0 }
 0xd77   :  { %4836 = vmatmul.mubr.msk.bf16.vlgmr.msra.gmra.mrb[16].mxu1 %vm111_vm1, %v1446_v26 }
 0xd78   :  { %4864 = vmatpush3.bf16.msra.mxu1 %v5196_v23  ;;  %4871 = vmatprep.mubr.msk.bf16.mxu1 %vm5402_vm0, %v5401_v0 }
 0xd79   :  { %4865 = vmatprep.subr.bf16.mxu1 %v5401_v0 }
 0xd7c   :  { %4866 = vmatpush3.bf16.msra.mxu1 %v5198_v14 }
 0xd7d   :  { %4867 = vmatprep.subr.bf16.mxu1 %v5401_v0 }
 0xd80   :  { %4868 = vmatpush3.bf16.msra.mxu1 %v5200_v16 }
 0xd81   :  { %4869 = vmatprep.subr.bf16.mxu1 %v5401_v0 }
 0xd84   :  { %4870 = vmatpush3.bf16.msra.mxu1 %v5202_v18 }
 0xd85   :  { %4899 = vmatprep.subr.bf16.mxu1 %v5401_v0 }
 0xe4a   :  { %v1496_v20 = vpop.f32.mrb[16].mxu1 }
 0xe4b   :  { %v5096_v21 = vadd.f32 %v4313_v19, %v1496_v20  ;;  %v4837_v22 = vpop.f32.mrb[17].mxu1 }
 0xe4c   :  { %v1499_v24 = vpop.f32.mrb[18].mxu1 }
 0xe4d   :  { %v1505_v25 = vmax.f32 %v5096_v21, 0.0  ;;  %v5097_v27 = vadd.f32 %v4313_v19, %v1499_v24  ;;  %v4838_v28 = vpop.f32.mrb[19].mxu1  ;;  %v5208_v19 = vld [vmem:[%s6682_s13 + $0x8] sm:$0xff]  }
 0xe4f   :  { %v1543_v29 = vrot.slane %v1505_v25, 7  ;;  %v1506_v30 = vmax.f32 %v5097_v27, 0.0  ;;  %v1693_v31 = vrot.slane %v1505_v25, 1 }
 0xe51   :  { %v1548_v32 = vsel %vm445_vm6, 0.0, %v1543_v29  ;;  %v1544_v33 = vrot.slane %v1506_v30, 7  ;;  %v1622_v34 = vpack.c.bf16 %v1506_v30, %v1505_v25  ;;  %v1694_v36 = vrot.slane %v1506_v30, 1 }
 0xe52   :  { %v1549_v39 = vsel %vm452_vm7, %v1548_v32, 0.0  ;;  %v4367_v32 = vld [vmem:[%s6681_s12 + $0x1] ss:$0 sm:$0xff] }
 0xe53   :  { %v1545_v37 = vsel %vm445_vm6, %v1543_v29, %v1544_v33  ;;  %v1695_v3 = vsel %vm573_vm8, %v1693_v31, %v1694_v36  ;;  %v1698_v4 = vsel %vm573_vm8, %v1694_v36, 0.0  ;;  %v4366_v29 = vld [vmem:[%s6680_s11 + $0x1] ss:$0 sm:$0xff] }
 0xe54   :  { %v1550_v41 = vsel %vm452_vm7, %v1545_v37, 0.0  ;;  %v1699_v42 = vsel %vm580_vm9, %v1695_v3, 0.0  ;;  %v1700_v43 = vsel %vm580_vm9, %v1698_v4, 0.0 }
 0xe55   :  { %v1701_v45 = vpack.c.bf16 %v1700_v43, %v1699_v42  ;;  %v1551_v46 = vpack.c.bf16 %v1550_v41, %v1549_v39 }
 0xe57   :  { %4848 = vmatmul.mubr.msk.bf16.vlgmr.msra.gmra.mrb[16].mxu0 %vm711_vm10, %v1551_v46  ;;  %4872 = vmatmul.mubr.msk.bf16.vlgmr.msra.gmra.mrb[20].mxu1 %vm711_vm10, %v1701_v45  ;;  %v5209_v45 = vld [vmem:[%s6682_s13 + $0x10] sm:$0xff]  }
 0xe58   :  { %4852 = vmatpush3.bf16.msra.mxu0 %v5203_v44  ;;  %4859 = vmatprep.mubr.msk.bf16.mxu0 %vm5402_vm0, %v5401_v0 }
 0xe59   :  { %4853 = vmatprep.subr.bf16.mxu0 %v5401_v0  ;;  %4903 = vmatprep.mubr.msk.bf16.mxu1 %vm5402_vm0, %v5401_v0 }
 0xe5c   :  { %4854 = vmatpush3.bf16.msra.mxu0 %v5204_v47  ;;  %v5210_v47 = vld [vmem:[%s6682_s13 + $0x18] sm:$0xff]  }
 0xe5d   :  { %4855 = vmatprep.subr.bf16.mxu0 %v5401_v0 }
 0xe60   :  { %4856 = vmatpush3.bf16.msra.mxu0 %v5205_v48  ;;  %v5211_v48 = vld [vmem:[%s6682_s13 + $0x20] sm:$0xff]  }
 0xe61   :  { %4857 = vmatprep.subr.bf16.mxu0 %v5401_v0 }
 0xe64   :  { %4858 = vmatpush3.bf16.msra.mxu0 %v5206_v49 }
 0xe65   :  { %4875 = vmatprep.subr.bf16.mxu0 %v5401_v0 }
 0xe67   :  { %4860 = vmatmul.mubr.msk.bf16.vlgmr.msra.gmra.mrb[20].mxu0 %vm711_vm10, %v1622_v34 }
 0xe68   :  { %4879 = vmatprep.mubr.msk.bf16.mxu0 %vm5402_vm0, %v5401_v0 }
 0xf2a   :  { %v1613_v50 = vpop.f32.mrb[16].mxu0  ;;  %v1763_v51 = vpop.f32.mrb[20].mxu1 }
 0xf2b   :  { %v4849_v52 = vpop.f32.mrb[17].mxu0  ;;  %v4873_v53 = vpop.f32.mrb[21].mxu1  ;;  %v1620_v59 = vadd.f32 %v4348_v58, %v1613_v50 }
 0xf2c   :  { %v1616_v55 = vpop.f32.mrb[18].mxu0  ;;  %v1766_v8 = vpop.f32.mrb[22].mxu1 }
 0xf2d   :  { %v4850_v12 = vpop.f32.mrb[19].mxu0  ;;  %v4874_v57 = vpop.f32.mrb[23].mxu1  ;;  %v1621_v61 = vadd.f32 %v4348_v58, %v1616_v55  ;;  %v4368_v58 = vld [vmem:[%s6683_s14] ss:$0 sm:$0xff] }
 0xf3a   :  { %v1684_v60 = vpop.f32.mrb[20].mxu0 }
 0xf3b   :  { %v1691_v62 = vadd.f32 %v1684_v60, %v1620_v59  ;;  %v4861_v63 = vpop.f32.mrb[21].mxu0 }
 0xf3c   :  { %v1687_v35 = vpop.f32.mrb[22].mxu0 }
 0xf3d   :  { %v1770_v40 = vadd.f32 %v1763_v51, %v1691_v62  ;;  %v1692_v1 = vadd.f32 %v1687_v35, %v1621_v61  ;;  %v4862_v2 = vpop.f32.mrb[23].mxu0  ;;  %v5212_v51 = vld [vmem:[%s6682_s13 + $0x28] sm:$0xff]  }
 0xf3f   :  { %v1771_v5 = vadd.f32 %v1766_v8, %v1692_v1  ;;  %v1772_v6 = vadd.f32 %v1770_v40, %v5901_v54 }
 0xf41   :  { %v1778_v7 = vsel %vm111_vm1, %v1772_v6, 0.0  ;;  %v1773_v9 = vadd.f32 %v1771_v5, %v5904_v56  ;;  %v5207_v56 = vld [vmem:[%s6682_s13] sm:$0xff]   ;;  %s6747_s13 = sld [smem:[#allocation15_spill]] }
 0xf42   :  { %1779 = vadd.xlane.f32.xlu1 %v1778_v7  ;;  %4876 = vmatpush3.bf16.msra.mxu0 %v5207_v56 }
 0xf43   :  { %v1781_v10 = vsel %vm111_vm1, %v1773_v9, 0.0  ;;  %4877 = vmatprep.subr.bf16.mxu0 %v5401_v0 }
 0xf44   :  { %1782 = vadd.xlane.f32.xlu0 %v1781_v10 }
 0xf46   :  { %4878 = vmatpush3.bf16.msra.mxu0 %v5208_v19 }
 0xf47   :  { %4883 = vmatprep.subr.bf16.mxu0 %v5401_v0 }
 0xfcf   :  { %v1780_v11 = vpop.xlane.xlu1 %1779 }
 0xfd0   :  { %v1784_v23 = vmul.f32 0.03125, %v1780_v11 }
 0xfd1   :  { %v1783_v26 = vpop.xlane.xlu0 %1782 }
 0xfd2   :  { %v1786_v13 = vsub.f32 %v1772_v6, %v1784_v23  ;;  %v1785_v14 = vmul.f32 0.03125, %v1783_v26 }
 0xfd4   :  { %v1787_v15 = vsub.f32 %v1773_v9, %v1785_v14  ;;  %v1788_v16 = vmul.f32 %v1786_v13, %v1786_v13 }
 0xfd6   :  { %v1790_v17 = vsel %vm111_vm1, %v1788_v16, 0.0  ;;  %v1789_v18 = vmul.f32 %v1787_v15, %v1787_v15  ;;  %v5213_v16 = vld [vmem:[%s6684_s17] sm:$0xff]  }
 0xfd7   :  { %1791 = vadd.xlane.f32.xlu1 %v1790_v17  ;;  %v5214_v17 = vld [vmem:[%s6684_s17 + $0x8] sm:$0xff]   ;;  %4900 = vmatpush3.bf16.msra.mxu1 %v5213_v16 }
 0xfd8   :  { %v1793_v54 = vsel %vm111_vm1, %v1789_v18, 0.0  ;;  %4901 = vmatprep.subr.bf16.mxu1 %v5401_v0 }
 0xfd9   :  { %1794 = vadd.xlane.f32.xlu0 %v1793_v54 }
 0xfdb   :  { %4902 = vmatpush3.bf16.msra.mxu1 %v5214_v17 }
 0xfdc   :  { %4907 = vmatprep.subr.bf16.mxu1 %v5401_v0 }
0x1064   :  { %v1792_v20 = vpop.xlane.xlu1 %1791 }
0x1065   :  { %v1796_v21 = vmul.f32 0.03125, %v1792_v20 }
0x1066   :  { %v1795_v22 = vpop.xlane.xlu0 %1794 }
0x1067   :  { %v1798_v24 = vadd.f32 1e-05, %v1796_v21  ;;  %v1797_v25 = vmul.f32 0.03125, %v1795_v22 }
0x1069   :  { %5325 = vrsqrt.f32 %v1798_v24  ;;  %v1799_v27 = vadd.f32 1e-05, %v1797_v25  ;;  %v4378_v24 = vld [vmem:[%s6685_s15] ss:$0 sm:$0xff] }
0x106b   :  { %5327 = vrsqrt.f32 %v1799_v27 }
0x1073   :  { %v5326_v28 = vpop.eup %5325 }
0x1074   :  { %v1802_v30 = vmul.f32 %v5326_v28, %v1786_v13  ;;  %v4379_v28 = vld [vmem:[%s6686_s16] ss:$0 sm:$0xff] }
0x1075   :  { %v5328_v31 = vpop.eup %5327 }
0x1076   :  { %v1810_v33 = vmul.f32 %v4366_v29, %v1802_v30  ;;  %v1803_v34 = vmul.f32 %v5328_v31, %v1787_v15 }
0x1078   :  { %v6039_v36 = vadd.f32 %v4367_v32, %v1810_v33  ;;  %v1811_v37 = vmul.f32 %v4366_v29, %v1803_v34 }
0x107a   :  { %v6041_v3 = vadd.f32 %v4367_v32, %v1811_v37  ;;  %v1842_v4 = vrot.slane %v6039_v36, 7  ;;  %v1968_v52 = vrot.slane %v6039_v36, 1 }
0x107c   :  { %v1843_v39 = vrot.slane %v6041_v3, 7  ;;  %v1847_v41 = vsel %vm445_vm6, 0.0, %v1842_v4  ;;  %v6067_v49 = vpack.c.bf16 %v6041_v3, %v6039_v36  ;;  %v1969_v50 = vrot.slane %v6041_v3, 1 }
0x107d   :  { %v1848_v43 = vsel %vm452_vm7, %v1847_v41, 0.0 }
0x107e   :  { %v1844_v42 = vsel %vm445_vm6, %v1842_v4, %v1843_v39  ;;  %v1970_v53 = vsel %vm573_vm8, %v1968_v52, %v1969_v50  ;;  %v1973_v55 = vsel %vm573_vm8, %v1969_v50, 0.0  ;;  %v5218_v50 = vld [vmem:[%s6684_s17 + $0x28] sm:$0xff]  }
0x107f   :  { %v1849_v44 = vsel %vm452_vm7, %v1844_v42, 0.0  ;;  %v1974_v8 = vsel %vm580_vm9, %v1970_v53, 0.0  ;;  %v1975_v12 = vsel %vm580_vm9, %v1973_v55, 0.0 }
0x1080   :  { %v1850_v46 = vpack.c.bf16 %v1849_v44, %v1848_v43  ;;  %v1976_v57 = vpack.c.bf16 %v1975_v12, %v1974_v8  ;;  %v5215_v43 = vld [vmem:[%s6684_s17 + $0x10] sm:$0xff]   ;;  %v5219_v12 = vld [vmem:[%s6732_s5 + $0x20] sm:$0xff]  }
0x1082   :  { %4880 = vmatmul.mubr.msk.bf16.vlgmr.msra.gmra.mrb[24].mxu0 %vm111_vm1, %v1850_v46  ;;  %v5217_v46 = vld [vmem:[%s6684_s17 + $0x20] sm:$0xff]  }
0x1083   :  { %4884 = vmatpush3.bf16.msra.mxu0 %v5209_v45  ;;  %4887 = vmatprep.mubr.msk.bf16.mxu0 %vm5402_vm0, %v5401_v0  ;;  %v5216_v45 = vld [vmem:[%s6684_s17 + $0x18] sm:$0xff]   ;;  %s6750_s17 = sld [smem:[#allocation18_spill]] }
0x1084   :  { %4885 = vmatprep.subr.bf16.mxu0 %v5401_v0 }
0x1087   :  { %4886 = vmatpush3.bf16.msra.mxu0 %v5210_v47 }
0x1088   :  { %4891 = vmatprep.subr.bf16.mxu0 %v5401_v0 }
0x108e   :  { %4888 = vmatmul.mubr.msk.bf16.vlgmr.msra.gmra.mrb[24].mxu0 %vm111_vm1, %v6067_v49 }
0x108f   :  { %4892 = vmatpush3.bf16.msra.mxu0 %v5211_v48  ;;  %4895 = vmatprep.mubr.msk.bf16.mxu0 %vm5402_vm0, %v5401_v0 }
0x1090   :  { %4893 = vmatprep.subr.bf16.mxu0 %v5401_v0 }
0x1093   :  { %4894 = vmatpush3.bf16.msra.mxu0 %v5212_v51 }
0x109a   :  { %4896 = vmatmul.mubr.msk.bf16.vlgmr.msra.gmra.mrb[24].mxu0 %vm111_vm1, %v1976_v57 }
0x109b   :  { %4927 = vmatprep.mubr.msk.f32.mxu0 %vm5402_vm0, %v5401_v0 }
0x116d   :  { %v2026_v59 = vpop.f32.mrb[24].mxu0 }
0x116e   :  { %v5098_v60 = vadd.f32 %v4368_v58, %v2026_v59  ;;  %v4897_v61 = vpop.f32.mrb[25].mxu0 }
0x116f   :  { %v2029_v62 = vpop.f32.mrb[26].mxu0 }
0x1170   :  { %v2035_v63 = vmax.f32 %v5098_v60, 0.0  ;;  %v5099_v35 = vadd.f32 %v4368_v58, %v2029_v62  ;;  %v4898_v40 = vpop.f32.mrb[27].mxu0  ;;  %v5220_v58 = vld [vmem:[%s6732_s5 + $0x28] sm:$0xff]  }
0x1172   :  { %v2036_v1 = vmax.f32 %v5099_v35, 0.0  ;;  %v2039_v2 = vsel %vm111_vm1, %v2035_v63, 0.0 }
0x1173   :  { %2040 = vadd.xlane.f32.xlu1 %v2039_v2 }
0x1174   :  { %v2042_v5 = vsel %vm111_vm1, %v2036_v1, 0.0 }
0x1175   :  { %2043 = vadd.xlane.f32.xlu0 %v2042_v5 }
0x1200   :  { %v2041_v6 = vpop.xlane.xlu1 %2040 }
0x1201   :  { %v2045_v7 = vmul.f32 0.03125, %v2041_v6 }
0x1202   :  { %v2044_v9 = vpop.xlane.xlu0 %2043 }
0x1203   :  { %v2047_v10 = vsub.f32 %v2035_v63, %v2045_v7  ;;  %v2046_v11 = vmul.f32 0.03125, %v2044_v9  ;;  %v4400_v63 = vld [vmem:[%s6734_s10 + $0x2] ss:$0 sm:$0xff] }
0x1205   :  { %v2048_v23 = vsub.f32 %v2036_v1, %v2046_v11  ;;  %v2049_v26 = vmul.f32 %v2047_v10, %v2047_v10 }
0x1207   :  { %v2051_v13 = vsel %vm111_vm1, %v2049_v26, 0.0  ;;  %v2050_v14 = vmul.f32 %v2048_v23, %v2048_v23  ;;  %v4380_v26 = vld [vmem:[%s6687_s18] ss:$0 sm:$0xff] }
0x1208   :  { %2052 = vadd.xlane.f32.xlu1 %v2051_v13 }
0x1209   :  { %v2054_v15 = vsel %vm111_vm1, %v2050_v14, 0.0 }
0x120a   :  { %2055 = vadd.xlane.f32.xlu0 %v2054_v15 }
0x1295   :  { %v2053_v18 = vpop.xlane.xlu1 %2052 }
0x1296   :  { %v2057_v54 = vmul.f32 0.03125, %v2053_v18 }
0x1297   :  { %v2056_v56 = vpop.xlane.xlu0 %2055 }
0x1298   :  { %v2059_v19 = vadd.f32 1e-05, %v2057_v54  ;;  %v2058_v20 = vmul.f32 0.03125, %v2056_v56 }
0x129a   :  { %5329 = vrsqrt.f32 %v2059_v19  ;;  %v2060_v21 = vadd.f32 1e-05, %v2058_v20 }
0x129c   :  { %5331 = vrsqrt.f32 %v2060_v21 }
0x12a4   :  { %v5330_v22 = vpop.eup %5329 }
0x12a5   :  { %v2063_v25 = vmul.f32 %v5330_v22, %v2047_v10 }
0x12a6   :  { %v5332_v27 = vpop.eup %5331 }
0x12a7   :  { %v2071_v29 = vmul.f32 %v4378_v24, %v2063_v25  ;;  %v2064_v30 = vmul.f32 %v5332_v27, %v2048_v23 }
0x12a9   :  { %v2079_v31 = vadd.f32 %v4379_v28, %v2071_v29  ;;  %v2072_v32 = vmul.f32 %v4378_v24, %v2064_v30 }
0x12ab   :  { %v2080_v33 = vadd.f32 %v4379_v28, %v2072_v32  ;;  %v2103_v34 = vrot.slane %v2079_v31, 7  ;;  %v2229_v51 = vrot.slane %v2079_v31, 1 }
0x12ad   :  { %v2104_v37 = vrot.slane %v2080_v33, 7  ;;  %v2108_v4 = vsel %vm445_vm6, 0.0, %v2103_v34  ;;  %v2170_v47 = vpack.c.bf16 %v2080_v33, %v2079_v31  ;;  %v2230_v48 = vrot.slane %v2080_v33, 1 }
0x12ae   :  { %v2109_v41 = vsel %vm452_vm7, %v2108_v4, 0.0 }
0x12af   :  { %v2105_v39 = vsel %vm445_vm6, %v2103_v34, %v2104_v37  ;;  %v2231_v52 = vsel %vm573_vm8, %v2229_v51, %v2230_v48  ;;  %v2234_v53 = vsel %vm573_vm8, %v2230_v48, 0.0 }
0x12b0   :  { %v2110_v42 = vsel %vm452_vm7, %v2105_v39, 0.0  ;;  %v2235_v55 = vsel %vm580_vm9, %v2231_v52, 0.0  ;;  %v2236_v8 = vsel %vm580_vm9, %v2234_v53, 0.0 }
0x12b1   :  { %v2111_v44 = vpack.c.bf16 %v2110_v42, %v2109_v41  ;;  %v2237_v57 = vpack.c.bf16 %v2236_v8, %v2235_v55 }
0x12b3   :  { %4904 = vmatmul.mubr.msk.bf16.vlgmr.msra.gmra.mrb[24].mxu1 %vm111_vm1, %v2111_v44 }
0x12b4   :  { %4908 = vmatpush3.bf16.msra.mxu1 %v5215_v43  ;;  %4911 = vmatprep.mubr.msk.bf16.mxu1 %vm5402_vm0, %v5401_v0 }
0x12b5   :  { %4909 = vmatprep.subr.bf16.mxu1 %v5401_v0 }
0x12b8   :  { %4910 = vmatpush3.bf16.msra.mxu1 %v5216_v45 }
0x12b9   :  { %4915 = vmatprep.subr.bf16.mxu1 %v5401_v0 }
0x12bf   :  { %4912 = vmatmul.mubr.msk.bf16.vlgmr.msra.gmra.mrb[24].mxu1 %vm111_vm1, %v2170_v47 }
0x12c0   :  { %4916 = vmatpush3.bf16.msra.mxu1 %v5217_v46  ;;  %4919 = vmatprep.mubr.msk.bf16.mxu1 %vm5402_vm0, %v5401_v0 }
0x12c1   :  { %4917 = vmatprep.subr.bf16.mxu1 %v5401_v0 }
0x12c4   :  { %4918 = vmatpush3.bf16.msra.mxu1 %v5218_v50 }
0x12c5   :  { %4930 = vmatprep.subr.bf16.mxu1 %v5401_v0 }
0x12cb   :  { %4920 = vmatmul.mubr.msk.bf16.vlgmr.msra.gmra.mrb[24].mxu1 %vm111_vm1, %v2237_v57 }
0x12cc   :  { %4931 = vmatpush3.bf16.msra.mxu1 %v5219_v12  ;;  %4934 = vmatprep.mubr.msk.bf16.mxu1 %vm5402_vm0, %v5401_v0 }
0x12cd   :  { %4932 = vmatprep.subr.bf16.mxu1 %v5401_v0 }
0x12d0   :  { %4933 = vmatpush3.bf16.msra.mxu1 %v5220_v58 }
0x12d1   :  { %4946 = vmatprep.subr.bf16.mxu1 %v5401_v0 }
0x12d3   :  { %4935 = vmatmul.mubr.msk.bf16.vlgmr.msra.gmra.mrb[28].mxu1 %vm111_vm1, %v6067_v49 }
0x12d4   :  { %4950 = vmatprep.mubr.msk.bf16.mxu1 %vm5402_vm0, %v5401_v0 }
0x139e   :  { %v2287_v59 = vpop.f32.mrb[24].mxu1 }
0x139f   :  { %v4921_v60 = vpop.f32.mrb[25].mxu1  ;;  %v5100_v13 = vadd.f32 %v4380_v26, %v2287_v59 }
0x13a0   :  { %v2290_v61 = vpop.f32.mrb[26].mxu1 }
0x13a1   :  { %v4922_v62 = vpop.f32.mrb[27].mxu1  ;;  %v2296_v14 = vmax.f32 %v5100_v13, 0.0  ;;  %v5101_v17 = vadd.f32 %v4380_v26, %v2290_v61 }
0x13a3   :  { %v2300_v15 = vsel %vm111_vm1, %v2296_v14, 0.0  ;;  %v2297_v54 = vmax.f32 %v5101_v17, 0.0 }
0x13a5   :  { %v2303_v19 = vsel %vm111_vm1, %v2297_v54, 0.0 }
0x13a6   :  { %v2493_v35 = vpop.f32.mrb[28].mxu1 }
0x13a7   :  { %v6161_v40 = vadd.f32 %v4400_v63, %v2493_v35  ;;  %v4936_v1 = vpop.f32.mrb[29].mxu1 }
0x13a8   :  { %v2496_v2 = vpop.f32.mrb[30].mxu1 }
0x13a9   :  { %v6163_v5 = vadd.f32 %v4400_v63, %v2496_v2  ;;  %2502 = vrot.lane.b32.xlu1 %v6161_v40, %s6743_s4  ;;  %v4937_v49 = vpop.f32.mrb[31].mxu1 }
0x13ab   :  { %2504 = vrot.lane.b32.xlu0 %v6163_v5, %s6743_s4 }
0x141b   :  { %v2503_v6 = vpop.permute.xlu1 %2502 }
0x141c   :  { %v2508_v7 = vmul.f32 %v2503_v6, %v6161_v40  ;;  %v2539_v9 = vmul.f32 %v2503_v6, %v6163_v5 }
0x141d   :  { %v2505_v10 = vpop.permute.xlu0 %2504 }
0x141e   :  { %2572 = vrot.lane.b32.xlu1 %v2508_v7, %s6744_s29  ;;  %2609 = vrot.lane.b32.xlu0 %v2539_v9, %s6744_s29  ;;  %v2509_v11 = vmul.f32 %v2505_v10, %v6161_v40  ;;  %v2540_v23 = vmul.f32 %v2505_v10, %v6163_v5  ;;  %v2510_v16 = vsel %vm166_vm2, %v2508_v7, 0.0  ;;  %v2541_v20 = vsel %vm166_vm2, %v2539_v9, 0.0 }
0x1420   :  { %v2513_v18 = vsel %vm166_vm2, %v2509_v11, 0.0  ;;  %v2544_v56 = vsel %vm166_vm2, %v2540_v23, 0.0 }
0x1422   :  { %2574 = vrot.lane.b32.xlu1 %v2509_v11, %s6744_s29 }
0x1426   :  { %2611 = vrot.lane.b32.xlu1 %v2540_v23, %s6744_s29 }
0x143d   :  { %2301 = vadd.xlane.f32.xlu0 %v2300_v15 }
0x1441   :  { %2511 = vadd.xlane.f32.xlu0 %v2510_v16 }
0x1445   :  { %2514 = vadd.xlane.f32.xlu0 %v2513_v18 }
0x1449   :  { %2545 = vadd.xlane.f32.xlu0 %v2544_v56  ;;  %v5406_v56 = vmov 0.0|0.0  }
0x144a   :  { %2304 = vadd.xlane.f32.xlu1 %v2303_v19  ;;  %5090 = vmatprep.subr.bf16.mxu0 %v5406_v56  ;;  %v4391_v56 = vld [vmem:[%s6689_s20] ss:$0 sm:$0xff] }
0x144e   :  { %2542 = vadd.xlane.f32.xlu1 %v2541_v20 }
0x1490   :  { %v2573_v21 = vpop.permute.xlu1 %2572  ;;  %v2610_v24 = vpop.permute.xlu0 %2609 }
0x1491   :  { %v2578_v22 = vsel %vm166_vm2, %v2573_v21, 0.0  ;;  %v2615_v28 = vsel %vm166_vm2, %v2610_v24, 0.0 }
0x1492   :  { %2579 = vadd.xlane.f32.xlu1 %v2578_v22 }
0x1494   :  { %v2575_v25 = vpop.permute.xlu1 %2574 }
0x1495   :  { %v2581_v27 = vsel %vm166_vm2, %v2575_v25, 0.0 }
0x1496   :  { %2582 = vadd.xlane.f32.xlu0 %v2581_v27  ;;  %2616 = vadd.xlane.f32.xlu1 %v2615_v28 }
0x1498   :  { %v2612_v29 = vpop.permute.xlu1 %2611 }
0x1499   :  { %v2618_v30 = vsel %vm166_vm2, %v2612_v29, 0.0 }
0x149a   :  { %2619 = vadd.xlane.f32.xlu0 %v2618_v30 }
0x14ca   :  { %v2302_v31 = vpop.xlane.xlu0 %2301 }
0x14cb   :  { %v2306_v32 = vmul.f32 0.03125, %v2302_v31 }
0x14cd   :  { %v6190_v33 = vsub.f32 %v2296_v14, %v2306_v32 }
0x14ce   :  { %v2512_v34 = vpop.xlane.xlu0 %2511 }
0x14cf   :  { %v2310_v37 = vmul.f32 %v6190_v33, %v6190_v33  ;;  %v2516_v41 = vmul.f32 0.25, %v2512_v34 }
0x14d1   :  { %v2312_v4 = vsel %vm111_vm1, %v2310_v37, 0.0 }
0x14d2   :  { %v2515_v39 = vpop.xlane.xlu0 %2514  ;;  %2313 = vadd.xlane.f32.xlu1 %v2312_v4 }
0x14d3   :  { %v2517_v42 = vmul.f32 0.25, %v2515_v39 }
0x14d5   :  { %v2518_v43 = vmax.f32 %v2516_v41, %v2517_v42 }
0x14d6   :  { %v2546_v51 = vpop.xlane.xlu0 %2545 }
0x14d7   :  { %v2519_v44 = vsub.f32 %v2516_v41, %v2518_v43  ;;  %v2520_v45 = vsub.f32 %v2517_v42, %v2518_v43  ;;  %v2305_v46 = vpop.xlane.xlu1 %2304  ;;  %v2548_v55 = vmul.f32 0.25, %v2546_v51 }
0x14d8   :  { %v2307_v47 = vmul.f32 0.03125, %v2305_v46 }
0x14d9   :  { %v2521_v48 = vmul.f32 1.442695, %v2519_v44  ;;  %v2523_v50 = vmul.f32 1.442695, %v2520_v45 }
0x14da   :  { %v6195_v52 = vsub.f32 %v2297_v54, %v2307_v47 }
0x14db   :  { %5333 = vpow2.f32 %v2521_v48  ;;  %v2543_v53 = vpop.xlane.xlu1 %2542 }
0x14dc   :  { %5335 = vpow2.f32 %v2523_v50  ;;  %v2547_v8 = vmul.f32 0.25, %v2543_v53  ;;  %v2311_v12 = vmul.f32 %v6195_v52, %v6195_v52 }
0x14de   :  { %v2549_v57 = vmax.f32 %v2547_v8, %v2548_v55  ;;  %v2315_v58 = vsel %vm111_vm1, %v2311_v12, 0.0 }
0x14df   :  { %2316 = vadd.xlane.f32.xlu0 %v2315_v58 }
0x14e0   :  { %v2550_v59 = vsub.f32 %v2547_v8, %v2549_v57  ;;  %v2551_v60 = vsub.f32 %v2548_v55, %v2549_v57 }
0x14e2   :  { %v2552_v61 = vmul.f32 1.442695, %v2550_v59  ;;  %v2554_v62 = vmul.f32 1.442695, %v2551_v60 }
0x14e4   :  { %5337 = vpow2.f32 %v2552_v61 }
0x14e5   :  { %v5334_v63 = vpop.eup %5333  ;;  %5339 = vpow2.f32 %v2554_v62 }
0x14e6   :  { %v5336_v35 = vpop.eup %5335 }
0x14e7   :  { %v2525_v1 = vadd.f32 %v5336_v35, %v5334_v63 }
0x14e9   :  { %5341 = vrcp.f32 %v2525_v1 }
0x14ee   :  { %v5338_v2 = vpop.eup %5337 }
0x14ef   :  { %v5340_v49 = vpop.eup %5339 }
0x14f0   :  { %v2556_v6 = vadd.f32 %v5340_v49, %v5338_v2 }
0x14f2   :  { %5343 = vrcp.f32 %v2556_v6 }
0x14f3   :  { %v5342_v7 = vpop.eup %5341 }
0x14f4   :  { %v2527_v9 = vmul.f32 %v5342_v7, %v5334_v63  ;;  %v2528_v10 = vmul.f32 %v5342_v7, %v5336_v35 }
0x14f6   :  { %v2529_v11 = vmul.f32 %v2527_v9, %v6161_v40  ;;  %v2530_v23 = vmul.f32 %v2528_v10, %v6163_v5 }
0x14f8   :  { %v2531_v26 = vsel %vm188_vm3, %v2529_v11, 0.0  ;;  %v2532_v13 = vsel %vm188_vm3, %v2530_v23, 0.0 }
0x14f9   :  { %v2533_v14 = vadd.f32 %v2532_v13, %v2531_v26 }
0x14fb   :  { %2535 = vrot.lane.b32.xlu1 %v2533_v14, %s6745_s7 }
0x14fc   :  { %v5344_v15 = vpop.eup %5343 }
0x14fd   :  { %v2558_v16 = vmul.f32 %v5344_v15, %v5338_v2  ;;  %v2559_v17 = vmul.f32 %v5344_v15, %v5340_v49 }
0x14ff   :  { %v2560_v18 = vmul.f32 %v2558_v16, %v6161_v40  ;;  %v2561_v54 = vmul.f32 %v2559_v17, %v6163_v5  ;;  %v4390_v16 = vld [vmem:[%s6688_s19] ss:$0 sm:$0xff]  ;;  %s6746_s19 = sld [smem:[#allocation12_spill]] }
0x1501   :  { %v2562_v19 = vsel %vm188_vm3, %v2560_v18, 0.0  ;;  %v2563_v20 = vsel %vm188_vm3, %v2561_v54, 0.0 }
0x1502   :  { %v2564_v21 = vadd.f32 %v2563_v20, %v2562_v19 }
0x1504   :  { %2566 = vrot.lane.b32.xlu0 %v2564_v21, %s6745_s7 }
0x151f   :  { %v2580_v22 = vpop.xlane.xlu1 %2579 }
0x1520   :  { %v2584_v25 = vmul.f32 0.25, %v2580_v22 }
0x1523   :  { %v2583_v24 = vpop.xlane.xlu0 %2582  ;;  %v2617_v28 = vpop.xlane.xlu1 %2616 }
0x1524   :  { %v2585_v27 = vmul.f32 0.25, %v2583_v24  ;;  %v2621_v34 = vmul.f32 0.25, %v2617_v28  ;;  %v5222_v24 = vld [vmem:[%s6735_s6 + $0x28] sm:$0xff]  }
0x1526   :  { %v2586_v29 = vmax.f32 %v2584_v25, %v2585_v27 }
0x1527   :  { %v2620_v30 = vpop.xlane.xlu0 %2619 }
0x1528   :  { %v2587_v31 = vsub.f32 %v2584_v25, %v2586_v29  ;;  %v2588_v32 = vsub.f32 %v2585_v27, %v2586_v29  ;;  %v2622_v37 = vmul.f32 0.25, %v2620_v30 }
0x152a   :  { %v2589_v4 = vmul.f32 1.442695, %v2587_v31  ;;  %v2591_v39 = vmul.f32 1.442695, %v2588_v32  ;;  %v2623_v41 = vmax.f32 %v2621_v34, %v2622_v37 }
0x152c   :  { %5345 = vpow2.f32 %v2589_v4  ;;  %v2624_v42 = vsub.f32 %v2621_v34, %v2623_v41  ;;  %v2625_v43 = vsub.f32 %v2622_v37, %v2623_v41  ;;  %v4409_v34 = vld [vmem:[%s6736_s30 + $0x2] ss:$0 sm:$0xff] }
0x152d   :  { %5347 = vpow2.f32 %v2591_v39 }
0x152e   :  { %v2626_v44 = vmul.f32 1.442695, %v2624_v42  ;;  %v2628_v45 = vmul.f32 1.442695, %v2625_v43 }
0x1530   :  { %5349 = vpow2.f32 %v2626_v44 }
0x1531   :  { %5351 = vpow2.f32 %v2628_v45 }
0x1536   :  { %v5346_v46 = vpop.eup %5345 }
0x1537   :  { %v5348_v47 = vpop.eup %5347 }
0x1538   :  { %v2593_v48 = vadd.f32 %v5348_v47, %v5346_v46 }
0x153a   :  { %v5350_v50 = vpop.eup %5349  ;;  %5353 = vrcp.f32 %v2593_v48 }
0x153b   :  { %v5352_v51 = vpop.eup %5351 }
0x153c   :  { %v2630_v53 = vadd.f32 %v5352_v51, %v5350_v50 }
0x153e   :  { %5355 = vrcp.f32 %v2630_v53 }
0x1544   :  { %v5354_v55 = vpop.eup %5353 }
0x1545   :  { %v2595_v8 = vmul.f32 %v5354_v55, %v5346_v46  ;;  %v2596_v12 = vmul.f32 %v5354_v55, %v5348_v47 }
0x1547   :  { %v2597_v57 = vmul.f32 %v2595_v8, %v6161_v40  ;;  %v2598_v58 = vmul.f32 %v2596_v12, %v6163_v5 }
0x1548   :  { %v5356_v59 = vpop.eup %5355 }
0x1549   :  { %v2599_v60 = vsel %vm257_vm4, %v2597_v57, 0.0  ;;  %v2600_v61 = vsel %vm257_vm4, %v2598_v58, 0.0  ;;  %v2632_v62 = vmul.f32 %v5356_v59, %v5350_v50  ;;  %v2633_v63 = vmul.f32 %v5356_v59, %v5352_v51  ;;  %v5224_v59 = vld [vmem:[%s6737_s3 + $0x68] sm:$0xff]  }
0x154a   :  { %v2601_v35 = vadd.f32 %v2600_v61, %v2599_v60  ;;  %v5229_v60 = vld [vmem:[%s6738_s8 + $0xc0] sm:$0xff]  }
0x154b   :  { %v2634_v1 = vmul.f32 %v2632_v62, %v6161_v40  ;;  %v2635_v2 = vmul.f32 %v2633_v63, %v6163_v5 }
0x154c   :  { %2603 = vrot.lane.b32.xlu1 %v2601_v35, %s6745_s7 }
0x154d   :  { %v2636_v49 = vsel %vm257_vm4, %v2634_v1, 0.0  ;;  %v2637_v6 = vsel %vm257_vm4, %v2635_v2, 0.0 }
0x154e   :  { %v2638_v7 = vadd.f32 %v2637_v6, %v2636_v49  ;;  %v4415_v6 = vld [vmem:[%s6739_s28 + $0x2] ss:$0 sm:$0xff] }
0x1550   :  { %2640 = vrot.lane.b32.xlu1 %v2638_v7, %s6745_s7 }
0x155f   :  { %v2314_v9 = vpop.xlane.xlu1 %2313 }
0x1560   :  { %v2318_v10 = vmul.f32 0.03125, %v2314_v9  ;;  %v4416_v9 = vld [vmem:[%s6746_s19 + $0x2] ss:$0 sm:$0xff] }
0x1562   :  { %v2320_v11 = vadd.f32 1e-05, %v2318_v10 }
0x1564   :  { %5357 = vrsqrt.f32 %v2320_v11 }
0x156c   :  { %v2317_v23 = vpop.xlane.xlu0 %2316 }
0x156d   :  { %v2319_v26 = vmul.f32 0.03125, %v2317_v23  ;;  %v2536_v13 = vpop.permute.xlu1 %2535 }
0x156e   :  { %2538 = vst.msk [vmem:[#allocation2] sm:$0xff] %vm166_vm2, %v2536_v13  ;;  %v5358_v5 = vpop.eup %5357 }
0x156f   :  { %v2321_v40 = vadd.f32 1e-05, %v2319_v26  ;;  %v2324_v15 = vmul.f32 %v5358_v5, %v6190_v33  ;;  %v2342_v33 = vld [vmem:[%s6690_s21] sm:$0x1] }
0x1571   :  { %5359 = vrsqrt.f32 %v2321_v40  ;;  %v2332_v18 = vmul.f32 %v4390_v16, %v2324_v15 }
0x1573   :  { %v2340_v20 = vadd.f32 %v4391_v56, %v2332_v18 }
0x1576   :  { %v2567_v14 = vpop.permute.xlu0 %2566 }
0x1577   :  { %2569 = vst.msk [vmem:[#allocation2 + $0x8] sm:$0xff] %vm166_vm2, %v2567_v14 }
0x157b   :  { %v5360_v17 = vpop.eup %5359 }
0x157c   :  { %v2325_v54 = vmul.f32 %v5360_v17, %v6195_v52  ;;  %v5221_v52 = vld [vmem:[%s6735_s6 + $0x20] sm:$0xff]  }
0x157e   :  { %v2333_v19 = vmul.f32 %v4390_v16, %v2325_v54  ;;  %v5225_v54 = vld [vmem:[%s6737_s3 + $0x70] sm:$0xff]  }
0x1580   :  { %v2341_v21 = vadd.f32 %v4391_v56, %v2333_v19  ;;  %v5226_v19 = vld [vmem:[%s6737_s3 + $0x78] sm:$0xff]  }
0x1582   :  { %v5091_v22 = vpack.c.bf16 %v2341_v21, %v2340_v20  ;;  %v5227_v20 = vld [vmem:[%s6737_s3 + $0x80] sm:$0xff]  }
0x1584   :  { %5093 = vmatpush3.bf16.xpose.msk.msra.mxu0 %vm5092_vm11, %v5091_v22 }
0x1585   :  { %4938 = vmatprep.subr.bf16.mxu0 %v5401_v0 }
0x158b   :  { %4928 = vmatmul.mubr.msk.f32.vlgmr.msra.gmra.mrb[28].mxu0 %vm111_vm1, %v2342_v33  ;;  %v5228_v33 = vld [vmem:[%s6737_s3 + $0x88] sm:$0xff]  }
0x158c   :  { %4939 = vmatpush3.bf16.msra.mxu0 %v5221_v52  ;;  %4942 = vmatprep.mubr.msk.bf16.mxu0 %vm5402_vm0, %v5401_v0 }
0x158d   :  { %4940 = vmatprep.subr.bf16.mxu0 %v5401_v0 }
0x1590   :  { %4941 = vmatpush3.bf16.msra.mxu0 %v5222_v24 }
0x1591   :  { %4970 = vmatprep.subr.bf16.mxu0 %v5401_v0 }
0x15be   :  { %v2604_v25 = vpop.permute.xlu1 %2603 }
0x15bf   :  { %2606 = vst.msk [vmem:[#allocation2] sm:$0xff] %vm265_vm5, %v2604_v25 }
0x15c2   :  { %v2641_v27 = vpop.permute.xlu1 %2640 }
0x15c3   :  { %2643 = vst.msk [vmem:[#allocation2 + $0x8] sm:$0xff] %vm265_vm5, %v2641_v27 }
0x15c6   :  { %v2644_v28 = vld [vmem:[#allocation2] sm:$0xff] }
0x15ca   :  { %v2645_v29 = vld [vmem:[#allocation2 + $0x8] sm:$0xff] }
0x15cb   :  { %v2646_v30 = vpack.c.bf16 %v2645_v29, %v2644_v28  ;;  %v5230_v29 = vld [vmem:[%s6738_s8 + $0x100] sm:$0xff]  }
0x15cd   :  { %4943 = vmatmul.mubr.msk.bf16.vlgmr.msra.gmra.mrb[32].mxu0 %vm111_vm1, %v2646_v30 }
0x15ce   :  { %4978 = vmatprep.mubr.msk.bf16.mxu0 %vm5402_vm0, %v5401_v0  ;;  %4971 = vmatpush3.bf16.msra.mxu0 %v5229_v60 }
0x15cf   :  { %4972 = vmatprep.subr.bf16.mxu0 %v5401_v0 }
0x165e   :  { %v6252_v31 = vpop.f32.mrb[28].mxu0 }
0x165f   :  { %v4929_v32 = vpop.f32.mrb[29].mxu0 }
0x1660   :  { %v5231_v32 = vld [vmem:[%s6738_s8 + $0xc8] sm:$0xff]  }
0x1661   :  { %4973 = vmatpush3.bf16.msra.mxu0 %v5231_v32 }
0x1662   :  { %4974 = vmatprep.subr.bf16.mxu0 %v5401_v0 }
0x16a0   :  { %v2709_v37 = vpop.f32.mrb[32].mxu0 }
0x16a1   :  { %v2710_v4 = vadd.f32 %v4409_v34, %v2709_v37  ;;  %v4944_v39 = vpop.f32.mrb[33].mxu0  ;;  %v5233_v37 = vld [vmem:[%s6738_s8 + $0xd0] sm:$0xff]  }
0x16a2   :  { %v2712_v41 = vpop.f32.mrb[34].mxu0  ;;  %4975 = vmatpush3.bf16.msra.mxu0 %v5233_v37  ;;  %v5235_v39 = vld [vmem:[%s6738_s8 + $0xd8] sm:$0xff]  }
0x16a3   :  { %v2713_v42 = vadd.f32 %v4409_v34, %v2712_v41  ;;  %v4945_v43 = vpop.f32.mrb[35].mxu0  ;;  %v2716_v44 = vadd.f32 %v2710_v4, %v6039_v36  ;;  %v5232_v34 = vld [vmem:[%s6738_s8 + $0x108] sm:$0xff]   ;;  %v5234_v4 = vld [vmem:[%s6738_s8 + $0x110] sm:$0xff]   ;;  %4976 = vmatprep.subr.bf16.mxu0 %v5401_v0  ;;  %v5236_v41 = vld [vmem:[%s6738_s8 + $0x118] sm:$0xff]  }
0x16a5   :  { %v2722_v45 = vsel %vm111_vm1, %v2716_v44, 0.0  ;;  %v2717_v46 = vadd.f32 %v2713_v42, %v6041_v3  ;;  %v5223_v3 = vld [vmem:[%s6737_s3 + $0x60] sm:$0xff]  }
0x16a6   :  { %2723 = vadd.xlane.f32.xlu0 %v2722_v45  ;;  %4947 = vmatpush3.bf16.msra.mxu1 %v5223_v3  ;;  %v4430_v42 = vld [vmem:[%s6741_s0 + $0x2] ss:$0 sm:$0xff] }
0x16a7   :  { %v2725_v47 = vsel %vm111_vm1, %v2717_v46, 0.0  ;;  %4948 = vmatprep.subr.bf16.mxu1 %v5401_v0  ;;  %4977 = vmatpush3.bf16.msra.mxu0 %v5235_v39 }
0x16a8   :  { %2726 = vadd.xlane.f32.xlu1 %v2725_v47  ;;  %4982 = vmatprep.subr.bf16.mxu0 %v5401_v0 }
0x16aa   :  { %4949 = vmatpush3.bf16.msra.mxu1 %v5224_v59 }
0x16ab   :  { %4954 = vmatprep.subr.bf16.mxu1 %v5401_v0 }
0x1733   :  { %v2724_v48 = vpop.xlane.xlu0 %2723 }
0x1734   :  { %v2728_v50 = vmul.f32 0.03125, %v2724_v48 }
0x1735   :  { %v2727_v51 = vpop.xlane.xlu1 %2726 }
0x1736   :  { %v2730_v53 = vsub.f32 %v2716_v44, %v2728_v50  ;;  %v2729_v55 = vmul.f32 0.03125, %v2727_v51 }
0x1738   :  { %v2731_v8 = vsub.f32 %v2717_v46, %v2729_v55  ;;  %v2732_v12 = vmul.f32 %v2730_v53, %v2730_v53 }
0x173a   :  { %v2734_v57 = vsel %vm111_vm1, %v2732_v12, 0.0  ;;  %v2733_v58 = vmul.f32 %v2731_v8, %v2731_v8 }
0x173b   :  { %2735 = vadd.xlane.f32.xlu0 %v2734_v57 }
0x173c   :  { %v2737_v36 = vsel %vm111_vm1, %v2733_v58, 0.0 }
0x173f   :  { %2738 = vadd.xlane.f32.xlu0 %v2737_v36 }
0x17c8   :  { %v2736_v61 = vpop.xlane.xlu0 %2735 }
0x17c9   :  { %v2740_v62 = vmul.f32 0.03125, %v2736_v61 }
0x17cb   :  { %v2742_v63 = vadd.f32 1e-05, %v2740_v62 }
0x17cc   :  { %v2739_v35 = vpop.xlane.xlu0 %2738 }
0x17cd   :  { %5361 = vrsqrt.f32 %v2742_v63  ;;  %v2741_v1 = vmul.f32 0.03125, %v2739_v35  ;;  %v5237_v35 = vld [vmem:[%s6738_s8 + $0xe0] sm:$0xff]  }
0x17cf   :  { %v2743_v2 = vadd.f32 1e-05, %v2741_v1 }
0x17d1   :  { %5363 = vrsqrt.f32 %v2743_v2 }
0x17d7   :  { %v5362_v49 = vpop.eup %5361 }
0x17d8   :  { %v2746_v7 = vmul.f32 %v5362_v49, %v2730_v53  ;;  %v5238_v49 = vld [vmem:[%s6738_s8 + $0xe8] sm:$0xff]  }
0x17da   :  { %v2754_v10 = vmul.f32 %v4415_v6, %v2746_v7  ;;  %v5240_v7 = vld [vmem:[%s6738_s8 + $0xf8] sm:$0xff]  }
0x17db   :  { %v5364_v11 = vpop.eup %5363 }
0x17dc   :  { %v6281_v23 = vadd.f32 %v4416_v9, %v2754_v10  ;;  %v2747_v26 = vmul.f32 %v5364_v11, %v2731_v8 }
0x17de   :  { %v2755_v13 = vmul.f32 %v4415_v6, %v2747_v26  ;;  %v2788_v40 = vrot.slane %v6281_v23, 7  ;;  %v2914_v52 = vrot.slane %v6281_v23, 1  ;;  %v5239_v6 = vld [vmem:[%s6738_s8 + $0xf0] sm:$0xff]  }
0x17e0   :  { %v6284_v5 = vadd.f32 %v4416_v9, %v2755_v13  ;;  %v2793_v15 = vsel %vm445_vm6, 0.0, %v2788_v40 }
0x17e1   :  { %v2794_v17 = vsel %vm452_vm7, %v2793_v15, 0.0 }
0x17e2   :  { %v2789_v14 = vrot.slane %v6284_v5, 7  ;;  %v2855_v21 = vpack.c.bf16 %v6284_v5, %v6281_v23  ;;  %v2915_v22 = vrot.slane %v6284_v5, 1 }
0x17e4   :  { %v2790_v16 = vsel %vm445_vm6, %v2788_v40, %v2789_v14  ;;  %v2916_v24 = vsel %vm573_vm8, %v2914_v52, %v2915_v22  ;;  %v2919_v25 = vsel %vm573_vm8, %v2915_v22, 0.0 }
0x17e5   :  { %v2795_v18 = vsel %vm452_vm7, %v2790_v16, 0.0  ;;  %v2920_v27 = vsel %vm580_vm9, %v2916_v24, 0.0  ;;  %v2921_v28 = vsel %vm580_vm9, %v2919_v25, 0.0  ;;  %v4465_v16 = vld [vmem:[%s6742_s2 + $0x2] ss:$0 sm:$0xff] }
0x17e6   :  { %v2796_v56 = vpack.c.bf16 %v2795_v18, %v2794_v17  ;;  %v2922_v30 = vpack.c.bf16 %v2921_v28, %v2920_v27 }
0x17e8   :  { %4951 = vmatmul.mubr.msk.bf16.vlgmr.msra.gmra.mrb[32].mxu1 %vm111_vm1, %v2796_v56 }
0x17e9   :  { %4955 = vmatpush3.bf16.msra.mxu1 %v5225_v54  ;;  %4958 = vmatprep.mubr.msk.bf16.mxu1 %vm5402_vm0, %v5401_v0 }
0x17ea   :  { %4956 = vmatprep.subr.bf16.mxu1 %v5401_v0 }
0x17ed   :  { %4957 = vmatpush3.bf16.msra.mxu1 %v5226_v19 }
0x17ee   :  { %4962 = vmatprep.subr.bf16.mxu1 %v5401_v0 }
0x17f4   :  { %4959 = vmatmul.mubr.msk.bf16.vlgmr.msra.gmra.mrb[32].mxu1 %vm111_vm1, %v2855_v21 }
0x17f5   :  { %4963 = vmatpush3.bf16.msra.mxu1 %v5227_v20  ;;  %4966 = vmatprep.mubr.msk.bf16.mxu1 %vm5402_vm0, %v5401_v0 }
0x17f6   :  { %4964 = vmatprep.subr.bf16.mxu1 %v5401_v0 }
0x17f9   :  { %4965 = vmatpush3.bf16.msra.mxu1 %v5228_v33 }
0x17fa   :  { %4994 = vmatprep.subr.bf16.mxu1 %v5401_v0 }
0x1800   :  { %4967 = vmatmul.mubr.msk.bf16.vlgmr.msra.gmra.mrb[32].mxu1 %vm111_vm1, %v2922_v30 }
0x1801   :  { %4995 = vmatpush3.bf16.msra.mxu1 %v5230_v29  ;;  %5002 = vmatprep.mubr.msk.bf16.mxu1 %vm5402_vm0, %v5401_v0 }
0x1802   :  { %4996 = vmatprep.subr.bf16.mxu1 %v5401_v0 }
0x1805   :  { %4997 = vmatpush3.bf16.msra.mxu1 %v5232_v34 }
0x1806   :  { %4998 = vmatprep.subr.bf16.mxu1 %v5401_v0 }
0x1809   :  { %4999 = vmatpush3.bf16.msra.mxu1 %v5234_v4 }
0x180a   :  { %5000 = vmatprep.subr.bf16.mxu1 %v5401_v0 }
0x180d   :  { %5001 = vmatpush3.bf16.msra.mxu1 %v5236_v41 }
0x180e   :  { %5014 = vmatprep.subr.bf16.mxu1 %v5401_v0 }
0x18d3   :  { %v2972_v43 = vpop.f32.mrb[32].mxu1 }
0x18d4   :  { %v5102_v44 = vadd.f32 %v4430_v42, %v2972_v43  ;;  %v4968_v45 = vpop.f32.mrb[33].mxu1  ;;  %v5242_v43 = vld [vmem:[%s6732_s5 + $0x38] sm:$0xff]  }
0x18d5   :  { %v2975_v46 = vpop.f32.mrb[34].mxu1 }
0x18d6   :  { %v2981_v47 = vmax.f32 %v5102_v44, 0.0  ;;  %v5103_v48 = vadd.f32 %v4430_v42, %v2975_v46  ;;  %v4969_v50 = vpop.f32.mrb[35].mxu1 }
0x18d8   :  { %v3019_v51 = vrot.slane %v2981_v47, 7  ;;  %v2982_v53 = vmax.f32 %v5103_v48, 0.0  ;;  %v3169_v55 = vrot.slane %v2981_v47, 1 }
0x18da   :  { %v3024_v8 = vsel %vm445_vm6, 0.0, %v3019_v51  ;;  %v3020_v12 = vrot.slane %v2982_v53, 7  ;;  %v3098_v57 = vpack.c.bf16 %v2982_v53, %v2981_v47  ;;  %v3170_v58 = vrot.slane %v2982_v53, 1  ;;  %v4483_v53 = vld [vmem:[%s6680_s11 + $0x2] ss:$0 sm:$0xff] }
0x18db   :  { %v3025_v60 = vsel %vm452_vm7, %v3024_v8, 0.0 }
0x18dc   :  { %v3021_v36 = vsel %vm445_vm6, %v3019_v51, %v3020_v12  ;;  %v3171_v3 = vsel %vm573_vm8, %v3169_v55, %v3170_v58  ;;  %v3174_v59 = vsel %vm573_vm8, %v3170_v58, 0.0  ;;  %v4484_v58 = vld [vmem:[%s6681_s12 + $0x2] ss:$0 sm:$0xff] }
0x18dd   :  { %v3026_v61 = vsel %vm452_vm7, %v3021_v36, 0.0  ;;  %v3175_v62 = vsel %vm580_vm9, %v3171_v3, 0.0  ;;  %v3176_v63 = vsel %vm580_vm9, %v3174_v59, 0.0 }
0x18de   :  { %v3177_v1 = vpack.c.bf16 %v3176_v63, %v3175_v62  ;;  %v3027_v2 = vpack.c.bf16 %v3026_v61, %v3025_v60  ;;  %v4490_v61 = vld [vmem:[%s6734_s10 + $0x3] ss:$0 sm:$0xff]  ;;  %s6748_s10 = sld [smem:[#allocation16_spill]] }
0x18e0   :  { %4979 = vmatmul.mubr.msk.bf16.vlgmr.msra.gmra.mrb[36].mxu0 %vm711_vm10, %v3027_v2  ;;  %5003 = vmatmul.mubr.msk.bf16.vlgmr.msra.gmra.mrb[36].mxu1 %vm711_vm10, %v3177_v1 }
0x18e1   :  { %4983 = vmatpush3.bf16.msra.mxu0 %v5237_v35  ;;  %4990 = vmatprep.mubr.msk.bf16.mxu0 %vm5402_vm0, %v5401_v0 }
0x18e2   :  { %4984 = vmatprep.subr.bf16.mxu0 %v5401_v0  ;;  %5018 = vmatprep.mubr.msk.bf16.mxu1 %vm5402_vm0, %v5401_v0 }
0x18e5   :  { %4985 = vmatpush3.bf16.msra.mxu0 %v5238_v49 }
0x18e6   :  { %4986 = vmatprep.subr.bf16.mxu0 %v5401_v0 }
0x18e9   :  { %4987 = vmatpush3.bf16.msra.mxu0 %v5239_v6 }
0x18ea   :  { %4988 = vmatprep.subr.bf16.mxu0 %v5401_v0 }
0x18ed   :  { %4989 = vmatpush3.bf16.msra.mxu0 %v5240_v7 }
0x18ee   :  { %5006 = vmatprep.subr.bf16.mxu0 %v5401_v0 }
0x18f0   :  { %4991 = vmatmul.mubr.msk.bf16.vlgmr.msra.gmra.mrb[40].mxu0 %vm711_vm10, %v3098_v57 }
0x18f1   :  { %5010 = vmatprep.mubr.msk.bf16.mxu0 %vm5402_vm0, %v5401_v0 }
0x19b3   :  { %v3089_v9 = vpop.f32.mrb[36].mxu0  ;;  %v3239_v10 = vpop.f32.mrb[36].mxu1 }
0x19b4   :  { %v4980_v11 = vpop.f32.mrb[37].mxu0  ;;  %v5004_v26 = vpop.f32.mrb[37].mxu1  ;;  %v3096_v17 = vadd.f32 %v4465_v16, %v3089_v9 }
0x19b5   :  { %v3092_v13 = vpop.f32.mrb[38].mxu0  ;;  %v3242_v40 = vpop.f32.mrb[38].mxu1 }
0x19b6   :  { %v4981_v14 = vpop.f32.mrb[39].mxu0  ;;  %v5005_v15 = vpop.f32.mrb[39].mxu1  ;;  %v3097_v54 = vadd.f32 %v4465_v16, %v3092_v13 }
0x19c3   :  { %v3160_v18 = vpop.f32.mrb[40].mxu0 }
0x19c4   :  { %v3167_v56 = vadd.f32 %v3160_v18, %v3096_v17  ;;  %v4992_v19 = vpop.f32.mrb[41].mxu0 }
0x19c5   :  { %v3163_v20 = vpop.f32.mrb[42].mxu0 }
0x19c6   :  { %v3246_v21 = vadd.f32 %v3239_v10, %v3167_v56  ;;  %v3168_v22 = vadd.f32 %v3163_v20, %v3097_v54  ;;  %v4993_v33 = vpop.f32.mrb[43].mxu0 }
0x19c8   :  { %v3247_v52 = vadd.f32 %v3242_v40, %v3168_v22  ;;  %v3248_v24 = vadd.f32 %v3246_v21, %v6281_v23 }
0x19ca   :  { %v3254_v25 = vsel %vm111_vm1, %v3248_v24, 0.0  ;;  %v3249_v27 = vadd.f32 %v3247_v52, %v6284_v5  ;;  %v5241_v5 = vld [vmem:[%s6732_s5 + $0x30] sm:$0xff]  }
0x19cb   :  { %3255 = vadd.xlane.f32.xlu1 %v3254_v25  ;;  %5007 = vmatpush3.bf16.msra.mxu0 %v5241_v5 }
0x19cc   :  { %v3257_v28 = vsel %vm111_vm1, %v3249_v27, 0.0  ;;  %5008 = vmatprep.subr.bf16.mxu0 %v5401_v0 }
0x19cd   :  { %3258 = vadd.xlane.f32.xlu0 %v3257_v28 }
0x19cf   :  { %5009 = vmatpush3.bf16.msra.mxu0 %v5242_v43 }
0x19d0   :  { %5022 = vmatprep.subr.bf16.mxu0 %v5401_v0 }
0x1a58   :  { %v3256_v29 = vpop.xlane.xlu1 %3255 }
0x1a59   :  { %v3260_v30 = vmul.f32 0.03125, %v3256_v29 }
0x1a5a   :  { %v3259_v32 = vpop.xlane.xlu0 %3258 }
0x1a5b   :  { %v3262_v34 = vsub.f32 %v3248_v24, %v3260_v30  ;;  %v3261_v37 = vmul.f32 0.03125, %v3259_v32 }
0x1a5d   :  { %v3263_v4 = vsub.f32 %v3249_v27, %v3261_v37  ;;  %v3264_v39 = vmul.f32 %v3262_v34, %v3262_v34 }
0x1a5f   :  { %v3266_v41 = vsel %vm111_vm1, %v3264_v39, 0.0  ;;  %v3265_v42 = vmul.f32 %v3263_v4, %v3263_v4 }
0x1a60   :  { %3267 = vadd.xlane.f32.xlu1 %v3266_v41 }
0x1a61   :  { %v3269_v23 = vsel %vm111_vm1, %v3265_v42, 0.0 }
0x1a62   :  { %3270 = vadd.xlane.f32.xlu0 %v3269_v23 }
0x1aed   :  { %v3268_v44 = vpop.xlane.xlu1 %3267 }
0x1aee   :  { %v3272_v45 = vmul.f32 0.03125, %v3268_v44 }
0x1aef   :  { %v3271_v46 = vpop.xlane.xlu0 %3270 }
0x1af0   :  { %v3274_v47 = vadd.f32 1e-05, %v3272_v45  ;;  %v3273_v48 = vmul.f32 0.03125, %v3271_v46 }
0x1af2   :  { %5365 = vrsqrt.f32 %v3274_v47  ;;  %v3275_v50 = vadd.f32 1e-05, %v3273_v48 }
0x1af4   :  { %5367 = vrsqrt.f32 %v3275_v50 }
0x1afc   :  { %v5366_v51 = vpop.eup %5365 }
0x1afd   :  { %v3278_v55 = vmul.f32 %v5366_v51, %v3262_v34 }
0x1afe   :  { %v5368_v8 = vpop.eup %5367 }
0x1aff   :  { %v3286_v12 = vmul.f32 %v4483_v53, %v3278_v55  ;;  %v3279_v57 = vmul.f32 %v5368_v8, %v3263_v4 }
0x1b01   :  { %v3287_v36 = vmul.f32 %v4483_v53, %v3279_v57  ;;  %v6419_v3 = vadd.f32 %v4484_v58, %v3286_v12 }
0x1b03   :  { %v6421_v59 = vadd.f32 %v4484_v58, %v3287_v36 }
0x1b05   :  { %v3296_v60 = vpack.c.bf16 %v6421_v59, %v6419_v3 }
0x1b07   :  { %5011 = vmatmul.mubr.msk.bf16.vlgmr.msra.gmra.mrb[44].mxu0 %vm111_vm1, %v3296_v60 }
0x1b08   :  { %5026 = vmatprep.mubr.msk.bf16.mxu0 %vm5402_vm0, %v5401_v0 }
0x1bda   :  { %v3359_v62 = vpop.f32.mrb[44].mxu0 }
0x1bdb   :  { %v6431_v63 = vadd.f32 %v4490_v61, %v3359_v62  ;;  %v5012_v35 = vpop.f32.mrb[45].mxu0 }
0x1bdc   :  { %v3362_v1 = vpop.f32.mrb[46].mxu0 }
0x1bdd   :  { %v6433_v2 = vadd.f32 %v4490_v61, %v3362_v1  ;;  %3368 = vrot.lane.b32.xlu1 %v6431_v63, %s6743_s4  ;;  %v5013_v49 = vpop.f32.mrb[47].mxu0 }
0x1bdf   :  { %3370 = vrot.lane.b32.xlu0 %v6433_v2, %s6743_s4 }
0x1c4f   :  { %v3369_v6 = vpop.permute.xlu1 %3368 }
0x1c50   :  { %v3374_v7 = vmul.f32 %v3369_v6, %v6431_v63  ;;  %v3405_v9 = vmul.f32 %v3369_v6, %v6433_v2 }
0x1c51   :  { %v3371_v10 = vpop.permute.xlu0 %3370 }
0x1c52   :  { %3438 = vrot.lane.b32.xlu1 %v3374_v7, %s6744_s29  ;;  %3475 = vrot.lane.b32.xlu0 %v3405_v9, %s6744_s29  ;;  %v3375_v11 = vmul.f32 %v3371_v10, %v6431_v63  ;;  %v3406_v26 = vmul.f32 %v3371_v10, %v6433_v2  ;;  %v3376_v13 = vsel %vm166_vm2, %v3374_v7, 0.0  ;;  %v3407_v40 = vsel %vm166_vm2, %v3405_v9, 0.0 }
0x1c54   :  { %v3410_v14 = vsel %vm166_vm2, %v3406_v26, 0.0  ;;  %v3379_v15 = vsel %vm166_vm2, %v3375_v11, 0.0 }
0x1c56   :  { %3440 = vrot.lane.b32.xlu1 %v3375_v11, %s6744_s29 }
0x1c5a   :  { %3477 = vrot.lane.b32.xlu1 %v3406_v26, %s6744_s29 }
0x1c71   :  { %3377 = vadd.xlane.f32.xlu0 %v3376_v13 }
0x1c75   :  { %3408 = vadd.xlane.f32.xlu0 %v3407_v40 }
0x1c79   :  { %3411 = vadd.xlane.f32.xlu0 %v3410_v14 }
0x1c7e   :  { %3380 = vadd.xlane.f32.xlu1 %v3379_v15 }
0x1cc4   :  { %v3439_v16 = vpop.permute.xlu1 %3438  ;;  %v3476_v18 = vpop.permute.xlu0 %3475 }
0x1cc5   :  { %v3444_v17 = vsel %vm166_vm2, %v3439_v16, 0.0  ;;  %v3481_v19 = vsel %vm166_vm2, %v3476_v18, 0.0 }
0x1cc6   :  { %3445 = vadd.xlane.f32.xlu1 %v3444_v17 }
0x1cc8   :  { %v3441_v54 = vpop.permute.xlu1 %3440 }
0x1cc9   :  { %v3447_v56 = vsel %vm166_vm2, %v3441_v54, 0.0 }
0x1cca   :  { %3482 = vadd.xlane.f32.xlu1 %v3481_v19  ;;  %3448 = vadd.xlane.f32.xlu0 %v3447_v56 }
0x1ccc   :  { %v3478_v20 = vpop.permute.xlu1 %3477 }
0x1ccd   :  { %v3484_v21 = vsel %vm166_vm2, %v3478_v20, 0.0 }
0x1cce   :  { %3485 = vadd.xlane.f32.xlu0 %v3484_v21 }
0x1cfe   :  { %v3378_v22 = vpop.xlane.xlu0 %3377 }
0x1cff   :  { %v3382_v32 = vmul.f32 0.25, %v3378_v22 }
0x1d02   :  { %v3409_v33 = vpop.xlane.xlu0 %3408 }
0x1d03   :  { %v3413_v24 = vmul.f32 0.25, %v3409_v33 }
0x1d06   :  { %v3412_v52 = vpop.xlane.xlu0 %3411 }
0x1d07   :  { %v3414_v25 = vmul.f32 0.25, %v3412_v52 }
0x1d09   :  { %v3415_v27 = vmax.f32 %v3413_v24, %v3414_v25 }
0x1d0b   :  { %v3416_v28 = vsub.f32 %v3413_v24, %v3415_v27  ;;  %v3417_v29 = vsub.f32 %v3414_v25, %v3415_v27  ;;  %v3381_v30 = vpop.xlane.xlu1 %3380 }
0x1d0c   :  { %v3383_v34 = vmul.f32 0.25, %v3381_v30 }
0x1d0d   :  { %v3418_v37 = vmul.f32 1.442695, %v3416_v28  ;;  %v3420_v4 = vmul.f32 1.442695, %v3417_v29  ;;  %v5243_v29 = vld [vmem:[%s6735_s6 + $0x30] sm:$0xff]  }
0x1d0e   :  { %v3384_v39 = vmax.f32 %v3382_v32, %v3383_v34  ;;  %5015 = vmatpush3.bf16.msra.mxu1 %v5243_v29 }
0x1d0f   :  { %5369 = vpow2.f32 %v3418_v37  ;;  %v5244_v37 = vld [vmem:[%s6735_s6 + $0x38] sm:$0xff]   ;;  %5016 = vmatprep.subr.bf16.mxu1 %v5401_v0 }
0x1d10   :  { %5371 = vpow2.f32 %v3420_v4  ;;  %v3385_v41 = vsub.f32 %v3382_v32, %v3384_v39  ;;  %v3386_v42 = vsub.f32 %v3383_v34, %v3384_v39 }
0x1d12   :  { %v3387_v23 = vmul.f32 1.442695, %v3385_v41  ;;  %v3389_v5 = vmul.f32 1.442695, %v3386_v42  ;;  %5017 = vmatpush3.bf16.msra.mxu1 %v5244_v37 }
0x1d13   :  { %5046 = vmatprep.subr.bf16.mxu1 %v5401_v0 }
0x1d14   :  { %5373 = vpow2.f32 %v3387_v23 }
0x1d15   :  { %5375 = vpow2.f32 %v3389_v5 }
0x1d19   :  { %v5370_v43 = vpop.eup %5369 }
0x1d1a   :  { %v5372_v44 = vpop.eup %5371 }
0x1d1b   :  { %v3422_v45 = vadd.f32 %v5372_v44, %v5370_v43 }
0x1d1d   :  { %5377 = vrcp.f32 %v3422_v45 }
0x1d1e   :  { %v5374_v46 = vpop.eup %5373 }
0x1d1f   :  { %v5376_v47 = vpop.eup %5375 }
0x1d20   :  { %v3391_v48 = vadd.f32 %v5376_v47, %v5374_v46 }
0x1d22   :  { %5379 = vrcp.f32 %v3391_v48 }
0x1d27   :  { %v5378_v50 = vpop.eup %5377 }
0x1d28   :  { %v3424_v51 = vmul.f32 %v5378_v50, %v5370_v43  ;;  %v3425_v53 = vmul.f32 %v5378_v50, %v5372_v44 }
0x1d2a   :  { %v3426_v55 = vmul.f32 %v3424_v51, %v6431_v63  ;;  %v3427_v8 = vmul.f32 %v3425_v53, %v6433_v2 }
0x1d2c   :  { %v5380_v12 = vpop.eup %5379  ;;  %v3428_v57 = vsel %vm188_vm3, %v3426_v55, 0.0  ;;  %v3429_v58 = vsel %vm188_vm3, %v3427_v8, 0.0 }
0x1d2d   :  { %v3430_v36 = vadd.f32 %v3429_v58, %v3428_v57  ;;  %v3393_v60 = vmul.f32 %v5380_v12, %v5374_v46  ;;  %v3394_v61 = vmul.f32 %v5380_v12, %v5376_v47  ;;  %v4499_v57 = vld [vmem:[%s6736_s30 + $0x3] ss:$0 sm:$0xff] }
0x1d2f   :  { %3432 = vrot.lane.b32.xlu0 %v3430_v36, %s6745_s7  ;;  %v3395_v62 = vmul.f32 %v3393_v60, %v6431_v63  ;;  %v3396_v35 = vmul.f32 %v3394_v61, %v6433_v2 }
0x1d31   :  { %v3397_v1 = vsel %vm188_vm3, %v3395_v62, 0.0  ;;  %v3398_v49 = vsel %vm188_vm3, %v3396_v35, 0.0 }
0x1d32   :  { %v3399_v6 = vadd.f32 %v3398_v49, %v3397_v1 }
0x1d34   :  { %3401 = vrot.lane.b32.xlu1 %v3399_v6, %s6745_s7 }
0x1d53   :  { %v3446_v7 = vpop.xlane.xlu1 %3445 }
0x1d54   :  { %v3450_v10 = vmul.f32 0.25, %v3446_v7 }
0x1d57   :  { %v3449_v9 = vpop.xlane.xlu0 %3448  ;;  %v3483_v26 = vpop.xlane.xlu1 %3482 }
0x1d58   :  { %v3451_v11 = vmul.f32 0.25, %v3449_v9  ;;  %v3487_v14 = vmul.f32 0.25, %v3483_v26 }
0x1d5a   :  { %v3452_v13 = vmax.f32 %v3450_v10, %v3451_v11 }
0x1d5b   :  { %v3486_v40 = vpop.xlane.xlu0 %3485 }
0x1d5c   :  { %v3453_v15 = vsub.f32 %v3450_v10, %v3452_v13  ;;  %v3454_v16 = vsub.f32 %v3451_v11, %v3452_v13  ;;  %v3488_v17 = vmul.f32 0.25, %v3486_v40 }
0x1d5e   :  { %v3455_v18 = vmul.f32 1.442695, %v3453_v15  ;;  %v3457_v54 = vmul.f32 1.442695, %v3454_v16  ;;  %v3489_v56 = vmax.f32 %v3487_v14, %v3488_v17 }
0x1d60   :  { %5381 = vpow2.f32 %v3455_v18  ;;  %v3490_v19 = vsub.f32 %v3487_v14, %v3489_v56  ;;  %v3491_v20 = vsub.f32 %v3488_v17, %v3489_v56  ;;  %v5246_v17 = vld [vmem:[%s6737_s3 + $0x98] sm:$0xff]   ;;  %v5251_v18 = vld [vmem:[%s6738_s8 + $0x120] sm:$0xff]  }
0x1d61   :  { %5383 = vpow2.f32 %v3457_v54 }
0x1d62   :  { %v3492_v21 = vmul.f32 1.442695, %v3490_v19  ;;  %v3494_v22 = vmul.f32 1.442695, %v3491_v20 }
0x1d64   :  { %5385 = vpow2.f32 %v3492_v21 }
0x1d65   :  { %5387 = vpow2.f32 %v3494_v22 }
0x1d6a   :  { %v5382_v33 = vpop.eup %5381 }
0x1d6b   :  { %v5384_v52 = vpop.eup %5383 }
0x1d6c   :  { %v3459_v24 = vadd.f32 %v5384_v52, %v5382_v33 }
0x1d6e   :  { %v5386_v25 = vpop.eup %5385  ;;  %5389 = vrcp.f32 %v3459_v24 }
0x1d6f   :  { %v5388_v27 = vpop.eup %5387 }
0x1d70   :  { %v3496_v28 = vadd.f32 %v5388_v27, %v5386_v25 }
0x1d72   :  { %5391 = vrcp.f32 %v3496_v28 }
0x1d78   :  { %v5390_v30 = vpop.eup %5389 }
0x1d79   :  { %v3461_v32 = vmul.f32 %v5390_v30, %v5382_v33  ;;  %v3462_v34 = vmul.f32 %v5390_v30, %v5384_v52  ;;  %v4505_v52 = vld [vmem:[%s6739_s28 + $0x3] ss:$0 sm:$0xff] }
0x1d7b   :  { %v3463_v4 = vmul.f32 %v3461_v32, %v6431_v63  ;;  %v3464_v39 = vmul.f32 %v3462_v34, %v6433_v2 }
0x1d7c   :  { %v5392_v41 = vpop.eup %5391 }
0x1d7d   :  { %v3465_v42 = vsel %vm257_vm4, %v3463_v4, 0.0  ;;  %v3466_v23 = vsel %vm257_vm4, %v3464_v39, 0.0  ;;  %v3498_v5 = vmul.f32 %v5392_v41, %v5386_v25  ;;  %v3499_v43 = vmul.f32 %v5392_v41, %v5388_v27  ;;  %v4506_v25 = vld [vmem:[%s6746_s19 + $0x3] ss:$0 sm:$0xff] }
0x1d7e   :  { %v3467_v44 = vadd.f32 %v3466_v23, %v3465_v42 }
0x1d7f   :  { %v3500_v45 = vmul.f32 %v3498_v5, %v6431_v63  ;;  %v3501_v46 = vmul.f32 %v3499_v43, %v6433_v2  ;;  %v5247_v5 = vld [vmem:[%s6737_s3 + $0xa0] sm:$0xff]  }
0x1d80   :  { %3469 = vrot.lane.b32.xlu1 %v3467_v44, %s6745_s7  ;;  %v5248_v44 = vld [vmem:[%s6737_s3 + $0xa8] sm:$0xff]  }
0x1d81   :  { %v3502_v47 = vsel %vm257_vm4, %v3500_v45, 0.0  ;;  %v3503_v48 = vsel %vm257_vm4, %v3501_v46, 0.0  ;;  %v5249_v45 = vld [vmem:[%s6737_s3 + $0xb0] sm:$0xff]  }
0x1d82   :  { %v3504_v50 = vadd.f32 %v3503_v48, %v3502_v47  ;;  %v5250_v48 = vld [vmem:[%s6737_s3 + $0xb8] sm:$0xff]  }
0x1d84   :  { %3506 = vrot.lane.b32.xlu1 %v3504_v50, %s6745_s7  ;;  %s6749_s7 = sld [smem:[#allocation17_spill]] }
0x1da1   :  { %v3433_v51 = vpop.permute.xlu0 %3432 }
0x1da2   :  { %3435 = vst.msk [vmem:[#allocation2 + $0x8] sm:$0xff] %vm166_vm2, %v3433_v51 }
0x1da6   :  { %v3402_v53 = vpop.permute.xlu1 %3401 }
0x1da7   :  { %3404 = vst.msk [vmem:[#allocation2] sm:$0xff] %vm166_vm2, %v3402_v53 }
0x1df2   :  { %v3470_v55 = vpop.permute.xlu1 %3469 }
0x1df3   :  { %3472 = vst.msk [vmem:[#allocation2] sm:$0xff] %vm265_vm5, %v3470_v55 }
0x1df6   :  { %v3507_v63 = vpop.permute.xlu1 %3506 }
0x1df7   :  { %3509 = vst.msk [vmem:[#allocation2 + $0x8] sm:$0xff] %vm265_vm5, %v3507_v63 }
0x1dfa   :  { %v3510_v2 = vld [vmem:[#allocation2] sm:$0xff] }
0x1dfe   :  { %v3511_v8 = vld [vmem:[#allocation2 + $0x8] sm:$0xff] }
0x1dff   :  { %v3512_v12 = vpack.c.bf16 %v3511_v8, %v3510_v2  ;;  %v5252_v2 = vld [vmem:[%s6738_s8 + $0x160] sm:$0xff]  }
0x1e01   :  { %5019 = vmatmul.mubr.msk.bf16.vlgmr.msra.gmra.mrb[40].mxu1 %vm111_vm1, %v3512_v12  ;;  %v5253_v12 = vld [vmem:[%s6738_s8 + $0x128] sm:$0xff]  }
0x1e02   :  { %5054 = vmatprep.mubr.msk.bf16.mxu1 %vm5402_vm0, %v5401_v0  ;;  %5047 = vmatpush3.bf16.msra.mxu1 %v5251_v18 }
0x1e03   :  { %5048 = vmatprep.subr.bf16.mxu1 %v5401_v0 }
0x1e06   :  { %5049 = vmatpush3.bf16.msra.mxu1 %v5253_v12 }
0x1e07   :  { %5050 = vmatprep.subr.bf16.mxu1 %v5401_v0 }
0x1ed4   :  { %v3575_v58 = vpop.f32.mrb[40].mxu1 }
0x1ed5   :  { %v3576_v36 = vadd.f32 %v4499_v57, %v3575_v58  ;;  %v5020_v60 = vpop.f32.mrb[41].mxu1  ;;  %v5255_v58 = vld [vmem:[%s6738_s8 + $0x130] sm:$0xff]  }
0x1ed6   :  { %v3578_v61 = vpop.f32.mrb[42].mxu1  ;;  %5051 = vmatpush3.bf16.msra.mxu1 %v5255_v58  ;;  %v5257_v60 = vld [vmem:[%s6738_s8 + $0x138] sm:$0xff]  }
0x1ed7   :  { %v3582_v62 = vadd.f32 %v3576_v36, %v6419_v3  ;;  %v3579_v35 = vadd.f32 %v4499_v57, %v3578_v61  ;;  %v5021_v1 = vpop.f32.mrb[43].mxu1  ;;  %v5254_v57 = vld [vmem:[%s6738_s8 + $0x168] sm:$0xff]   ;;  %v5256_v36 = vld [vmem:[%s6738_s8 + $0x170] sm:$0xff]   ;;  %5052 = vmatprep.subr.bf16.mxu1 %v5401_v0  ;;  %v5258_v61 = vld [vmem:[%s6738_s8 + $0x178] sm:$0xff]  }
0x1ed9   :  { %v3583_v49 = vadd.f32 %v3579_v35, %v6421_v59  ;;  %v3588_v6 = vsel %vm111_vm1, %v3582_v62, 0.0  ;;  %v5245_v59 = vld [vmem:[%s6737_s3 + $0x90] sm:$0xff]  }
0x1eda   :  { %3589 = vadd.xlane.f32.xlu0 %v3588_v6  ;;  %5023 = vmatpush3.bf16.msra.mxu0 %v5245_v59 }
0x1edb   :  { %v3591_v7 = vsel %vm111_vm1, %v3583_v49, 0.0  ;;  %5024 = vmatprep.subr.bf16.mxu0 %v5401_v0  ;;  %5053 = vmatpush3.bf16.msra.mxu1 %v5257_v60 }
0x1edc   :  { %3592 = vadd.xlane.f32.xlu1 %v3591_v7  ;;  %5058 = vmatprep.subr.bf16.mxu1 %v5401_v0 }
0x1ede   :  { %5025 = vmatpush3.bf16.msra.mxu0 %v5246_v17 }
0x1edf   :  { %5030 = vmatprep.subr.bf16.mxu0 %v5401_v0 }
0x1f67   :  { %v3590_v9 = vpop.xlane.xlu0 %3589 }
0x1f68   :  { %v3594_v10 = vmul.f32 0.03125, %v3590_v9 }
0x1f69   :  { %v3593_v11 = vpop.xlane.xlu1 %3592 }
0x1f6a   :  { %v3596_v26 = vsub.f32 %v3582_v62, %v3594_v10  ;;  %v3595_v13 = vmul.f32 0.03125, %v3593_v11  ;;  %v4520_v62 = vld [vmem:[%s6741_s0 + $0x3] ss:$0 sm:$0xff]  ;;  %s6751_s0 = sld [smem:[#allocation19_spill]] }
0x1f6c   :  { %v3597_v40 = vsub.f32 %v3583_v49, %v3595_v13  ;;  %v3598_v14 = vmul.f32 %v3596_v26, %v3596_v26 }
0x1f6e   :  { %v3600_v15 = vsel %vm111_vm1, %v3598_v14, 0.0  ;;  %v3599_v3 = vmul.f32 %v3597_v40, %v3597_v40 }
0x1f6f   :  { %3601 = vadd.xlane.f32.xlu0 %v3600_v15 }
0x1f70   :  { %v3603_v16 = vsel %vm111_vm1, %v3599_v3, 0.0 }
0x1f73   :  { %3604 = vadd.xlane.f32.xlu0 %v3603_v16 }
0x1ffc   :  { %v3602_v54 = vpop.xlane.xlu0 %3601 }
0x1ffd   :  { %v3606_v56 = vmul.f32 0.03125, %v3602_v54 }
0x1fff   :  { %v3608_v19 = vadd.f32 1e-05, %v3606_v56 }
0x2000   :  { %v3605_v20 = vpop.xlane.xlu0 %3604 }
0x2001   :  { %5393 = vrsqrt.f32 %v3608_v19  ;;  %v3607_v21 = vmul.f32 0.03125, %v3605_v20  ;;  %v5259_v20 = vld [vmem:[%s6738_s8 + $0x140] sm:$0xff]  }
0x2003   :  { %v3609_v22 = vadd.f32 1e-05, %v3607_v21 }
0x2005   :  { %5395 = vrsqrt.f32 %v3609_v22 }
0x200b   :  { %v5394_v33 = vpop.eup %5393 }
0x200c   :  { %v3612_v24 = vmul.f32 %v5394_v33, %v3596_v26  ;;  %v5260_v33 = vld [vmem:[%s6738_s8 + $0x148] sm:$0xff]  }
0x200e   :  { %v3620_v27 = vmul.f32 %v4505_v52, %v3612_v24  ;;  %v5262_v24 = vld [vmem:[%s6738_s8 + $0x158] sm:$0xff]  }
0x200f   :  { %v5396_v28 = vpop.eup %5395 }
0x2010   :  { %v6517_v29 = vadd.f32 %v4506_v25, %v3620_v27  ;;  %v3613_v30 = vmul.f32 %v5396_v28, %v3597_v40 }
0x2012   :  { %v3621_v32 = vmul.f32 %v4505_v52, %v3613_v30  ;;  %v3654_v34 = vrot.slane %v6517_v29, 7  ;;  %v3780_v50 = vrot.slane %v6517_v29, 1  ;;  %v5261_v52 = vld [vmem:[%s6738_s8 + $0x150] sm:$0xff]  }
0x2014   :  { %v6520_v37 = vadd.f32 %v4506_v25, %v3621_v32  ;;  %v3659_v39 = vsel %vm445_vm6, 0.0, %v3654_v34 }
0x2015   :  { %v3660_v42 = vsel %vm452_vm7, %v3659_v39, 0.0 }
0x2016   :  { %v3655_v4 = vrot.slane %v6520_v37, 7  ;;  %v3721_v46 = vpack.c.bf16 %v6520_v37, %v6517_v29  ;;  %v3781_v47 = vrot.slane %v6520_v37, 1 }
0x2018   :  { %v3656_v41 = vsel %vm445_vm6, %v3654_v34, %v3655_v4  ;;  %v3782_v51 = vsel %vm573_vm8, %v3780_v50, %v3781_v47  ;;  %v3785_v53 = vsel %vm573_vm8, %v3781_v47, 0.0 }
0x2019   :  { %v3661_v23 = vsel %vm452_vm7, %v3656_v41, 0.0  ;;  %v3786_v55 = vsel %vm580_vm9, %v3782_v51, 0.0  ;;  %v3787_v63 = vsel %vm580_vm9, %v3785_v53, 0.0  ;;  %v4555_v41 = vld [vmem:[%s6742_s2 + $0x3] ss:$0 sm:$0xff] }
0x201a   :  { %v3662_v43 = vpack.c.bf16 %v3661_v23, %v3660_v42  ;;  %v3788_v8 = vpack.c.bf16 %v3787_v63, %v3786_v55 }
0x201c   :  { %5027 = vmatmul.mubr.msk.bf16.vlgmr.msra.gmra.mrb[48].mxu0 %vm111_vm1, %v3662_v43 }
0x201d   :  { %5031 = vmatpush3.bf16.msra.mxu0 %v5247_v5  ;;  %5034 = vmatprep.mubr.msk.bf16.mxu0 %vm5402_vm0, %v5401_v0 }
0x201e   :  { %5032 = vmatprep.subr.bf16.mxu0 %v5401_v0 }
0x2021   :  { %5033 = vmatpush3.bf16.msra.mxu0 %v5248_v44 }
0x2022   :  { %5038 = vmatprep.subr.bf16.mxu0 %v5401_v0 }
0x2028   :  { %5035 = vmatmul.mubr.msk.bf16.vlgmr.msra.gmra.mrb[48].mxu0 %vm111_vm1, %v3721_v46 }
0x2029   :  { %5039 = vmatpush3.bf16.msra.mxu0 %v5249_v45  ;;  %5042 = vmatprep.mubr.msk.bf16.mxu0 %vm5402_vm0, %v5401_v0 }
0x202a   :  { %5040 = vmatprep.subr.bf16.mxu0 %v5401_v0 }
0x202d   :  { %5041 = vmatpush3.bf16.msra.mxu0 %v5250_v48 }
0x202e   :  { %5070 = vmatprep.subr.bf16.mxu0 %v5401_v0 }
0x2034   :  { %5043 = vmatmul.mubr.msk.bf16.vlgmr.msra.gmra.mrb[48].mxu0 %vm111_vm1, %v3788_v8  ;;  %v32_v8 = vstv %s6747_s13 }
0x2035   :  { %5071 = vmatpush3.bf16.msra.mxu0 %v5252_v2  ;;  %5078 = vmatprep.mubr.msk.bf16.mxu0 %vm5402_vm0, %v5401_v0  ;;  %v5407_v2 = vmov 0   ;;  %33 = vst [vmem:[#allocation3] sm:$0x1] %v32_v8 }
0x2036   :  { %5072 = vmatprep.subr.bf16.mxu0 %v5401_v0  ;;  %5161 = vset.pattern.permute.xlu1 %v5407_v2 }
0x2037   :  { %5162 = vset.pattern.permute.xlu0 %v5407_v2 }
0x2039   :  { %5073 = vmatpush3.bf16.msra.mxu0 %v5254_v57 }
0x203a   :  { %5074 = vmatprep.subr.bf16.mxu0 %v5401_v0 }
0x203d   :  { %5075 = vmatpush3.bf16.msra.mxu0 %v5256_v36 }
0x203e   :  { %5076 = vmatprep.subr.bf16.mxu0 %v5401_v0 }
0x2041   :  { %5077 = vmatpush3.bf16.msra.mxu0 %v5258_v61 }
0x2107   :  { %v3838_v35 = vpop.f32.mrb[48].mxu0 }
0x2108   :  { %v5104_v1 = vadd.f32 %v4520_v62, %v3838_v35  ;;  %v5044_v49 = vpop.f32.mrb[49].mxu0 }
0x2109   :  { %v3841_v6 = vpop.f32.mrb[50].mxu0  ;;  %v5263_v49 = vld [vmem:[%s6748_s10] sm:$0xff]  }
0x210a   :  { %v3847_v7 = vmax.f32 %v5104_v1, 0.0  ;;  %v5105_v9 = vadd.f32 %v4520_v62, %v3841_v6  ;;  %v5045_v10 = vpop.f32.mrb[51].mxu0  ;;  %v2343_v1 = vld [vmem:[#allocation3] sm:$0x1]  ;;  %v5264_v6 = vld [vmem:[%s6748_s10 + $0x8] sm:$0xff]  }
0x210b   :  { %v2351_v10 = vsub.s32 0, %v5663_v38  ;;  %v4573_v38 = vld [vmem:[%s6680_s11 + $0x3] ss:$0 sm:$0xff] }
0x210c   :  { %v3885_v11 = vrot.slane %v3847_v7, 7  ;;  %v3848_v26 = vmax.f32 %v5105_v9, 0.0  ;;  %v4035_v13 = vrot.slane %v3847_v7, 1 }
0x210e   :  { %v3890_v40 = vsel %vm445_vm6, 0.0, %v3885_v11  ;;  %v3886_v14 = vrot.slane %v3848_v26, 7  ;;  %v3964_v15 = vpack.c.bf16 %v3848_v26, %v3847_v7  ;;  %v4036_v3 = vrot.slane %v3848_v26, 1 }
0x210f   :  { %v3891_v18 = vsel %vm452_vm7, %v3890_v40, 0.0 }
0x2110   :  { %v3887_v16 = vsel %vm445_vm6, %v3885_v11, %v3886_v14  ;;  %v4037_v59 = vsel %vm573_vm8, %v4035_v13, %v4036_v3  ;;  %v4040_v17 = vsel %vm573_vm8, %v4036_v3, 0.0 }
0x2111   :  { %v3892_v54 = vsel %vm452_vm7, %v3887_v16, 0.0  ;;  %v4041_v56 = vsel %vm580_vm9, %v4037_v59, 0.0  ;;  %v4042_v19 = vsel %vm580_vm9, %v4040_v17, 0.0 }
0x2112   :  { %v4043_v21 = vpack.c.bf16 %v4042_v19, %v4041_v56  ;;  %v3893_v22 = vpack.c.bf16 %v3892_v54, %v3891_v18  ;;  %v4574_v54 = vld [vmem:[%s6681_s12 + $0x3] ss:$0 sm:$0xff] }
0x2114   :  { %5055 = vmatmul.mubr.msk.bf16.vlgmr.msra.gmra.mrb[44].mxu1 %vm711_vm10, %v3893_v22  ;;  %5079 = vmatmul.mubr.msk.bf16.vlgmr.msra.gmra.mrb[52].mxu0 %vm711_vm10, %v4043_v21  ;;  %v4575_v21 = vld [vmem:[%s6750_s17] ss:$0 sm:$0xff] }
0x2115   :  { %5059 = vmatpush3.bf16.msra.mxu1 %v5259_v20  ;;  %5066 = vmatprep.mubr.msk.bf16.mxu1 %vm5402_vm0, %v5401_v0 }
0x2116   :  { %5060 = vmatprep.subr.bf16.mxu1 %v5401_v0 }
0x2119   :  { %5061 = vmatpush3.bf16.msra.mxu1 %v5260_v33 }
0x211a   :  { %5062 = vmatprep.subr.bf16.mxu1 %v5401_v0 }
0x211d   :  { %5063 = vmatpush3.bf16.msra.mxu1 %v5261_v52 }
0x211e   :  { %5064 = vmatprep.subr.bf16.mxu1 %v5401_v0 }
0x2121   :  { %5065 = vmatpush3.bf16.msra.mxu1 %v5262_v24 }
0x2122   :  { %5082 = vmatprep.subr.bf16.mxu1 %v5401_v0 }
0x2124   :  { %5067 = vmatmul.mubr.msk.bf16.vlgmr.msra.gmra.mrb[48].mxu1 %vm711_vm10, %v3964_v15 }
0x2125   :  { %5086 = vmatprep.mubr.msk.bf16.mxu1 %vm5402_vm0, %v5401_v0  ;;  %5083 = vmatpush3.bf16.msra.mxu1 %v5263_v49 }
0x2126   :  { %5084 = vmatprep.subr.bf16.mxu1 %v5401_v0 }
0x2129   :  { %5085 = vmatpush3.bf16.msra.mxu1 %v5264_v6 }
0x21e7   :  { %v3955_v25 = vpop.f32.mrb[44].mxu1  ;;  %v4105_v27 = vpop.f32.mrb[52].mxu0 }
0x21e8   :  { %v5056_v28 = vpop.f32.mrb[45].mxu1  ;;  %v5080_v30 = vpop.f32.mrb[53].mxu0  ;;  %v3962_v42 = vadd.f32 %v4555_v41, %v3955_v25 }
0x21e9   :  { %v3958_v32 = vpop.f32.mrb[46].mxu1  ;;  %v4108_v34 = vpop.f32.mrb[54].mxu0 }
0x21ea   :  { %v5057_v4 = vpop.f32.mrb[47].mxu1  ;;  %v5081_v39 = vpop.f32.mrb[55].mxu0  ;;  %v3963_v5 = vadd.f32 %v4555_v41, %v3958_v32 }
0x21f7   :  { %v4026_v23 = vpop.f32.mrb[48].mxu1 }
0x21f8   :  { %v4033_v43 = vadd.f32 %v4026_v23, %v3962_v42  ;;  %v5068_v44 = vpop.f32.mrb[49].mxu1 }
0x21f9   :  { %v4029_v45 = vpop.f32.mrb[50].mxu1 }
0x21fa   :  { %v4112_v46 = vadd.f32 %v4105_v27, %v4033_v43  ;;  %v4034_v47 = vadd.f32 %v4029_v45, %v3963_v5  ;;  %v5069_v48 = vpop.f32.mrb[51].mxu1 }
0x21fc   :  { %v4113_v50 = vadd.f32 %v4108_v34, %v4034_v47  ;;  %v4114_v51 = vadd.f32 %v4112_v46, %v6517_v29 }
0x21fe   :  { %v4120_v53 = vsel %vm111_vm1, %v4114_v51, 0.0  ;;  %v4115_v55 = vadd.f32 %v4113_v50, %v6520_v37 }
0x21ff   :  { %4121 = vadd.xlane.f32.xlu1 %v4120_v53 }
0x2200   :  { %v4123_v63 = vsel %vm111_vm1, %v4115_v55, 0.0 }
0x2201   :  { %4124 = vadd.xlane.f32.xlu0 %v4123_v63 }
0x228c   :  { %v4122_v12 = vpop.xlane.xlu1 %4121 }
0x228d   :  { %v4126_v57 = vmul.f32 0.03125, %v4122_v12 }
0x228e   :  { %v4125_v58 = vpop.xlane.xlu0 %4124 }
0x228f   :  { %v4128_v29 = vsub.f32 %v4114_v51, %v4126_v57  ;;  %v4127_v36 = vmul.f32 0.03125, %v4125_v58 }
0x2291   :  { %v4129_v60 = vsub.f32 %v4115_v55, %v4127_v36  ;;  %v4130_v61 = vmul.f32 %v4128_v29, %v4128_v29 }
0x2293   :  { %v4132_v37 = vsel %vm111_vm1, %v4130_v61, 0.0  ;;  %v4131_v62 = vmul.f32 %v4129_v60, %v4129_v60 }
0x2294   :  { %4133 = vadd.xlane.f32.xlu1 %v4132_v37 }
0x2295   :  { %v4135_v35 = vsel %vm111_vm1, %v4131_v62, 0.0 }
0x2296   :  { %4136 = vadd.xlane.f32.xlu0 %v4135_v35 }
0x22a5   :  { %2346 = vperm.xlu1 %5161, %v2343_v1  }
0x2321   :  { %v4134_v7 = vpop.xlane.xlu1 %4133 }
0x2322   :  { %v4138_v9 = vmul.f32 0.03125, %v4134_v7 }
0x2323   :  { %v4137_v11 = vpop.xlane.xlu0 %4136 }
0x2324   :  { %v4140_v26 = vadd.f32 1e-05, %v4138_v9  ;;  %v4139_v13 = vmul.f32 0.03125, %v4137_v11 }
0x2325   :  { %v2347_v40 = vpop.permute.xlu1 %2346 }
0x2326   :  { %5397 = vrsqrt.f32 %v4140_v26  ;;  %v4141_v14 = vadd.f32 1e-05, %v4139_v13  ;;  %v2352_v15 = vrot.slane %v2347_v40, %v2351_v10 }
0x2328   :  { %5399 = vrsqrt.f32 %v4141_v14  ;;  %v2429_v0 = vadd.f32 %v6252_v31, %v2352_v15 }
0x232a   :  { %2433 = vst.msk [vmem:[%s6749_s7] sm:$0x1] %vm2432_vm12, %v2429_v0 }
0x2330   :  { %v5398_v3 = vpop.eup %5397 }
0x2331   :  { %v4144_v16 = vmul.f32 %v5398_v3, %v4128_v29 }
0x2332   :  { %v5400_v59 = vpop.eup %5399 }
0x2333   :  { %v4152_v17 = vmul.f32 %v4573_v38, %v4144_v16  ;;  %v4145_v18 = vmul.f32 %v5400_v59, %v4129_v60 }
0x2335   :  { %v4153_v56 = vmul.f32 %v4573_v38, %v4145_v18  ;;  %v4160_v19 = vadd.f32 %v4574_v54, %v4152_v17 }
0x2337   :  { %v4161_v31 = vadd.f32 %v4574_v54, %v4153_v56 }
0x2339   :  { %v4162_v20 = vpack.c.bf16 %v4161_v31, %v4160_v19 }
0x233b   :  { %5087 = vmatmul.mubr.msk.bf16.vlgmr.msra.gmra.mrb[52].mxu1 %vm111_vm1, %v4162_v20 }
0x240e   :  { %v4223_v22 = vpop.f32.mrb[52].mxu1 }
0x240f   :  { %v4224_v33 = vadd.f32 %v4575_v21, %v4223_v22  ;;  %v5088_v52 = vpop.f32.mrb[53].mxu1 }
0x2410   :  { %v4226_v24 = vpop.f32.mrb[54].mxu1 }
0x2411   :  { %4230 = vst [vmem:[%s6751_s0] sm:$0xff] %v4224_v33  ;;  %v4227_v25 = vadd.f32 %v4575_v21, %v4226_v24  ;;  %v5089_v27 = vpop.f32.mrb[55].mxu1 }
0x2413   :  { %4231 = vst [vmem:[%s6751_s0 + $0x8] sm:$0xff] %v4227_v25 }

</bundles_post_ra>
